<compile_context>
chip_gen: v5e
topology: v5e:2x2
jax: 0.10.0
libtpu: 0.0.40
codegen_flags: <defaults>
</compile_context>

<pallas_src>
import functools
import math

import jax
import jax.numpy as jnp
import numpy as np
from jax import lax
from jax.experimental import pallas as pl
from jax.experimental.pallas import tpu as pltpu


def make_divisible(value, divisor, min_value=None, round_down_protect=True):
    if min_value is None:
        min_value = divisor
    new_value = max(min_value, int(value + divisor / 2) // divisor * divisor)
    if round_down_protect and new_value < 0.9 * value:
        new_value += divisor
    return new_value


def _cdiv(a, b):
    return -(-a // b)


# ------------------------------ fused Pallas kernel ---------------------------------


def _uib_kernel(*refs, H, W, Cin, Cexp, Cout, start_k, middle_k,
                s_stride, m_stride, th_out, identity):
    has_start = start_k > 0
    has_middle = middle_k > 0
    ps = (start_k - 1) // 2 if has_start else 0
    pm = (middle_k - 1) // 2 if has_middle else 0
    ss = s_stride if has_start else 1
    ms = m_stride if has_middle else 1

    H1 = _cdiv(H, ss)           # spatial dims after start-DW
    W1 = _cdiv(W, ss)
    Wo = _cdiv(W1, ms)          # final output width

    RH = (th_out - 1) * ms + 2 * pm + 1       # post-start rows per tile (incl. halo)
    IN_ROWS = (RH - 1) * ss + 2 * ps + 1      # input rows per tile (incl. halo)
    pad_h = pm * ss + ps
    pad_w = ps

    it = iter(refs)
    x_ref = next(it)
    if has_start:
        sdw_w_ref, sdw_s_ref, sdw_b_ref = next(it), next(it), next(it)
    exp_w_ref, exp_s_ref, exp_b_ref = next(it), next(it), next(it)
    if has_middle:
        mdw_w_ref, mdw_s_ref, mdw_b_ref = next(it), next(it), next(it)
    proj_w_ref, proj_s_ref, proj_b_ref = next(it), next(it), next(it)
    o_ref = next(it)
    xpad_ref = next(it)
    epad_ref = next(it) if has_middle else None

    t = pl.program_id(1)
    o0 = t * th_out              # first output row of this tile
    a = o0 * ms - pm             # first post-start-DW row touched (may be negative)

    # Stage 0 (once per image): zero-padded input image held in VMEM scratch.
    @pl.when(t == 0)
    def _():
        xpad_ref[...] = jnp.zeros_like(xpad_ref)
        xpad_ref[pad_h:pad_h + H, pad_w:pad_w + W, :] = x_ref[0].astype(jnp.float32)

    # Haloed input row window for this tile, loaded once as a value.
    in_row0 = o0 * ms * ss       # == a*ss - ps + pad_h, always >= 0
    win = xpad_ref[pl.ds(in_row0, IN_ROWS), :, :]     # (IN_ROWS, W + 2*pad_w, Cin) f32

    def dw(v, w_ref_, scale, bias, k, stride, nrows, ncols, relu):
        c = v.shape[-1]
        acc = jnp.zeros((nrows, ncols, c), jnp.float32)
        for dy in range(k):
            for dx in range(k):
                if stride == 1:
                    tap = v[dy:dy + nrows, dx:dx + ncols, :]
                else:
                    # TODO(synk): strided taps exercised only for stride>1 configs.
                    tap = lax.slice(
                        v, (dy, dx, 0),
                        (dy + (nrows - 1) * stride + 1,
                         dx + (ncols - 1) * stride + 1, c),
                        (stride, stride, 1))
                acc = acc + tap * w_ref_[dy, dx, :].astype(jnp.float32)
        y = acc * scale + bias
        return jnp.maximum(y, 0.0) if relu else y

    # Stage 1: start depthwise conv + folded BN (no activation).
    if has_start:
        h1 = dw(win, sdw_w_ref,
                sdw_s_ref[0].astype(jnp.float32), sdw_b_ref[0].astype(jnp.float32),
                start_k, ss, RH, W1, relu=False)
    else:
        h1 = win                                   # (RH, W1, Cin), already fp32

    # Stage 2: expand 1x1 conv (MXU matmul) + folded BN + ReLU, fp32 accumulate.
    x2 = jnp.dot(h1.reshape(RH * W1, Cin),
                 exp_w_ref[...].astype(jnp.float32),
                 preferred_element_type=jnp.float32)
    x2 = jnp.maximum(x2 * exp_s_ref[0].astype(jnp.float32)
                     + exp_b_ref[0].astype(jnp.float32), 0.0)

    # Stage 3: middle depthwise conv + folded BN + ReLU (expanded act stays in VMEM).
    if has_middle:
        x2 = x2.reshape(RH, W1, Cexp)
        # Halo rows outside the valid feature map act as the conv's zero padding.
        row_ids = a + lax.broadcasted_iota(jnp.int32, (RH, W1, Cexp), 0)
        x2 = jnp.where((row_ids >= 0) & (row_ids < H1), x2, jnp.float32(0.0))
        epad_ref[...] = jnp.zeros_like(epad_ref)          # zero W borders
        epad_ref[:, pm:pm + W1, :] = x2
        ev = epad_ref[...]
        h2 = dw(ev, mdw_w_ref,
                mdw_s_ref[0].astype(jnp.float32), mdw_b_ref[0].astype(jnp.float32),
                middle_k, ms, th_out, Wo, relu=True)
        h2 = h2.reshape(th_out * Wo, Cexp)
    else:
        h2 = x2                                           # (th_out*Wo, Cexp)

    # Stage 4: proj 1x1 conv (MXU) + folded BN (+layer scale folded) (+residual).
    y = jnp.dot(h2, proj_w_ref[...].astype(jnp.float32),
                preferred_element_type=jnp.float32)
    y = y * proj_s_ref[0].astype(jnp.float32) + proj_b_ref[0].astype(jnp.float32)
    if identity:
        res = x_ref[:, pl.ds(o0, th_out), :, :].astype(jnp.float32)
        y = y + res.reshape(th_out * Wo, Cout)
    o_ref[...] = y.reshape(1, th_out, Wo, Cout).astype(o_ref.dtype)


# ------------------------------ wrapper ----------------------------------------------


def bn_fold(gamma, beta, mean, var, eps=1e-5):
    scale = gamma / jnp.sqrt(var + eps)
    bias = beta - mean * scale
    return scale.reshape(1, -1), bias.reshape(1, -1)


def uib_forward(x_nchw, params, *, in_ch, out_ch, start_k, middle_k, stride,
                middle_dw_downsample=True, use_layer_scale=False):
    identity = (stride == 1 and in_ch == out_ch)
    x = jnp.transpose(x_nchw, (0, 2, 3, 1))     # NCHW -> NHWC boundary glue
    # TODO(synk): keep NHWC end-to-end across layers to drop the boundary transposes.
    N, H, W, Cin = x.shape
    Cexp = params["expand_channels"]
    Cout = out_ch

    has_start = start_k > 0
    has_middle = middle_k > 0
    if has_start:
        assert start_k % 2 == 1, "same padding assumes odd depthwise kernel"
    if has_middle:
        assert middle_k % 2 == 1, "same padding assumes odd depthwise kernel"
    ss = (1 if middle_dw_downsample else stride) if has_start else 1
    ms = (stride if middle_dw_downsample else 1) if has_middle else 1
    ps = (start_k - 1) // 2 if has_start else 0
    pm = (middle_k - 1) // 2 if has_middle else 0

    H1, W1 = _cdiv(H, ss), _cdiv(W, ss)
    Ho, Wo = _cdiv(H1, ms), _cdiv(W1, ms)

    # Output-row tile: keeps the expanded (Cexp-wide) activation bounded in VMEM;
    # halo rows are recomputed per tile.
    th_out = Ho
    if Ho > 8:
        for cand in (8, 4, 2):
            if Ho % cand == 0:
                th_out = cand
                break

    RH = (th_out - 1) * ms + 2 * pm + 1
    pad_h = pm * ss + ps
    pad_w = ps

    def full_spec(shape):
        nd = len(shape)
        return pl.BlockSpec(shape, lambda n, t: (0,) * nd)

    args = [x]
    in_specs = [pl.BlockSpec((1, H, W, Cin), lambda n, t: (n, 0, 0, 0))]
    if has_start:
        s_, b_ = bn_fold(*params["start_dw_bn"])
        args += [params["start_dw_w"], s_, b_]
        in_specs += [full_spec((start_k, start_k, Cin)),
                     full_spec((1, Cin)), full_spec((1, Cin))]
    s_, b_ = bn_fold(*params["expand_bn"])
    args += [params["expand_w"], s_, b_]
    in_specs += [full_spec((Cin, Cexp)), full_spec((1, Cexp)), full_spec((1, Cexp))]
    if has_middle:
        s_, b_ = bn_fold(*params["middle_dw_bn"])
        args += [params["middle_dw_w"], s_, b_]
        in_specs += [full_spec((middle_k, middle_k, Cexp)),
                     full_spec((1, Cexp)), full_spec((1, Cexp))]
    s_, b_ = bn_fold(*params["proj_bn"])
    if use_layer_scale:
        g = params["gamma_ls"].reshape(1, -1)
        s_, b_ = s_ * g, b_ * g
    args += [params["proj_w"], s_, b_]
    in_specs += [full_spec((Cexp, Cout)), full_spec((1, Cout)), full_spec((1, Cout))]

    scratch = [pltpu.VMEM((H + 2 * pad_h, W + 2 * pad_w, Cin), jnp.float32)]
    if has_middle:
        scratch.append(pltpu.VMEM((RH, W1 + 2 * pm, Cexp), jnp.float32))

    # VMEM budget: double-buffered blocks + scratch + fp32 temporaries, generous headroom.
    fp32 = 4
    est = 2 * (H * W * Cin + th_out * Wo * Cout) * fp32
    est += (H + 2 * pad_h) * (W + 2 * pad_w) * Cin * fp32
    est += RH * (W1 + 2 * pm) * Cexp * fp32
    est += 8 * RH * max(W1 + 2 * pm, Wo) * max(Cexp, Cin, Cout) * fp32
    est += 2 * (Cin * Cexp + Cexp * Cout
                + start_k * start_k * Cin + middle_k * middle_k * Cexp
                + 8 * Cexp) * fp32
    vmem_limit = int(min(max(4 * est, 16 << 20), 64 << 20))

    kern = functools.partial(
        _uib_kernel, H=H, W=W, Cin=Cin, Cexp=Cexp, Cout=Cout,
        start_k=start_k, middle_k=middle_k, s_stride=ss, m_stride=ms,
        th_out=th_out, identity=identity)

    y = pl.pallas_call(
        kern,
        out_shape=jax.ShapeDtypeStruct((N, Ho, Wo, Cout), x.dtype),
        grid=(N, Ho // th_out),
        in_specs=in_specs,
        out_specs=pl.BlockSpec((1, th_out, Wo, Cout), lambda n, t: (n, t, 0, 0)),
        scratch_shapes=scratch,
        compiler_params=pltpu.CompilerParams(
            dimension_semantics=("parallel", "arbitrary"),
            vmem_limit_bytes=vmem_limit),
    )(*args)
    return jnp.transpose(y, (0, 3, 1, 2))        # NHWC -> NCHW


# ------------------------------ params / reference -----------------------------------


def init_bn(key, c):
    k1, k2, k3, k4 = jax.random.split(key, 4)
    gamma = jax.random.uniform(k1, (c,), jnp.float32, 0.5, 1.5)
    beta = 0.1 * jax.random.normal(k2, (c,), jnp.float32)
    mean = 0.1 * jax.random.normal(k3, (c,), jnp.float32)
    var = jax.random.uniform(k4, (c,), jnp.float32, 0.5, 1.5)
    return gamma, beta, mean, var


def init_uib_params(key, in_ch, out_ch, expand_ratio, start_k, middle_k,
                    use_layer_scale=False, layer_scale_init_value=1e-5):
    expand_ch = make_divisible(in_ch * expand_ratio, 8)
    keys = jax.random.split(key, 8)
    params = {"expand_channels": expand_ch}
    if start_k:
        params["start_dw_w"] = 0.1 * jax.random.normal(keys[0], (start_k, start_k, in_ch), jnp.float32)
        params["start_dw_bn"] = init_bn(keys[1], in_ch)
    params["expand_w"] = 0.1 * jax.random.normal(keys[2], (in_ch, expand_ch), jnp.float32)
    params["expand_bn"] = init_bn(keys[3], expand_ch)
    if middle_k:
        params["middle_dw_w"] = 0.1 * jax.random.normal(keys[4], (middle_k, middle_k, expand_ch), jnp.float32)
        params["middle_dw_bn"] = init_bn(keys[5], expand_ch)
    params["proj_w"] = 0.1 * jax.random.normal(keys[6], (expand_ch, out_ch), jnp.float32)
    params["proj_bn"] = init_bn(keys[7], out_ch)
    if use_layer_scale:
        params["gamma_ls"] = layer_scale_init_value * jnp.ones((out_ch,), jnp.float32)
    return params


def _ref_dw(x, w, k, stride):
    p = (k - 1) // 2
    w4 = w.reshape(k, k, 1, -1)
    return lax.conv_general_dilated(
        x, w4, window_strides=(stride, stride), padding=[(p, p), (p, p)],
        dimension_numbers=("NHWC", "HWIO", "NHWC"),
        feature_group_count=x.shape[-1])


def uib_forward_ref(x_nchw, params, *, in_ch, out_ch, start_k, middle_k, stride,
                    middle_dw_downsample=True, use_layer_scale=False):
    identity = (stride == 1 and in_ch == out_ch)
    x = jnp.transpose(x_nchw, (0, 2, 3, 1))
    shortcut = x
    if start_k:
        s = 1 if middle_dw_downsample else stride
        x = _ref_dw(x, params["start_dw_w"], start_k, s)
        sc, bi = bn_fold(*params["start_dw_bn"])
        x = x * sc[0] + bi[0]
    sc, bi = bn_fold(*params["expand_bn"])
    x = jnp.maximum(jnp.einsum("nhwc,cd->nhwd", x, params["expand_w"]) * sc[0] + bi[0], 0.0)
    if middle_k:
        s = stride if middle_dw_downsample else 1
        x = _ref_dw(x, params["middle_dw_w"], middle_k, s)
        sc, bi = bn_fold(*params["middle_dw_bn"])
        x = jnp.maximum(x * sc[0] + bi[0], 0.0)
    sc, bi = bn_fold(*params["proj_bn"])
    x = jnp.einsum("nhwc,cd->nhwd", x, params["proj_w"]) * sc[0] + bi[0]
    if use_layer_scale:
        x = x * params["gamma_ls"]
    if identity:
        x = x + shortcut
    return jnp.transpose(x, (0, 3, 1, 2))


# ------------------------------ main --------------------------------------------------

if __name__ == "__main__":
    # in=4, out=4, expand_ratio=4 -> expand_channels=16; 3x3 start & middle DW,
    # stride=1 -> identity shortcut active. Row-tiled fused path (2 tiles of 8 rows).
    cfg = dict(in_ch=4, out_ch=4, start_k=3, middle_k=3, stride=1,
               middle_dw_downsample=True, use_layer_scale=False)

    key = jax.random.PRNGKey(0)
    kx, kp = jax.random.split(key)
    x = jax.random.normal(kx, (2, 4, 16, 16), jnp.float32)  # NCHW like PyTorch
    params = init_uib_params(kp, cfg["in_ch"], cfg["out_ch"], expand_ratio=4.0,
                             start_k=cfg["start_k"], middle_k=cfg["middle_k"],
                             use_layer_scale=cfg["use_layer_scale"])

    out = jax.block_until_ready(uib_forward(x, params, **cfg))
    ref = jax.block_until_ready(uib_forward_ref(x, params, **cfg))
    np.testing.assert_allclose(np.asarray(out), np.asarray(ref), rtol=1e-4, atol=1e-4)

    print("KERNEL_OK")
</pallas_src>

<mosaic_0001>
module attributes {stable_mosaic.version = 11 : i64} {
  func.func @_uib_kernel(%arg0: i32, %arg1: i32, %arg2: memref<1x16x16x4xf32, #tpu.memory_space<vmem>>, %arg3: memref<3x3x4xf32, #tpu.memory_space<vmem>>, %arg4: memref<1x4xf32, #tpu.memory_space<vmem>>, %arg5: memref<1x4xf32, #tpu.memory_space<vmem>>, %arg6: memref<4x16xf32, #tpu.memory_space<vmem>>, %arg7: memref<1x16xf32, #tpu.memory_space<vmem>>, %arg8: memref<1x16xf32, #tpu.memory_space<vmem>>, %arg9: memref<3x3x16xf32, #tpu.memory_space<vmem>>, %arg10: memref<1x16xf32, #tpu.memory_space<vmem>>, %arg11: memref<1x16xf32, #tpu.memory_space<vmem>>, %arg12: memref<16x4xf32, #tpu.memory_space<vmem>>, %arg13: memref<1x4xf32, #tpu.memory_space<vmem>>, %arg14: memref<1x4xf32, #tpu.memory_space<vmem>>, %arg15: memref<1x8x16x4xf32, #tpu.memory_space<vmem>>, %arg16: memref<20x18x4xf32, #tpu.memory_space<vmem>>, %arg17: memref<10x18x16xf32, #tpu.memory_space<vmem>>) attributes {dimension_semantics = [#tpu.dimension_semantics<parallel>, #tpu.dimension_semantics<arbitrary>], iteration_bounds = array<i64: 2, 2>, scalar_prefetch = 0 : i64, scratch_operands = 2 : i64, tpu.core_type = #tpu.core_type<tc>, window_params = [{transform_indices = @transform_0, window_bounds = array<i64: 1, 16, 16, 4>}, {pipeline_mode = #tpu.pipeline_mode<synchronous>, transform_indices = @transform_1, window_bounds = array<i64: 3, 3, 4>}, {pipeline_mode = #tpu.pipeline_mode<synchronous>, transform_indices = @transform_2, window_bounds = array<i64: 1, 4>}, {pipeline_mode = #tpu.pipeline_mode<synchronous>, transform_indices = @transform_3, window_bounds = array<i64: 1, 4>}, {pipeline_mode = #tpu.pipeline_mode<synchronous>, transform_indices = @transform_4, window_bounds = array<i64: 4, 16>}, {pipeline_mode = #tpu.pipeline_mode<synchronous>, transform_indices = @transform_5, window_bounds = array<i64: 1, 16>}, {pipeline_mode = #tpu.pipeline_mode<synchronous>, transform_indices = @transform_6, window_bounds = array<i64: 1, 16>}, {pipeline_mode = #tpu.pipeline_mode<synchronous>, transform_indices = @transform_7, window_bounds = array<i64: 3, 3, 16>}, {pipeline_mode = #tpu.pipeline_mode<synchronous>, transform_indices = @transform_8, window_bounds = array<i64: 1, 16>}, {pipeline_mode = #tpu.pipeline_mode<synchronous>, transform_indices = @transform_9, window_bounds = array<i64: 1, 16>}, {pipeline_mode = #tpu.pipeline_mode<synchronous>, transform_indices = @transform_10, window_bounds = array<i64: 16, 4>}, {pipeline_mode = #tpu.pipeline_mode<synchronous>, transform_indices = @transform_11, window_bounds = array<i64: 1, 4>}, {pipeline_mode = #tpu.pipeline_mode<synchronous>, transform_indices = @transform_12, window_bounds = array<i64: 1, 4>}, {transform_indices = @transform_13, window_bounds = array<i64: 1, 8, 16, 4>}]} {
    %c8_i32 = arith.constant 8 : i32
    %0 = arith.muli %arg1, %c8_i32 : i32
    %c1_i32 = arith.constant 1 : i32
    %1 = arith.muli %0, %c1_i32 : i32
    %c1_i32_0 = arith.constant 1 : i32
    %2 = arith.subi %1, %c1_i32_0 : i32
    %c0_i32 = arith.constant 0 : i32
    %3 = arith.cmpi eq, %arg1, %c0_i32 : i32
    %4 = arith.extui %3 : i1 to i32
    %c0_i32_1 = arith.constant 0 : i32
    %5 = arith.cmpi ne, %4, %c0_i32_1 : i32
    scf.if %5 {
      %cst_101 = arith.constant 0.000000e+00 : f32
      %209 = vector.broadcast %cst_101 : f32 to vector<20x18x4xf32>
      %c0_102 = arith.constant 0 : index
      %c0_103 = arith.constant 0 : index
      %c0_104 = arith.constant 0 : index
      %210 = vector.load %arg16[%c0_102, %c0_103, %c0_104] : memref<20x18x4xf32, #tpu.memory_space<vmem>>, vector<20x18x4xf32>
      tpu.vector_store %arg16[%c0_102, %c0_103, %c0_104], %209 {strides = array<i32>} : memref<20x18x4xf32, #tpu.memory_space<vmem>>, vector<20x18x4xf32>,
      %c0_105 = arith.constant 0 : index
      %c0_106 = arith.constant 0 : index
      %c0_107 = arith.constant 0 : index
      %c0_108 = arith.constant 0 : index
      %211 = vector.load %arg2[%c0_105, %c0_106, %c0_107, %c0_108] : memref<1x16x16x4xf32, #tpu.memory_space<vmem>>, vector<1x16x16x4xf32>
      %212 = vector.shape_cast %211 : vector<1x16x16x4xf32> to vector<16x16x4xf32>
      %c2_109 = arith.constant 2 : index
      %c1_110 = arith.constant 1 : index
      %c0_111 = arith.constant 0 : index
      %213 = vector.load %arg16[%c2_109, %c1_110, %c0_111] : memref<20x18x4xf32, #tpu.memory_space<vmem>>, vector<16x16x4xf32>
      tpu.vector_store %arg16[%c2_109, %c1_110, %c0_111], %212 {strides = array<i32>} : memref<20x18x4xf32, #tpu.memory_space<vmem>>, vector<16x16x4xf32>,
    } else {
    }
    %c1_i32_2 = arith.constant 1 : i32
    %6 = arith.muli %0, %c1_i32_2 : i32
    %c1_i32_3 = arith.constant 1 : i32
    %7 = arith.muli %6, %c1_i32_3 : i32
    %8 = arith.index_cast %7 : i32 to index
    %c0 = arith.constant 0 : index
    %c0_4 = arith.constant 0 : index
    %9 = vector.load %arg16[%8, %c0, %c0_4] : memref<20x18x4xf32, #tpu.memory_space<vmem>>, vector<12x18x4xf32>
    %c0_5 = arith.constant 0 : index
    %c0_6 = arith.constant 0 : index
    %10 = vector.load %arg4[%c0_5, %c0_6] : memref<1x4xf32, #tpu.memory_space<vmem>>, vector<1x4xf32>
    %11 = vector.shape_cast %10 : vector<1x4xf32> to vector<4xf32>
    %c0_7 = arith.constant 0 : index
    %c0_8 = arith.constant 0 : index
    %12 = vector.load %arg5[%c0_7, %c0_8] : memref<1x4xf32, #tpu.memory_space<vmem>>, vector<1x4xf32>
    %13 = vector.shape_cast %12 : vector<1x4xf32> to vector<4xf32>
    %cst = arith.constant 0.000000e+00 : f32
    %14 = vector.broadcast %cst : f32 to vector<10x16x4xf32>
    %15 = vector.extract_strided_slice %9 {offsets = [0, 0, 0], sizes = [10, 16, 4], strides = [1, 1, 1]} : vector<12x18x4xf32> to vector<10x16x4xf32>
    %c0_9 = arith.constant 0 : index
    %c0_10 = arith.constant 0 : index
    %c0_11 = arith.constant 0 : index
    %16 = vector.load %arg3[%c0_9, %c0_10, %c0_11] : memref<3x3x4xf32, #tpu.memory_space<vmem>>, vector<1x1x4xf32>
    %17 = vector.shape_cast %16 : vector<1x1x4xf32> to vector<4xf32>
    %18 = vector.shape_cast %17 : vector<4xf32> to vector<1x1x4xf32>
    %19 = vector.broadcast %18 : vector<1x1x4xf32> to vector<10x16x4xf32>
    %20 = arith.mulf %15, %19 : vector<10x16x4xf32>
    %21 = arith.addf %14, %20 : vector<10x16x4xf32>
    %22 = vector.extract_strided_slice %9 {offsets = [0, 1, 0], sizes = [10, 16, 4], strides = [1, 1, 1]} : vector<12x18x4xf32> to vector<10x16x4xf32>
    %c0_12 = arith.constant 0 : index
    %c1 = arith.constant 1 : index
    %c0_13 = arith.constant 0 : index
    %23 = vector.load %arg3[%c0_12, %c1, %c0_13] : memref<3x3x4xf32, #tpu.memory_space<vmem>>, vector<1x1x4xf32>
    %24 = vector.shape_cast %23 : vector<1x1x4xf32> to vector<4xf32>
    %25 = vector.shape_cast %24 : vector<4xf32> to vector<1x1x4xf32>
    %26 = vector.broadcast %25 : vector<1x1x4xf32> to vector<10x16x4xf32>
    %27 = arith.mulf %22, %26 : vector<10x16x4xf32>
    %28 = arith.addf %21, %27 : vector<10x16x4xf32>
    %29 = vector.extract_strided_slice %9 {offsets = [0, 2, 0], sizes = [10, 16, 4], strides = [1, 1, 1]} : vector<12x18x4xf32> to vector<10x16x4xf32>
    %c0_14 = arith.constant 0 : index
    %c2 = arith.constant 2 : index
    %c0_15 = arith.constant 0 : index
    %30 = vector.load %arg3[%c0_14, %c2, %c0_15] : memref<3x3x4xf32, #tpu.memory_space<vmem>>, vector<1x1x4xf32>
    %31 = vector.shape_cast %30 : vector<1x1x4xf32> to vector<4xf32>
    %32 = vector.shape_cast %31 : vector<4xf32> to vector<1x1x4xf32>
    %33 = vector.broadcast %32 : vector<1x1x4xf32> to vector<10x16x4xf32>
    %34 = arith.mulf %29, %33 : vector<10x16x4xf32>
    %35 = arith.addf %28, %34 : vector<10x16x4xf32>
    %36 = vector.extract_strided_slice %9 {offsets = [1, 0, 0], sizes = [10, 16, 4], strides = [1, 1, 1]} : vector<12x18x4xf32> to vector<10x16x4xf32>
    %c1_16 = arith.constant 1 : index
    %c0_17 = arith.constant 0 : index
    %c0_18 = arith.constant 0 : index
    %37 = vector.load %arg3[%c1_16, %c0_17, %c0_18] : memref<3x3x4xf32, #tpu.memory_space<vmem>>, vector<1x1x4xf32>
    %38 = vector.shape_cast %37 : vector<1x1x4xf32> to vector<4xf32>
    %39 = vector.shape_cast %38 : vector<4xf32> to vector<1x1x4xf32>
    %40 = vector.broadcast %39 : vector<1x1x4xf32> to vector<10x16x4xf32>
    %41 = arith.mulf %36, %40 : vector<10x16x4xf32>
    %42 = arith.addf %35, %41 : vector<10x16x4xf32>
    %43 = vector.extract_strided_slice %9 {offsets = [1, 1, 0], sizes = [10, 16, 4], strides = [1, 1, 1]} : vector<12x18x4xf32> to vector<10x16x4xf32>
    %c1_19 = arith.constant 1 : index
    %c1_20 = arith.constant 1 : index
    %c0_21 = arith.constant 0 : index
    %44 = vector.load %arg3[%c1_19, %c1_20, %c0_21] : memref<3x3x4xf32, #tpu.memory_space<vmem>>, vector<1x1x4xf32>
    %45 = vector.shape_cast %44 : vector<1x1x4xf32> to vector<4xf32>
    %46 = vector.shape_cast %45 : vector<4xf32> to vector<1x1x4xf32>
    %47 = vector.broadcast %46 : vector<1x1x4xf32> to vector<10x16x4xf32>
    %48 = arith.mulf %43, %47 : vector<10x16x4xf32>
    %49 = arith.addf %42, %48 : vector<10x16x4xf32>
    %50 = vector.extract_strided_slice %9 {offsets = [1, 2, 0], sizes = [10, 16, 4], strides = [1, 1, 1]} : vector<12x18x4xf32> to vector<10x16x4xf32>
    %c1_22 = arith.constant 1 : index
    %c2_23 = arith.constant 2 : index
    %c0_24 = arith.constant 0 : index
    %51 = vector.load %arg3[%c1_22, %c2_23, %c0_24] : memref<3x3x4xf32, #tpu.memory_space<vmem>>, vector<1x1x4xf32>
    %52 = vector.shape_cast %51 : vector<1x1x4xf32> to vector<4xf32>
    %53 = vector.shape_cast %52 : vector<4xf32> to vector<1x1x4xf32>
    %54 = vector.broadcast %53 : vector<1x1x4xf32> to vector<10x16x4xf32>
    %55 = arith.mulf %50, %54 : vector<10x16x4xf32>
    %56 = arith.addf %49, %55 : vector<10x16x4xf32>
    %57 = vector.extract_strided_slice %9 {offsets = [2, 0, 0], sizes = [10, 16, 4], strides = [1, 1, 1]} : vector<12x18x4xf32> to vector<10x16x4xf32>
    %c2_25 = arith.constant 2 : index
    %c0_26 = arith.constant 0 : index
    %c0_27 = arith.constant 0 : index
    %58 = vector.load %arg3[%c2_25, %c0_26, %c0_27] : memref<3x3x4xf32, #tpu.memory_space<vmem>>, vector<1x1x4xf32>
    %59 = vector.shape_cast %58 : vector<1x1x4xf32> to vector<4xf32>
    %60 = vector.shape_cast %59 : vector<4xf32> to vector<1x1x4xf32>
    %61 = vector.broadcast %60 : vector<1x1x4xf32> to vector<10x16x4xf32>
    %62 = arith.mulf %57, %61 : vector<10x16x4xf32>
    %63 = arith.addf %56, %62 : vector<10x16x4xf32>
    %64 = vector.extract_strided_slice %9 {offsets = [2, 1, 0], sizes = [10, 16, 4], strides = [1, 1, 1]} : vector<12x18x4xf32> to vector<10x16x4xf32>
    %c2_28 = arith.constant 2 : index
    %c1_29 = arith.constant 1 : index
    %c0_30 = arith.constant 0 : index
    %65 = vector.load %arg3[%c2_28, %c1_29, %c0_30] : memref<3x3x4xf32, #tpu.memory_space<vmem>>, vector<1x1x4xf32>
    %66 = vector.shape_cast %65 : vector<1x1x4xf32> to vector<4xf32>
    %67 = vector.shape_cast %66 : vector<4xf32> to vector<1x1x4xf32>
    %68 = vector.broadcast %67 : vector<1x1x4xf32> to vector<10x16x4xf32>
    %69 = arith.mulf %64, %68 : vector<10x16x4xf32>
    %70 = arith.addf %63, %69 : vector<10x16x4xf32>
    %71 = vector.extract_strided_slice %9 {offsets = [2, 2, 0], sizes = [10, 16, 4], strides = [1, 1, 1]} : vector<12x18x4xf32> to vector<10x16x4xf32>
    %c2_31 = arith.constant 2 : index
    %c2_32 = arith.constant 2 : index
    %c0_33 = arith.constant 0 : index
    %72 = vector.load %arg3[%c2_31, %c2_32, %c0_33] : memref<3x3x4xf32, #tpu.memory_space<vmem>>, vector<1x1x4xf32>
    %73 = vector.shape_cast %72 : vector<1x1x4xf32> to vector<4xf32>
    %74 = vector.shape_cast %73 : vector<4xf32> to vector<1x1x4xf32>
    %75 = vector.broadcast %74 : vector<1x1x4xf32> to vector<10x16x4xf32>
    %76 = arith.mulf %71, %75 : vector<10x16x4xf32>
    %77 = arith.addf %70, %76 : vector<10x16x4xf32>
    %78 = vector.shape_cast %11 : vector<4xf32> to vector<1x1x4xf32>
    %79 = vector.broadcast %78 : vector<1x1x4xf32> to vector<10x16x4xf32>
    %80 = arith.mulf %77, %79 : vector<10x16x4xf32>
    %81 = vector.shape_cast %13 : vector<4xf32> to vector<1x1x4xf32>
    %82 = vector.broadcast %81 : vector<1x1x4xf32> to vector<10x16x4xf32>
    %83 = arith.addf %80, %82 : vector<10x16x4xf32>
    %84 = vector.shape_cast %83 : vector<10x16x4xf32> to vector<160x4xf32>
    %c0_34 = arith.constant 0 : index
    %c0_35 = arith.constant 0 : index
    %85 = vector.load %arg6[%c0_34, %c0_35] : memref<4x16xf32, #tpu.memory_space<vmem>>, vector<4x16xf32>
    %cst_36 = arith.constant dense<0.000000e+00> : vector<160x16xf32>
    %86 = tpu.matmul %84, %85, %cst_36 {dimension_numbers = #tpu.dot_dimension_numbers<[1], [0], [0], [1], [0, 0, 1, 1], [], []>} : vector<160x4xf32>, vector<4x16xf32>, vector<160x16xf32> -> vector<160x16xf32>
    %c0_37 = arith.constant 0 : index
    %c0_38 = arith.constant 0 : index
    %87 = vector.load %arg7[%c0_37, %c0_38] : memref<1x16xf32, #tpu.memory_space<vmem>>, vector<1x16xf32>
    %88 = vector.shape_cast %87 : vector<1x16xf32> to vector<16xf32>
    %89 = vector.shape_cast %88 : vector<16xf32> to vector<1x16xf32>
    %90 = vector.broadcast %89 : vector<1x16xf32> to vector<160x16xf32>
    %91 = arith.mulf %86, %90 : vector<160x16xf32>
    %c0_39 = arith.constant 0 : index
    %c0_40 = arith.constant 0 : index
    %92 = vector.load %arg8[%c0_39, %c0_40] : memref<1x16xf32, #tpu.memory_space<vmem>>, vector<1x16xf32>
    %93 = vector.shape_cast %92 : vector<1x16xf32> to vector<16xf32>
    %94 = vector.shape_cast %93 : vector<16xf32> to vector<1x16xf32>
    %95 = vector.broadcast %94 : vector<1x16xf32> to vector<160x16xf32>
    %96 = arith.addf %91, %95 : vector<160x16xf32>
    %cst_41 = arith.constant 0.000000e+00 : f32
    %97 = vector.broadcast %cst_41 : f32 to vector<160x16xf32>
    %98 = arith.maximumf %96, %97 : vector<160x16xf32>
    %99 = vector.shape_cast %98 : vector<160x16xf32> to vector<10x16x16xf32>
    %100 = tpu.iota {dimensions = array<i32: 0>} : vector<10x16x16xi32>
    %101 = vector.broadcast %2 : i32 to vector<10x16x16xi32>
    %102 = arith.addi %101, %100 : vector<10x16x16xi32>
    %c0_i32_42 = arith.constant 0 : i32
    %103 = vector.broadcast %c0_i32_42 : i32 to vector<10x16x16xi32>
    %104 = arith.cmpi sge, %102, %103 : vector<10x16x16xi32>
    %c16_i32 = arith.constant 16 : i32
    %105 = vector.broadcast %c16_i32 : i32 to vector<10x16x16xi32>
    %106 = arith.cmpi slt, %102, %105 : vector<10x16x16xi32>
    %107 = arith.andi %104, %106 : vector<10x16x16xi1>
    %cst_43 = arith.constant 0.000000e+00 : f32
    %108 = vector.broadcast %cst_43 : f32 to vector<10x16x16xf32>
    %109 = arith.select %107, %99, %108 : vector<10x16x16xi1>, vector<10x16x16xf32>
    %cst_44 = arith.constant 0.000000e+00 : f32
    %110 = vector.broadcast %cst_44 : f32 to vector<10x18x16xf32>
    %c0_45 = arith.constant 0 : index
    %c0_46 = arith.constant 0 : index
    %c0_47 = arith.constant 0 : index
    %111 = vector.load %arg17[%c0_45, %c0_46, %c0_47] : memref<10x18x16xf32, #tpu.memory_space<vmem>>, vector<10x18x16xf32>
    tpu.vector_store %arg17[%c0_45, %c0_46, %c0_47], %110 {strides = array<i32>} : memref<10x18x16xf32, #tpu.memory_space<vmem>>, vector<10x18x16xf32>,
    %c0_48 = arith.constant 0 : index
    %c1_49 = arith.constant 1 : index
    %c0_50 = arith.constant 0 : index
    %112 = vector.load %arg17[%c0_48, %c1_49, %c0_50] : memref<10x18x16xf32, #tpu.memory_space<vmem>>, vector<10x16x16xf32>
    tpu.vector_store %arg17[%c0_48, %c1_49, %c0_50], %109 {strides = array<i32>} : memref<10x18x16xf32, #tpu.memory_space<vmem>>, vector<10x16x16xf32>,
    %c0_51 = arith.constant 0 : index
    %c0_52 = arith.constant 0 : index
    %c0_53 = arith.constant 0 : index
    %113 = vector.load %arg17[%c0_51, %c0_52, %c0_53] : memref<10x18x16xf32, #tpu.memory_space<vmem>>, vector<10x18x16xf32>
    %c0_54 = arith.constant 0 : index
    %c0_55 = arith.constant 0 : index
    %114 = vector.load %arg10[%c0_54, %c0_55] : memref<1x16xf32, #tpu.memory_space<vmem>>, vector<1x16xf32>
    %115 = vector.shape_cast %114 : vector<1x16xf32> to vector<16xf32>
    %c0_56 = arith.constant 0 : index
    %c0_57 = arith.constant 0 : index
    %116 = vector.load %arg11[%c0_56, %c0_57] : memref<1x16xf32, #tpu.memory_space<vmem>>, vector<1x16xf32>
    %117 = vector.shape_cast %116 : vector<1x16xf32> to vector<16xf32>
    %cst_58 = arith.constant 0.000000e+00 : f32
    %118 = vector.broadcast %cst_58 : f32 to vector<8x16x16xf32>
    %119 = vector.extract_strided_slice %113 {offsets = [0, 0, 0], sizes = [8, 16, 16], strides = [1, 1, 1]} : vector<10x18x16xf32> to vector<8x16x16xf32>
    %c0_59 = arith.constant 0 : index
    %c0_60 = arith.constant 0 : index
    %c0_61 = arith.constant 0 : index
    %120 = vector.load %arg9[%c0_59, %c0_60, %c0_61] : memref<3x3x16xf32, #tpu.memory_space<vmem>>, vector<1x1x16xf32>
    %121 = vector.shape_cast %120 : vector<1x1x16xf32> to vector<16xf32>
    %122 = vector.shape_cast %121 : vector<16xf32> to vector<1x1x16xf32>
    %123 = vector.broadcast %122 : vector<1x1x16xf32> to vector<8x16x16xf32>
    %124 = arith.mulf %119, %123 : vector<8x16x16xf32>
    %125 = arith.addf %118, %124 : vector<8x16x16xf32>
    %126 = vector.extract_strided_slice %113 {offsets = [0, 1, 0], sizes = [8, 16, 16], strides = [1, 1, 1]} : vector<10x18x16xf32> to vector<8x16x16xf32>
    %c0_62 = arith.constant 0 : index
    %c1_63 = arith.constant 1 : index
    %c0_64 = arith.constant 0 : index
    %127 = vector.load %arg9[%c0_62, %c1_63, %c0_64] : memref<3x3x16xf32, #tpu.memory_space<vmem>>, vector<1x1x16xf32>
    %128 = vector.shape_cast %127 : vector<1x1x16xf32> to vector<16xf32>
    %129 = vector.shape_cast %128 : vector<16xf32> to vector<1x1x16xf32>
    %130 = vector.broadcast %129 : vector<1x1x16xf32> to vector<8x16x16xf32>
    %131 = arith.mulf %126, %130 : vector<8x16x16xf32>
    %132 = arith.addf %125, %131 : vector<8x16x16xf32>
    %133 = vector.extract_strided_slice %113 {offsets = [0, 2, 0], sizes = [8, 16, 16], strides = [1, 1, 1]} : vector<10x18x16xf32> to vector<8x16x16xf32>
    %c0_65 = arith.constant 0 : index
    %c2_66 = arith.constant 2 : index
    %c0_67 = arith.constant 0 : index
    %134 = vector.load %arg9[%c0_65, %c2_66, %c0_67] : memref<3x3x16xf32, #tpu.memory_space<vmem>>, vector<1x1x16xf32>
    %135 = vector.shape_cast %134 : vector<1x1x16xf32> to vector<16xf32>
    %136 = vector.shape_cast %135 : vector<16xf32> to vector<1x1x16xf32>
    %137 = vector.broadcast %136 : vector<1x1x16xf32> to vector<8x16x16xf32>
    %138 = arith.mulf %133, %137 : vector<8x16x16xf32>
    %139 = arith.addf %132, %138 : vector<8x16x16xf32>
    %140 = vector.extract_strided_slice %113 {offsets = [1, 0, 0], sizes = [8, 16, 16], strides = [1, 1, 1]} : vector<10x18x16xf32> to vector<8x16x16xf32>
    %c1_68 = arith.constant 1 : index
    %c0_69 = arith.constant 0 : index
    %c0_70 = arith.constant 0 : index
    %141 = vector.load %arg9[%c1_68, %c0_69, %c0_70] : memref<3x3x16xf32, #tpu.memory_space<vmem>>, vector<1x1x16xf32>
    %142 = vector.shape_cast %141 : vector<1x1x16xf32> to vector<16xf32>
    %143 = vector.shape_cast %142 : vector<16xf32> to vector<1x1x16xf32>
    %144 = vector.broadcast %143 : vector<1x1x16xf32> to vector<8x16x16xf32>
    %145 = arith.mulf %140, %144 : vector<8x16x16xf32>
    %146 = arith.addf %139, %145 : vector<8x16x16xf32>
    %147 = vector.extract_strided_slice %113 {offsets = [1, 1, 0], sizes = [8, 16, 16], strides = [1, 1, 1]} : vector<10x18x16xf32> to vector<8x16x16xf32>
    %c1_71 = arith.constant 1 : index
    %c1_72 = arith.constant 1 : index
    %c0_73 = arith.constant 0 : index
    %148 = vector.load %arg9[%c1_71, %c1_72, %c0_73] : memref<3x3x16xf32, #tpu.memory_space<vmem>>, vector<1x1x16xf32>
    %149 = vector.shape_cast %148 : vector<1x1x16xf32> to vector<16xf32>
    %150 = vector.shape_cast %149 : vector<16xf32> to vector<1x1x16xf32>
    %151 = vector.broadcast %150 : vector<1x1x16xf32> to vector<8x16x16xf32>
    %152 = arith.mulf %147, %151 : vector<8x16x16xf32>
    %153 = arith.addf %146, %152 : vector<8x16x16xf32>
    %154 = vector.extract_strided_slice %113 {offsets = [1, 2, 0], sizes = [8, 16, 16], strides = [1, 1, 1]} : vector<10x18x16xf32> to vector<8x16x16xf32>
    %c1_74 = arith.constant 1 : index
    %c2_75 = arith.constant 2 : index
    %c0_76 = arith.constant 0 : index
    %155 = vector.load %arg9[%c1_74, %c2_75, %c0_76] : memref<3x3x16xf32, #tpu.memory_space<vmem>>, vector<1x1x16xf32>
    %156 = vector.shape_cast %155 : vector<1x1x16xf32> to vector<16xf32>
    %157 = vector.shape_cast %156 : vector<16xf32> to vector<1x1x16xf32>
    %158 = vector.broadcast %157 : vector<1x1x16xf32> to vector<8x16x16xf32>
    %159 = arith.mulf %154, %158 : vector<8x16x16xf32>
    %160 = arith.addf %153, %159 : vector<8x16x16xf32>
    %161 = vector.extract_strided_slice %113 {offsets = [2, 0, 0], sizes = [8, 16, 16], strides = [1, 1, 1]} : vector<10x18x16xf32> to vector<8x16x16xf32>
    %c2_77 = arith.constant 2 : index
    %c0_78 = arith.constant 0 : index
    %c0_79 = arith.constant 0 : index
    %162 = vector.load %arg9[%c2_77, %c0_78, %c0_79] : memref<3x3x16xf32, #tpu.memory_space<vmem>>, vector<1x1x16xf32>
    %163 = vector.shape_cast %162 : vector<1x1x16xf32> to vector<16xf32>
    %164 = vector.shape_cast %163 : vector<16xf32> to vector<1x1x16xf32>
    %165 = vector.broadcast %164 : vector<1x1x16xf32> to vector<8x16x16xf32>
    %166 = arith.mulf %161, %165 : vector<8x16x16xf32>
    %167 = arith.addf %160, %166 : vector<8x16x16xf32>
    %168 = vector.extract_strided_slice %113 {offsets = [2, 1, 0], sizes = [8, 16, 16], strides = [1, 1, 1]} : vector<10x18x16xf32> to vector<8x16x16xf32>
    %c2_80 = arith.constant 2 : index
    %c1_81 = arith.constant 1 : index
    %c0_82 = arith.constant 0 : index
    %169 = vector.load %arg9[%c2_80, %c1_81, %c0_82] : memref<3x3x16xf32, #tpu.memory_space<vmem>>, vector<1x1x16xf32>
    %170 = vector.shape_cast %169 : vector<1x1x16xf32> to vector<16xf32>
    %171 = vector.shape_cast %170 : vector<16xf32> to vector<1x1x16xf32>
    %172 = vector.broadcast %171 : vector<1x1x16xf32> to vector<8x16x16xf32>
    %173 = arith.mulf %168, %172 : vector<8x16x16xf32>
    %174 = arith.addf %167, %173 : vector<8x16x16xf32>
    %175 = vector.extract_strided_slice %113 {offsets = [2, 2, 0], sizes = [8, 16, 16], strides = [1, 1, 1]} : vector<10x18x16xf32> to vector<8x16x16xf32>
    %c2_83 = arith.constant 2 : index
    %c2_84 = arith.constant 2 : index
    %c0_85 = arith.constant 0 : index
    %176 = vector.load %arg9[%c2_83, %c2_84, %c0_85] : memref<3x3x16xf32, #tpu.memory_space<vmem>>, vector<1x1x16xf32>
    %177 = vector.shape_cast %176 : vector<1x1x16xf32> to vector<16xf32>
    %178 = vector.shape_cast %177 : vector<16xf32> to vector<1x1x16xf32>
    %179 = vector.broadcast %178 : vector<1x1x16xf32> to vector<8x16x16xf32>
    %180 = arith.mulf %175, %179 : vector<8x16x16xf32>
    %181 = arith.addf %174, %180 : vector<8x16x16xf32>
    %182 = vector.shape_cast %115 : vector<16xf32> to vector<1x1x16xf32>
    %183 = vector.broadcast %182 : vector<1x1x16xf32> to vector<8x16x16xf32>
    %184 = arith.mulf %181, %183 : vector<8x16x16xf32>
    %185 = vector.shape_cast %117 : vector<16xf32> to vector<1x1x16xf32>
    %186 = vector.broadcast %185 : vector<1x1x16xf32> to vector<8x16x16xf32>
    %187 = arith.addf %184, %186 : vector<8x16x16xf32>
    %cst_86 = arith.constant 0.000000e+00 : f32
    %188 = vector.broadcast %cst_86 : f32 to vector<8x16x16xf32>
    %189 = arith.maximumf %187, %188 : vector<8x16x16xf32>
    %190 = vector.shape_cast %189 : vector<8x16x16xf32> to vector<128x16xf32>
    %c0_87 = arith.constant 0 : index
    %c0_88 = arith.constant 0 : index
    %191 = vector.load %arg12[%c0_87, %c0_88] : memref<16x4xf32, #tpu.memory_space<vmem>>, vector<16x4xf32>
    %cst_89 = arith.constant dense<0.000000e+00> : vector<128x4xf32>
    %192 = tpu.matmul %190, %191, %cst_89 {dimension_numbers = #tpu.dot_dimension_numbers<[1], [0], [0], [1], [0, 0, 1, 1], [], []>} : vector<128x16xf32>, vector<16x4xf32>, vector<128x4xf32> -> vector<128x4xf32>
    %c0_90 = arith.constant 0 : index
    %c0_91 = arith.constant 0 : index
    %193 = vector.load %arg13[%c0_90, %c0_91] : memref<1x4xf32, #tpu.memory_space<vmem>>, vector<1x4xf32>
    %194 = vector.shape_cast %193 : vector<1x4xf32> to vector<4xf32>
    %195 = vector.shape_cast %194 : vector<4xf32> to vector<1x4xf32>
    %196 = vector.broadcast %195 : vector<1x4xf32> to vector<128x4xf32>
    %197 = arith.mulf %192, %196 : vector<128x4xf32>
    %c0_92 = arith.constant 0 : index
    %c0_93 = arith.constant 0 : index
    %198 = vector.load %arg14[%c0_92, %c0_93] : memref<1x4xf32, #tpu.memory_space<vmem>>, vector<1x4xf32>
    %199 = vector.shape_cast %198 : vector<1x4xf32> to vector<4xf32>
    %200 = vector.shape_cast %199 : vector<4xf32> to vector<1x4xf32>
    %201 = vector.broadcast %200 : vector<1x4xf32> to vector<128x4xf32>
    %202 = arith.addf %197, %201 : vector<128x4xf32>
    %c0_94 = arith.constant 0 : index
    %203 = arith.index_cast %0 : i32 to index
    %c0_95 = arith.constant 0 : index
    %c0_96 = arith.constant 0 : index
    %204 = vector.load %arg2[%c0_94, %203, %c0_95, %c0_96] : memref<1x16x16x4xf32, #tpu.memory_space<vmem>>, vector<1x8x16x4xf32>
    %205 = vector.shape_cast %204 : vector<1x8x16x4xf32> to vector<128x4xf32>
    %206 = arith.addf %202, %205 : vector<128x4xf32>
    %207 = vector.shape_cast %206 : vector<128x4xf32> to vector<1x8x16x4xf32>
    %c0_97 = arith.constant 0 : index
    %c0_98 = arith.constant 0 : index
    %c0_99 = arith.constant 0 : index
    %c0_100 = arith.constant 0 : index
    %208 = vector.load %arg15[%c0_97, %c0_98, %c0_99, %c0_100] : memref<1x8x16x4xf32, #tpu.memory_space<vmem>>, vector<1x8x16x4xf32>
    tpu.vector_store %arg15[%c0_97, %c0_98, %c0_99, %c0_100], %207 {strides = array<i32>} : memref<1x8x16x4xf32, #tpu.memory_space<vmem>>, vector<1x8x16x4xf32>,
    return
  }
  func.func @transform_0(%arg0: i32, %arg1: i32) -> (i32, i32, i32, i32) {
    %c0_i32 = arith.constant 0 : i32
    %c0_i32_0 = arith.constant 0 : i32
    %c0_i32_1 = arith.constant 0 : i32
    %c0_i32_2 = arith.constant 0 : i32
    return %arg0, %c0_i32, %c0_i32_0, %c0_i32_1 : i32, i32, i32, i32
  }
  func.func @transform_1(%arg0: i32, %arg1: i32) -> (i32, i32, i32) {
    %c0_i32 = arith.constant 0 : i32
    %c0_i32_0 = arith.constant 0 : i32
    %c0_i32_1 = arith.constant 0 : i32
    %c0_i32_2 = arith.constant 0 : i32
    return %c0_i32, %c0_i32_0, %c0_i32_1 : i32, i32, i32
  }
  func.func @transform_2(%arg0: i32, %arg1: i32) -> (i32, i32) {
    %c0_i32 = arith.constant 0 : i32
    %c0_i32_0 = arith.constant 0 : i32
    %c0_i32_1 = arith.constant 0 : i32
    return %c0_i32, %c0_i32_0 : i32, i32
  }
  func.func @transform_3(%arg0: i32, %arg1: i32) -> (i32, i32) {
    %c0_i32 = arith.constant 0 : i32
    %c0_i32_0 = arith.constant 0 : i32
    %c0_i32_1 = arith.constant 0 : i32
    return %c0_i32, %c0_i32_0 : i32, i32
  }
  func.func @transform_4(%arg0: i32, %arg1: i32) -> (i32, i32) {
    %c0_i32 = arith.constant 0 : i32
    %c0_i32_0 = arith.constant 0 : i32
    %c0_i32_1 = arith.constant 0 : i32
    return %c0_i32, %c0_i32_0 : i32, i32
  }
  func.func @transform_5(%arg0: i32, %arg1: i32) -> (i32, i32) {
    %c0_i32 = arith.constant 0 : i32
    %c0_i32_0 = arith.constant 0 : i32
    %c0_i32_1 = arith.constant 0 : i32
    return %c0_i32, %c0_i32_0 : i32, i32
  }
  func.func @transform_6(%arg0: i32, %arg1: i32) -> (i32, i32) {
    %c0_i32 = arith.constant 0 : i32
    %c0_i32_0 = arith.constant 0 : i32
    %c0_i32_1 = arith.constant 0 : i32
    return %c0_i32, %c0_i32_0 : i32, i32
  }
  func.func @transform_7(%arg0: i32, %arg1: i32) -> (i32, i32, i32) {
    %c0_i32 = arith.constant 0 : i32
    %c0_i32_0 = arith.constant 0 : i32
    %c0_i32_1 = arith.constant 0 : i32
    %c0_i32_2 = arith.constant 0 : i32
    return %c0_i32, %c0_i32_0, %c0_i32_1 : i32, i32, i32
  }
  func.func @transform_8(%arg0: i32, %arg1: i32) -> (i32, i32) {
    %c0_i32 = arith.constant 0 : i32
    %c0_i32_0 = arith.constant 0 : i32
    %c0_i32_1 = arith.constant 0 : i32
    return %c0_i32, %c0_i32_0 : i32, i32
  }
  func.func @transform_9(%arg0: i32, %arg1: i32) -> (i32, i32) {
    %c0_i32 = arith.constant 0 : i32
    %c0_i32_0 = arith.constant 0 : i32
    %c0_i32_1 = arith.constant 0 : i32
    return %c0_i32, %c0_i32_0 : i32, i32
  }
  func.func @transform_10(%arg0: i32, %arg1: i32) -> (i32, i32) {
    %c0_i32 = arith.constant 0 : i32
    %c0_i32_0 = arith.constant 0 : i32
    %c0_i32_1 = arith.constant 0 : i32
    return %c0_i32, %c0_i32_0 : i32, i32
  }
  func.func @transform_11(%arg0: i32, %arg1: i32) -> (i32, i32) {
    %c0_i32 = arith.constant 0 : i32
    %c0_i32_0 = arith.constant 0 : i32
    %c0_i32_1 = arith.constant 0 : i32
    return %c0_i32, %c0_i32_0 : i32, i32
  }
  func.func @transform_12(%arg0: i32, %arg1: i32) -> (i32, i32) {
    %c0_i32 = arith.constant 0 : i32
    %c0_i32_0 = arith.constant 0 : i32
    %c0_i32_1 = arith.constant 0 : i32
    return %c0_i32, %c0_i32_0 : i32, i32
  }
  func.func @transform_13(%arg0: i32, %arg1: i32) -> (i32, i32, i32, i32) {
    %c0_i32 = arith.constant 0 : i32
    %c0_i32_0 = arith.constant 0 : i32
    %c0_i32_1 = arith.constant 0 : i32
    return %arg0, %arg1, %c0_i32, %c0_i32_0 : i32, i32, i32, i32
  }
}

</mosaic_0001>

<bundles_post_ra>
// kernel: tpu_custom_call.1
= control target key start
LH: loop header
LB: loop body
LE: loop exit
PB: predicated region body
PF: predicated region fallthrough
CT: control target
= control target key end

     0   :  { %s3554_s25 = smov 0   ;;  %s3556_s26 = smov 0   ;;  %s6293_s0 = inlined_call_operand.vmem [shape: f32[2,16,16,4], index: 0, kind: input, shape index: {}]   ;;  %s6294_s1 = inlined_call_operand.vmem [shape: f32[3,3,4], index: 1, kind: input, shape index: {}]   ;;  %s6295_s2 = inlined_call_operand.vmem [shape: f32[1,4], index: 2, kind: input, shape index: {}]   ;;  %s6296_s3 = inlined_call_operand.vmem [shape: f32[1,4], index: 3, kind: input, shape index: {}]   ;;  %s6297_s4 = inlined_call_operand.vmem [shape: f32[4,16], index: 4, kind: input, shape index: {}]   ;;  %s6298_s5 = inlined_call_operand.vmem [shape: f32[1,16], index: 5, kind: input, shape index: {}]   ;;  %s6299_s6 = inlined_call_operand.vmem [shape: f32[1,16], index: 6, kind: input, shape index: {}]   ;;  %s6300_s7 = inlined_call_operand.vmem [shape: f32[3,3,16], index: 7, kind: input, shape index: {}]   ;;  %s6301_s8 = inlined_call_operand.vmem [shape: f32[1,16], index: 8, kind: input, shape index: {}]   ;;  %s6302_s9 = inlined_call_operand.vmem [shape: f32[1,16], index: 9, kind: input, shape index: {}]   ;;  %s6303_s10 = inlined_call_operand.vmem [shape: f32[16,4], index: 10, kind: input, shape index: {}]   ;;  %s6304_s11 = inlined_call_operand.vmem [shape: f32[1,4], index: 11, kind: input, shape index: {}]   ;;  %s6305_s12 = inlined_call_operand.vmem [shape: f32[1,4], index: 12, kind: input, shape index: {}]   ;;  %s6306_s13 = inlined_call_operand.vmem [shape: f32[2,16,16,4], index: 13, kind: output, shape index: {}]  }
   0x1   :  { %s3558_s27 = smov 0   ;;  %s3560_s28 = smov 0  }
   0x2   :  { %s3562_s29 = smov 0  }
   0x3 LB: > { %6366 = sst [smem:[#allocation4_spill]] %s3472_s27  ;;  %s32_s30 = sadd.s32 1, %s3472_s27  ;;  %s3480_s29 = sphi %s3562_s29, %s23_s29   ;;  %s3476_s28 = sphi %s3560_s28, %s6463_s28   ;;  %s3472_s27 = sphi %s3558_s27, %s6462_s27   ;;  %s3468_s26 = sphi %s3556_s26, %s6461_s26   ;;  %s3464_s25 = sphi %s3554_s25, %s6460_s25  }
   0x4   : > { %6367 = sst [smem:[#allocation5_spill]] %s3476_s28  ;;  %s35_s14 = sadd.s32 1, %s3476_s28 }
   0x5   : > { %p33_p0 = scmp.ge.s32.totalorder %s32_s30, 2  ;;  %p3275_p1 = scmp.ge.s32.totalorder %s3480_s29, 1 }
   0x6   : > { %p401_p2 = scmp.lt.s32.totalorder %s3480_s29, 5 }
   0x7   : > { %s6465_s30 = smov (%p33_p0, %s32_s30), 0  ;;  %s6467_s14 = smov (!%p33_p0, %s35_s14), %s3476_s28 }
   0x8   : > { %6368 = sst [smem:[#allocation6_spill]] %s6465_s30  ;;  %p402_p3 = pnand %p3275_p1, %p401_p2 }
   0x9   : > { %p37_p4 = scmp.ge.s32.totalorder %s6467_s14, 2 }
   0xa   : > { %405 = sbr.rel (%p402_p3) target bundleno = 700 (0x2bc), region = 72 }
   0xb   : > { %s6469_s14 = smov (%p37_p4, %s6467_s14), 0 }
   0xc   : > { %6369 = sst [smem:[#allocation7_spill]] %s6469_s14 }
   0xf   : > { %p450_p5 = scmp.lt.s32.totalorder %s3468_s26, 1  ;;  %s3587_s15 = sshll.u32 %s3464_s25, 3 }
  0x10   : > { %p458_p6 = scmp.lt.s32.totalorder %s3587_s15, 15  ;;  %s3283_s16 = sadd.s32 4294967295, %s3587_s15 }
  0x11   : > { %s6471_s26 = smov (!%p450_p5, %s3468_s26), 1  ;;  %p3284_p7 = scmp.ne.s32.totalorder %s3464_s25, 0 }
  0x12   : > { %s459_s17 = scalar_select %p458_p6, %s3587_s15, 15 }
  0x13   : > { %s3338_s18 = sshll.u32 %s6471_s26, 8  ;;  %s3280_s19 = sshll.u32 %s6471_s26, 5 }
  0x14   : > { %s3595_s22 = scalar_lea.vmem %s6293_s0, %s3338_s18  ;;  %s3279_s23 = sshll.u32 %s459_s17, 1 }
  0x15   : > { %s462_s24 = sadd.s32 %s3280_s19, %s3279_s23  ;;  %471 = sbr.rel (%p3284_p7) target bundleno = 119 (0x77), region = 76 }
  0x16   : > { %s3281_s14 = sshll.u32 %s462_s24, 3 }
  0x17   : > { %s3600_s27 = scalar_lea.vmem %s6306_s13, %s3281_s14 }
  0x1a   : > { %vm472_vm0 = vcmask 31744   ;;  %v3482_v0 = vmov 0.0   ;;  %vm475_vm1 = vcmask 25600   ;;  %v534_v1 = vld [vmem:[%s3595_s22] sm:$0xff]  ;;  %v535_v2 = vld [vmem:[%s3595_s22 + $0x8] sm:$0xff]  ;;  %v536_v3 = vld [vmem:[%s3595_s22 + $0x10] sm:$0xff] }
  0x1b   : > { %480 = vst.msk [vmem:[#allocation2 + $0x30] sm:$0xff] %vm472_vm0, %v3482_v0  ;;  %v537_v4 = vld [vmem:[%s3595_s22 + $0x18] sm:$0xff]  ;;  %v538_v5 = vld [vmem:[%s3595_s22 + $0x20] sm:$0xff]  ;;  %v539_v6 = vld [vmem:[%s3595_s22 + $0x28] sm:$0xff] }
  0x1c   : > { %473 = vst.msk [vmem:[#allocation2] sm:$0xff] %vm472_vm0, %v3482_v0  ;;  %v540_v7 = vld [vmem:[%s3595_s22 + $0x30] sm:$0xff]  ;;  %v541_v8 = vld [vmem:[%s3595_s22 + $0x38] sm:$0xff]  ;;  %v542_v9 = vld [vmem:[%s3595_s22 + $0x40] sm:$0xff] }
  0x1d   : > { %474 = vst.msk [vmem:[#allocation2 + $0x8] sm:$0xff] %vm472_vm0, %v3482_v0  ;;  %v543_v10 = vld [vmem:[%s3595_s22 + $0x48] sm:$0xff]  ;;  %v544_v11 = vld [vmem:[%s3595_s22 + $0x50] sm:$0xff]  ;;  %v545_v12 = vld [vmem:[%s3595_s22 + $0x58] sm:$0xff] }
  0x1e   : > { %477 = vst.msk [vmem:[#allocation2 + $0x18] sm:$0xff] %vm472_vm0, %v3482_v0  ;;  %v546_v13 = vld [vmem:[%s3595_s22 + $0x60] sm:$0xff]  ;;  %v547_v14 = vld [vmem:[%s3595_s22 + $0x68] sm:$0xff]  ;;  %v548_v15 = vld [vmem:[%s3595_s22 + $0x70] sm:$0xff] }
  0x1f   : > { %478 = vst.msk [vmem:[#allocation2 + $0x20] sm:$0xff] %vm472_vm0, %v3482_v0  ;;  %v549_v16 = vld [vmem:[%s3595_s22 + $0x78] sm:$0xff]  ;;  %v550_v17 = vld [vmem:[%s3595_s22 + $0x80] sm:$0xff]  ;;  %v551_v18 = vld [vmem:[%s3595_s22 + $0x88] sm:$0xff] }
  0x20   : > { %481 = vst.msk [vmem:[#allocation2 + $0x38] sm:$0xff] %vm472_vm0, %v3482_v0  ;;  %v552_v19 = vld [vmem:[%s3595_s22 + $0x90] sm:$0xff]  ;;  %v553_v20 = vld [vmem:[%s3595_s22 + $0x98] sm:$0xff]  ;;  %v554_v21 = vld [vmem:[%s3595_s22 + $0xa0] sm:$0xff] }
  0x21   : > { %483 = vst.msk [vmem:[#allocation2 + $0x48] sm:$0xff] %vm472_vm0, %v3482_v0  ;;  %v555_v22 = vld [vmem:[%s3595_s22 + $0xa8] sm:$0xff]  ;;  %v556_v23 = vld [vmem:[%s3595_s22 + $0xb0] sm:$0xff]  ;;  %v557_v24 = vld [vmem:[%s3595_s22 + $0xb8] sm:$0xff] }
  0x22   : > { %484 = vst.msk [vmem:[#allocation2 + $0x50] sm:$0xff] %vm472_vm0, %v3482_v0  ;;  %v558_v25 = vld [vmem:[%s3595_s22 + $0xc0] sm:$0xff]  ;;  %v559_v26 = vld [vmem:[%s3595_s22 + $0xc8] sm:$0xff]  ;;  %v560_v27 = vld [vmem:[%s3595_s22 + $0xd0] sm:$0xff] }
  0x23   : > { %486 = vst.msk [vmem:[#allocation2 + $0x60] sm:$0xff] %vm472_vm0, %v3482_v0  ;;  %v561_v28 = vld [vmem:[%s3595_s22 + $0xd8] sm:$0xff]  ;;  %v562_v29 = vld [vmem:[%s3595_s22 + $0xe0] sm:$0xff]  ;;  %v563_v30 = vld [vmem:[%s3595_s22 + $0xe8] sm:$0xff] }
  0x24   : > { %487 = vst.msk [vmem:[#allocation2 + $0x68] sm:$0xff] %vm472_vm0, %v3482_v0  ;;  %v564_v31 = vld [vmem:[%s3595_s22 + $0xf0] sm:$0xff]  ;;  %v565_v32 = vld [vmem:[%s3595_s22 + $0xf8] sm:$0xff] }
  0x25   : > { %489 = vst.msk [vmem:[#allocation2 + $0x78] sm:$0xff] %vm472_vm0, %v3482_v0 }
  0x26   : > { %490 = vst.msk [vmem:[#allocation2 + $0x80] sm:$0xff] %vm472_vm0, %v3482_v0 }
  0x27   : > { %492 = vst.msk [vmem:[#allocation2 + $0x90] sm:$0xff] %vm472_vm0, %v3482_v0 }
  0x28   : > { %493 = vst.msk [vmem:[#allocation2 + $0x98] sm:$0xff] %vm472_vm0, %v3482_v0 }
  0x29   : > { %495 = vst.msk [vmem:[#allocation2 + $0xa8] sm:$0xff] %vm472_vm0, %v3482_v0 }
  0x2a   : > { %496 = vst.msk [vmem:[#allocation2 + $0xb0] sm:$0xff] %vm472_vm0, %v3482_v0 }
  0x2b   : > { %498 = vst.msk [vmem:[#allocation2 + $0xc0] sm:$0xff] %vm472_vm0, %v3482_v0 }
  0x2c   : > { %499 = vst.msk [vmem:[#allocation2 + $0xc8] sm:$0xff] %vm472_vm0, %v3482_v0 }
  0x2d   : > { %501 = vst.msk [vmem:[#allocation2 + $0xd8] sm:$0xff] %vm472_vm0, %v3482_v0 }
  0x2e   : > { %502 = vst.msk [vmem:[#allocation2 + $0xe0] sm:$0xff] %vm472_vm0, %v3482_v0 }
  0x2f   : > { %504 = vst.msk [vmem:[#allocation2 + $0xf0] sm:$0xff] %vm472_vm0, %v3482_v0 }
  0x30   : > { %505 = vst.msk [vmem:[#allocation2 + $0xf8] sm:$0xff] %vm472_vm0, %v3482_v0 }
  0x31   : > { %507 = vst.msk [vmem:[#allocation2 + $0x108] sm:$0xff] %vm472_vm0, %v3482_v0 }
  0x32   : > { %508 = vst.msk [vmem:[#allocation2 + $0x110] sm:$0xff] %vm472_vm0, %v3482_v0 }
  0x33   : > { %510 = vst.msk [vmem:[#allocation2 + $0x120] sm:$0xff] %vm472_vm0, %v3482_v0 }
  0x34   : > { %511 = vst.msk [vmem:[#allocation2 + $0x128] sm:$0xff] %vm472_vm0, %v3482_v0 }
  0x35   : > { %513 = vst.msk [vmem:[#allocation2 + $0x138] sm:$0xff] %vm472_vm0, %v3482_v0 }
  0x36   : > { %514 = vst.msk [vmem:[#allocation2 + $0x140] sm:$0xff] %vm472_vm0, %v3482_v0 }
  0x37   : > { %516 = vst.msk [vmem:[#allocation2 + $0x150] sm:$0xff] %vm472_vm0, %v3482_v0 }
  0x38   : > { %517 = vst.msk [vmem:[#allocation2 + $0x158] sm:$0xff] %vm472_vm0, %v3482_v0 }
  0x39   : > { %519 = vst.msk [vmem:[#allocation2 + $0x168] sm:$0xff] %vm472_vm0, %v3482_v0 }
  0x3a   : > { %520 = vst.msk [vmem:[#allocation2 + $0x170] sm:$0xff] %vm472_vm0, %v3482_v0 }
  0x3b   : > { %522 = vst.msk [vmem:[#allocation2 + $0x180] sm:$0xff] %vm472_vm0, %v3482_v0 }
  0x3c   : > { %523 = vst.msk [vmem:[#allocation2 + $0x188] sm:$0xff] %vm472_vm0, %v3482_v0 }
  0x3d   : > { %525 = vst.msk [vmem:[#allocation2 + $0x198] sm:$0xff] %vm472_vm0, %v3482_v0 }
  0x3e   : > { %526 = vst.msk [vmem:[#allocation2 + $0x1a0] sm:$0xff] %vm472_vm0, %v3482_v0 }
  0x3f   : > { %528 = vst.msk [vmem:[#allocation2 + $0x1b0] sm:$0xff] %vm472_vm0, %v3482_v0 }
  0x40   : > { %529 = vst.msk [vmem:[#allocation2 + $0x1b8] sm:$0xff] %vm472_vm0, %v3482_v0 }
  0x41   : > { %531 = vst.msk [vmem:[#allocation2 + $0x1c8] sm:$0xff] %vm472_vm0, %v3482_v0 }
  0x42   : > { %532 = vst.msk [vmem:[#allocation2 + $0x1d0] sm:$0xff] %vm472_vm0, %v3482_v0 }
  0x43   : > { %482 = vst.msk [vmem:[#allocation2 + $0x40] sm:$0x3] %vm475_vm1, %v3482_v0 }
  0x44   : > { %476 = vst.msk [vmem:[#allocation2 + $0x10] sm:$0x3] %vm475_vm1, %v3482_v0 }
  0x45   : > { %479 = vst.msk [vmem:[#allocation2 + $0x28] sm:$0x3] %vm475_vm1, %v3482_v0 }
  0x46   : > { %485 = vst.msk [vmem:[#allocation2 + $0x58] sm:$0x3] %vm475_vm1, %v3482_v0 }
  0x47   : > { %488 = vst.msk [vmem:[#allocation2 + $0x70] sm:$0x3] %vm475_vm1, %v3482_v0 }
  0x48   : > { %491 = vst.msk [vmem:[#allocation2 + $0x88] sm:$0x3] %vm475_vm1, %v3482_v0 }
  0x49   : > { %494 = vst.msk [vmem:[#allocation2 + $0xa0] sm:$0x3] %vm475_vm1, %v3482_v0 }
  0x4a   : > { %497 = vst.msk [vmem:[#allocation2 + $0xb8] sm:$0x3] %vm475_vm1, %v3482_v0 }
  0x4b   : > { %500 = vst.msk [vmem:[#allocation2 + $0xd0] sm:$0x3] %vm475_vm1, %v3482_v0 }
  0x4c   : > { %503 = vst.msk [vmem:[#allocation2 + $0xe8] sm:$0x3] %vm475_vm1, %v3482_v0 }
  0x4d   : > { %506 = vst.msk [vmem:[#allocation2 + $0x100] sm:$0x3] %vm475_vm1, %v3482_v0 }
  0x4e   : > { %509 = vst.msk [vmem:[#allocation2 + $0x118] sm:$0x3] %vm475_vm1, %v3482_v0 }
  0x4f   : > { %512 = vst.msk [vmem:[#allocation2 + $0x130] sm:$0x3] %vm475_vm1, %v3482_v0 }
  0x50   : > { %515 = vst.msk [vmem:[#allocation2 + $0x148] sm:$0x3] %vm475_vm1, %v3482_v0 }
  0x51   : > { %518 = vst.msk [vmem:[#allocation2 + $0x160] sm:$0x3] %vm475_vm1, %v3482_v0 }
  0x52   : > { %521 = vst.msk [vmem:[#allocation2 + $0x178] sm:$0x3] %vm475_vm1, %v3482_v0 }
  0x53   : > { %524 = vst.msk [vmem:[#allocation2 + $0x190] sm:$0x3] %vm475_vm1, %v3482_v0 }
  0x54   : > { %527 = vst.msk [vmem:[#allocation2 + $0x1a8] sm:$0x3] %vm475_vm1, %v3482_v0 }
  0x55   : > { %530 = vst.msk [vmem:[#allocation2 + $0x1c0] sm:$0x3] %vm475_vm1, %v3482_v0 }
  0x56   : > { %533 = vst.msk [vmem:[#allocation2 + $0x1d8] sm:$0x3] %vm475_vm1, %v3482_v0 }
  0x57   : > { %567 = vst.msk [vmem:[#allocation2 + $0x31] sm:$0xff] %vm472_vm0, %v534_v1 }
  0x58   : > { %568 = vst.msk [vmem:[#allocation2 + $0x39] sm:$0xff] %vm472_vm0, %v535_v2 }
  0x59   : > { %569 = vst.msk [vmem:[#allocation2 + $0x49] sm:$0xff] %vm472_vm0, %v536_v3 }
  0x5a   : > { %570 = vst.msk [vmem:[#allocation2 + $0x51] sm:$0xff] %vm472_vm0, %v537_v4 }
  0x5b   : > { %571 = vst.msk [vmem:[#allocation2 + $0x61] sm:$0xff] %vm472_vm0, %v538_v5 }
  0x5c   : > { %572 = vst.msk [vmem:[#allocation2 + $0x69] sm:$0xff] %vm472_vm0, %v539_v6 }
  0x5d   : > { %573 = vst.msk [vmem:[#allocation2 + $0x79] sm:$0xff] %vm472_vm0, %v540_v7 }
  0x5e   : > { %574 = vst.msk [vmem:[#allocation2 + $0x81] sm:$0xff] %vm472_vm0, %v541_v8 }
  0x5f   : > { %575 = vst.msk [vmem:[#allocation2 + $0x91] sm:$0xff] %vm472_vm0, %v542_v9 }
  0x60   : > { %576 = vst.msk [vmem:[#allocation2 + $0x99] sm:$0xff] %vm472_vm0, %v543_v10 }
  0x61   : > { %577 = vst.msk [vmem:[#allocation2 + $0xa9] sm:$0xff] %vm472_vm0, %v544_v11 }
  0x62   : > { %578 = vst.msk [vmem:[#allocation2 + $0xb1] sm:$0xff] %vm472_vm0, %v545_v12 }
  0x63   : > { %579 = vst.msk [vmem:[#allocation2 + $0xc1] sm:$0xff] %vm472_vm0, %v546_v13 }
  0x64   : > { %580 = vst.msk [vmem:[#allocation2 + $0xc9] sm:$0xff] %vm472_vm0, %v547_v14 }
  0x65   : > { %581 = vst.msk [vmem:[#allocation2 + $0xd9] sm:$0xff] %vm472_vm0, %v548_v15 }
  0x66   : > { %582 = vst.msk [vmem:[#allocation2 + $0xe1] sm:$0xff] %vm472_vm0, %v549_v16 }
  0x67   : > { %583 = vst.msk [vmem:[#allocation2 + $0xf1] sm:$0xff] %vm472_vm0, %v550_v17 }
  0x68   : > { %584 = vst.msk [vmem:[#allocation2 + $0xf9] sm:$0xff] %vm472_vm0, %v551_v18 }
  0x69   : > { %585 = vst.msk [vmem:[#allocation2 + $0x109] sm:$0xff] %vm472_vm0, %v552_v19 }
  0x6a   : > { %586 = vst.msk [vmem:[#allocation2 + $0x111] sm:$0xff] %vm472_vm0, %v553_v20 }
  0x6b   : > { %587 = vst.msk [vmem:[#allocation2 + $0x121] sm:$0xff] %vm472_vm0, %v554_v21 }
  0x6c   : > { %588 = vst.msk [vmem:[#allocation2 + $0x129] sm:$0xff] %vm472_vm0, %v555_v22 }
  0x6d   : > { %589 = vst.msk [vmem:[#allocation2 + $0x139] sm:$0xff] %vm472_vm0, %v556_v23 }
  0x6e   : > { %590 = vst.msk [vmem:[#allocation2 + $0x141] sm:$0xff] %vm472_vm0, %v557_v24 }
  0x6f   : > { %591 = vst.msk [vmem:[#allocation2 + $0x151] sm:$0xff] %vm472_vm0, %v558_v25 }
  0x70   : > { %592 = vst.msk [vmem:[#allocation2 + $0x159] sm:$0xff] %vm472_vm0, %v559_v26 }
  0x71   : > { %593 = vst.msk [vmem:[#allocation2 + $0x169] sm:$0xff] %vm472_vm0, %v560_v27 }
  0x72   : > { %594 = vst.msk [vmem:[#allocation2 + $0x171] sm:$0xff] %vm472_vm0, %v561_v28 }
  0x73   : > { %595 = vst.msk [vmem:[#allocation2 + $0x181] sm:$0xff] %vm472_vm0, %v562_v29 }
  0x74   : > { %596 = vst.msk [vmem:[#allocation2 + $0x189] sm:$0xff] %vm472_vm0, %v563_v30 }
  0x75   : > { %597 = vst.msk [vmem:[#allocation2 + $0x199] sm:$0xff] %vm472_vm0, %v564_v31 }
  0x76   : > { %598 = vst.msk [vmem:[#allocation2 + $0x1a1] sm:$0xff] %vm472_vm0, %v565_v32 }
  0x77 PF: > { %v1727_v33 = vld [vmem:[%s6297_s4] sm:$0xf]  ;;  %vm1789_vm2 = vcmask 1043456   ;;  %s3285_s30 = smul.u32 192, %s3464_s25  ;;  %vm743_vm3 = vcmask 1046528   ;;  %vm896_vm4 = vcmask 1045504  }
  0x78   : > { %3292 = vmatpush.msk.msra.mxu0 %vm1789_vm2, %v1727_v33  ;;  %3340 = vmatpush.msk.msra.mxu2 %vm1789_vm2, %v1727_v33  ;;  %v3794_v34 = vld [vmem:[%s6294_s1] ss:$0 sm:$0xff]  ;;  %v3799_v35 = vld [vmem:[%s6294_s1 + $0x1] ss:$0 sm:$0xff]  ;;  %v3822_v44 = vld [vmem:[%s6294_s1 + $0x2] ss:$0 sm:$0xff] }
  0x79   : > { %3341 = vmatpush.msk.msra.mxu3 %vm1789_vm2, %v1727_v33  ;;  %s3801_s20 = scalar_lea.vmem [#allocation2], %s3285_s30  ;;  %v3831_v48 = vld [vmem:[%s6294_s1 + $0x4] ss:$0 sm:$0xff]  ;;  %v3840_v51 = vld [vmem:[%s6294_s1 + $0x5] ss:$0 sm:$0xff]  ;;  %vm1728_vm5 = vcmask 31744  }
  0x7a   : > { %v3845_v52 = vld [vmem:[%s6294_s1 + $0x6] ss:$0 sm:$0xff]  ;;  %v3858_v56 = vld [vmem:[%s6294_s1 + $0x8] ss:$0 sm:$0xff]  ;;  %v3874_v63 = vld [vmem:[%s6294_s1 + $0x9] ss:$0 sm:$0xff] }
  0x7b   : > { %v3891_v4 = vld [vmem:[%s6294_s1 + $0xa] ss:$0 sm:$0xff]  ;;  %vm1998_vm8 = vcmask 130048   ;;  %vm2001_vm13 = vcmask 123904   ;;  %s3339_s15 = sshll.u32 %s3464_s25, 7 }
  0x7c   : > { %s6192_s25 = scalar_lea.vmem %s3595_s22, %s3339_s15 }
  0x7d   : > { %v601_v36 = vld [vmem:[%s3801_s20] sm:$0xff]  ;;  %v602_v37 = vld [vmem:[%s3801_s20 + $0x8] sm:$0xff]  ;;  %v3806_v38 = vld [vmem:[%s3801_s20 + $0x18] sm:$0xff] }
  0x7e   : > { %v683_v39 = vmul.f32 %v3799_v35, %v601_v36  ;;  %v3810_v40 = vmul.f32 %v3799_v35, %v602_v37  ;;  %v3813_v41 = vld [vmem:[%s3801_s20 + $0x20] sm:$0xff]  ;;  %v3816_v42 = vld [vmem:[%s3801_s20 + $0x30] sm:$0xff]  ;;  %v641_v43 = vmul.f32 %v3794_v34, %v601_v36  ;;  %v3825_v45 = vld [vmem:[%s3801_s20 + $0x38] sm:$0xff]  ;;  %v836_v49 = vmul.f32 %v3822_v44, %v601_v36 }
  0x7f   : > { %v3835_v50 = vmul.f32 %v3822_v44, %v602_v37  ;;  %v3848_v53 = vmul.f32 %v3794_v34, %v602_v37  ;;  %v990_v55 = vmul.f32 %v3831_v48, %v3806_v38  ;;  %v3862_v57 = vmul.f32 %v3831_v48, %v3813_v41  ;;  %v3905_v13 = vld [vmem:[%s3801_s20 + $0x68] sm:$0xff]  ;;  %v3915_v18 = vld [vmem:[%s3801_s20 + $0x70] sm:$0x3]  ;;  %v3924_v22 = vld [vmem:[%s3801_s20 + $0x80] sm:$0xff] }
  0x80   : > { %v744_v46 = vrot.slane %v683_v39, 1  ;;  %v745_v47 = vrot.slane %v3810_v40, 1  ;;  %v3866_v58 = vmul.f32 %v3799_v35, %v3806_v38  ;;  %v897_v60 = vrot.slane %v836_v49, 2  ;;  %v3933_v27 = vld [vmem:[%s3801_s20 + $0x88] sm:$0x3]  ;;  %v3951_v36 = vld [vmem:[%s3801_s20 + $0x98] sm:$0xff] }
  0x81   : > { %v898_v61 = vrot.slane %v3835_v50, 2  ;;  %v1032_v62 = vmul.f32 %v3840_v51, %v3806_v38  ;;  %v3878_v0 = vmul.f32 %v3840_v51, %v3813_v41  ;;  %v1184_v1 = vmul.f32 %v3845_v52, %v3806_v38 }
  0x82   : > { %v746_v54 = vsel %vm743_vm3, %v744_v46, %v745_v47  ;;  %v3884_v2 = vmul.f32 %v3845_v52, %v3813_v41  ;;  %v1337_v3 = vmul.f32 %v3858_v56, %v3816_v42  ;;  %v1379_v7 = vmul.f32 %v3874_v63, %v3816_v42 }
  0x83   : > { %v814_v59 = vadd.f32 %v746_v54, %v641_v43  ;;  %v899_v5 = vsel %vm896_vm4, %v897_v60, %v898_v61  ;;  %v1092_v6 = vrot.slane %v1032_v62, 1  ;;  %v3900_v8 = vmul.f32 %v3874_v63, %v3825_v45 }
  0x84   : > { %v1093_v10 = vrot.slane %v3878_v0, 1  ;;  %v1244_v11 = vrot.slane %v1184_v1, 2  ;;  %v1245_v12 = vrot.slane %v3884_v2, 2  ;;  %v1439_v14 = vrot.slane %v1379_v7, 1  ;;  %v3976_v7 = vld [vmem:[%s6295_s2] ss:$0 sm:$0xff] }
  0x85   : > { %v967_v9 = vadd.f32 %v899_v5, %v814_v59  ;;  %v6315_v15 = vrot.slane %v3900_v8, 1  ;;  %v1531_v16 = vmul.f32 %v3891_v4, %v3816_v42  ;;  %v3912_v17 = vmul.f32 %v3891_v4, %v3825_v45  ;;  %v3962_v59 = vld [vmem:[%s3801_s20 + $0xa0] sm:$0x3]  ;;  %v4061_v0 = vld [vmem:[%s3801_s20 + $0x90] sm:$0xff] }
  0x86   : > { %v1094_v20 = vsel %vm743_vm3, %v1092_v6, %v1093_v10  ;;  %v1246_v21 = vsel %vm896_vm4, %v1244_v11, %v1245_v12  ;;  %v650_v23 = vmul.f32 %v3794_v34, %v3905_v13  ;;  %v3937_v28 = vmul.f32 %v3799_v35, %v3905_v13 }
  0x87   : > { %v1010_v19 = vadd.f32 %v990_v55, %v967_v9  ;;  %v1441_v24 = vsel %vm743_vm3, %v1439_v14, %v6315_v15  ;;  %v1591_v25 = vrot.slane %v1531_v16, 2  ;;  %v6313_v26 = vrot.slane %v3912_v17, 2 }
  0x88   : > { %6370 = vst [vmem:[#allocation8_spill] sm:$0xff] %v3937_v28  ;;  %v697_v30 = vmul.f32 %v3799_v35, %v3915_v18  ;;  %v3943_v31 = vmul.f32 %v3822_v44, %v3905_v13  ;;  %v850_v32 = vmul.f32 %v3822_v44, %v3915_v18  ;;  %v6312_v37 = vrot.slane %v3937_v28, 1 }
  0x89   : > { %v1162_v29 = vadd.f32 %v1094_v20, %v1010_v19  ;;  %v1593_v33 = vsel %vm896_vm4, %v1591_v25, %v6313_v26  ;;  %v999_v39 = vmul.f32 %v3831_v48, %v3924_v22  ;;  %v3958_v43 = vmul.f32 %v3840_v51, %v3924_v22 }
  0x8a   : > { %6371 = vst [vmem:[#allocation9_spill] sm:$0xff] %v3943_v31  ;;  %v767_v49 = vrot.slane %v697_v30, 1  ;;  %v6311_v54 = vrot.slane %v3943_v31, 2  ;;  %v920_v55 = vrot.slane %v850_v32, 2  ;;  %v1046_v60 = vmul.f32 %v3840_v51, %v3933_v27  ;;  %v603_v32 = vld [vmem:[%s3801_s20 + $0x10] sm:$0x3] }
  0x8b   : > { %6372 = vst [vmem:[#allocation10_spill] sm:$0xff] %v3958_v43  ;;  %v1314_v46 = vadd.f32 %v1246_v21, %v1162_v29  ;;  %v6310_v62 = vrot.slane %v3958_v43, 1  ;;  %v3969_v1 = vmul.f32 %v3845_v52, %v3924_v22  ;;  %v1198_v5 = vmul.f32 %v3845_v52, %v3933_v27 }
  0x8c   : > { %v768_v9 = vsel %vm743_vm3, %v6312_v37, %v767_v49  ;;  %v921_v11 = vsel %vm896_vm4, %v6311_v54, %v920_v55  ;;  %v1346_v14 = vmul.f32 %v3858_v56, %v3951_v36  ;;  %v1115_v19 = vrot.slane %v1046_v60, 1  ;;  %v4007_v55 = vld [vmem:[%s3801_s20 + $0x28] sm:$0x3] }
  0x8d   : > { %6373 = vst [vmem:[#allocation11_spill] sm:$0xff] %v3969_v1  ;;  %v1357_v6 = vadd.f32 %v1337_v3, %v1314_v46  ;;  %v823_v16 = vadd.f32 %v768_v9, %v650_v23  ;;  %v6309_v3 = vrot.slane %v3969_v1, 2  ;;  %v1267_v20 = vrot.slane %v1198_v5, 2  ;;  %v4012_v5 = vld [vmem:[%s6296_s3] ss:$0 sm:$0xff] }
  0x8e   : > { %v3989_v25 = vmul.f32 %v3874_v63, %v3951_v36  ;;  %v1393_v29 = vmul.f32 %v3874_v63, %v3962_v59  ;;  %v3995_v30 = vmul.f32 %v3891_v4, %v3951_v36  ;;  %v1116_v23 = vsel %vm743_vm3, %v6310_v62, %v1115_v19 }
  0x8f   : > { %v1509_v21 = vadd.f32 %v1441_v24, %v1357_v6  ;;  %v976_v46 = vadd.f32 %v921_v11, %v823_v16  ;;  %v1268_v24 = vsel %vm896_vm4, %v6309_v3, %v1267_v20  ;;  %v1545_v49 = vmul.f32 %v3891_v4, %v3962_v59 }
  0x90   : > { %6374 = vst [vmem:[#allocation12_spill] sm:$0xff] %v3989_v25  ;;  %v6314_v6 = vrot.slane %v3989_v25, 1  ;;  %v1462_v9 = vrot.slane %v1393_v29, 1  ;;  %v6316_v11 = vrot.slane %v3995_v30, 2  ;;  %v685_v20 = vmul.f32 %v3799_v35, %v603_v32 }
  0x91   : > { %6375 = vst [vmem:[#allocation13_spill] sm:$0xff] %v3995_v30  ;;  %v1661_v60 = vadd.f32 %v1593_v33, %v1509_v21  ;;  %v1019_v16 = vadd.f32 %v999_v39, %v976_v46  ;;  %v1614_v19 = vrot.slane %v1545_v49, 2  ;;  %v838_v3 = vmul.f32 %v3822_v44, %v603_v32  ;;  %v4023_v21 = vld [vmem:[%s3801_s20 + $0x40] sm:$0x3] }
  0x92   : > { %v1463_v33 = vsel %vm743_vm3, %v6314_v6, %v1462_v9  ;;  %v1034_v29 = vmul.f32 %v3840_v51, %v4007_v55  ;;  %v1186_v39 = vmul.f32 %v3845_v52, %v4007_v55  ;;  %v747_v32 = vrot.slane %v685_v20, 1  ;;  %v4036_v6 = vld [vmem:[%s3801_s20 + $0x78] sm:$0xff] }
  0x93   : > { %v1684_v62 = vmul.f32 %v3976_v7, %v1661_v60  ;;  %v1171_v46 = vadd.f32 %v1116_v23, %v1019_v16  ;;  %v1615_v49 = vsel %vm896_vm4, %v6316_v11, %v1614_v19  ;;  %v900_v54 = vrot.slane %v838_v3, 2 }
  0x94   : > { %v1095_v37 = vrot.slane %v1034_v29, 1  ;;  %v1247_v26 = vrot.slane %v1186_v39, 2  ;;  %v1338_v9 = vmul.f32 %v3858_v56, %v3825_v45  ;;  %v748_v23 = vsel %vm743_vm3, %v745_v47, %v747_v32 }
  0x95   : > { %v1707_v60 = vadd.f32 %v4012_v5, %v1684_v62  ;;  %v1323_v15 = vadd.f32 %v1268_v24, %v1171_v46  ;;  %v901_v16 = vsel %vm896_vm4, %v898_v61, %v900_v54  ;;  %v1381_v62 = vmul.f32 %v3874_v63, %v4023_v21 }
  0x96   : > { %v815_v3 = vadd.f32 %v748_v23, %v3848_v53  ;;  %v1096_v19 = vsel %vm743_vm3, %v1093_v10, %v1095_v37  ;;  %v1248_v40 = vsel %vm896_vm4, %v1245_v12, %v1247_v26  ;;  %v1533_v47 = vmul.f32 %v3891_v4, %v4023_v21 }
  0x97   : > { %3293 = vmatmul.msk.f32.vlgmr.msra.gmra.mxu0 %vm1728_vm5, %v1707_v60  ;;  %v1366_v50 = vadd.f32 %v1346_v14, %v1323_v15  ;;  %v1442_v61 = vrot.slane %v1381_v62, 1  ;;  %v651_v54 = vmul.f32 %v3794_v34, %v4036_v6  ;;  %v698_v24 = vmul.f32 %v3799_v35, %v4036_v6 }
  0x98   : > { %v968_v53 = vadd.f32 %v901_v16, %v815_v3  ;;  %v1594_v20 = vrot.slane %v1533_v47, 2  ;;  %v4065_v2 = vmul.f32 %v3799_v35, %v3924_v22  ;;  %v851_v10 = vmul.f32 %v3822_v44, %v4036_v6  ;;  %v4087_v3 = vld [vmem:[%s3801_s20 + $0xa8] sm:$0xff] }
  0x99   : > { %v1518_v12 = vadd.f32 %v1463_v33, %v1366_v50  ;;  %v6376_v15 = vrot.slane %v3900_v8, 1  ;;  %v769_v37 = vrot.slane %v698_v24, 1  ;;  %v4074_v14 = vmul.f32 %v3822_v44, %v3924_v22  ;;  %v4100_v50 = vld [vmem:[%s3801_s20 + $0xb0] sm:$0xff] }
  0x9a   : > { %v1011_v29 = vadd.f32 %v3862_v57, %v968_v53  ;;  %v6377_v39 = vrot.slane %v3912_v17, 2  ;;  %v6326_v32 = vrot.slane %v4065_v2, 1  ;;  %v922_v60 = vrot.slane %v851_v10, 2 }
  0x9b   : > { %v1443_v26 = vsel %vm743_vm3, %v6376_v15, %v1442_v61  ;;  %v1670_v33 = vadd.f32 %v1615_v49, %v1518_v12  ;;  %v6324_v8 = vrot.slane %v4074_v14, 2  ;;  %v1000_v23 = vmul.f32 %v3831_v48, %v4061_v0 }
  0x9c   : > { %v1595_v46 = vsel %vm896_vm4, %v6377_v39, %v1594_v20  ;;  %v1047_v16 = vmul.f32 %v3840_v51, %v4061_v0  ;;  %v1163_v62 = vadd.f32 %v1096_v19, %v1011_v29  ;;  %v771_v57 = vsel %vm743_vm3, %v769_v37, %v6326_v32 }
  0x9d   : > { %v4094_v17 = vmul.f32 %v3840_v51, %v3951_v36  ;;  %v1199_v49 = vmul.f32 %v3845_v52, %v4061_v0  ;;  %v1693_v47 = vmul.f32 %v3976_v7, %v1670_v33  ;;  %v824_v61 = vadd.f32 %v771_v57, %v651_v54 }
  0x9e   : > { %v924_v19 = vsel %vm896_vm4, %v922_v60, %v6324_v8  ;;  %v1117_v24 = vrot.slane %v1047_v16, 1  ;;  %v1315_v53 = vadd.f32 %v1248_v40, %v1163_v62  ;;  %v4108_v10 = vmul.f32 %v3845_v52, %v3951_v36 }
  0x9f   : > { %v6321_v20 = vrot.slane %v4094_v17, 1  ;;  %v1269_v12 = vrot.slane %v1199_v49, 2  ;;  %v1716_v15 = vadd.f32 %v4012_v5, %v1693_v47  ;;  %v977_v37 = vadd.f32 %v924_v19, %v824_v61 }
  0xa0   : > { %v1347_v29 = vmul.f32 %v3858_v56, %v4087_v3  ;;  %v1394_v54 = vmul.f32 %v3874_v63, %v4087_v3  ;;  %v1358_v39 = vadd.f32 %v1338_v9, %v1315_v53  ;;  %v6320_v60 = vrot.slane %v4108_v10, 2 }
  0xa1   : > { %v1119_v40 = vsel %vm743_vm3, %v1117_v24, %v6321_v20  ;;  %v4121_v33 = vmul.f32 %v3874_v63, %v4100_v50  ;;  %3302 = vmatmul.msk.f32.vlgmr.msra.gmra.mxu2 %vm1728_vm5, %v1716_v15  ;;  %v1020_v16 = vadd.f32 %v1000_v23, %v977_v37  ;;  %v1546_v57 = vmul.f32 %v3891_v4, %v4087_v3 }
  0xa2   : > { %v1464_v62 = vrot.slane %v1394_v54, 1  ;;  %v4128_v9 = vmul.f32 %v3891_v4, %v4100_v50  ;;  %v1510_v49 = vadd.f32 %v1443_v26, %v1358_v39  ;;  %v1271_v47 = vsel %vm896_vm4, %v1269_v12, %v6320_v60 }
  0xa3   : > { %v6318_v61 = vrot.slane %v4121_v33, 1  ;;  %v643_v19 = vmul.f32 %v3794_v34, %v3806_v38  ;;  %v1172_v24 = vadd.f32 %v1119_v40, %v1020_v16  ;;  %v1616_v23 = vrot.slane %v1546_v57, 2 }
  0xa4   : > { %v6317_v53 = vrot.slane %v4128_v9, 2  ;;  %v4139_v15 = vmul.f32 %v3799_v35, %v3813_v41  ;;  %v1662_v37 = vadd.f32 %v1595_v46, %v1510_v49  ;;  %v749_v12 = vrot.slane %v3866_v58, 1 }
  0xa5   : > { %v1466_v26 = vsel %vm743_vm3, %v1464_v62, %v6318_v61  ;;  %v839_v54 = vmul.f32 %v3822_v44, %v3806_v38  ;;  %v1324_v39 = vadd.f32 %v1271_v47, %v1172_v24  ;;  %v4153_v46 = vmul.f32 %v3822_v44, %v3813_v41  ;;  %v4161_v47 = vld [vmem:[%s3801_s20 + $0x48] sm:$0xff] }
  0xa6   : > { %v1618_v40 = vsel %vm896_vm4, %v1616_v23, %v6317_v53  ;;  %v6319_v16 = vrot.slane %v4139_v15, 1  ;;  %v1685_v57 = vmul.f32 %v3976_v7, %v1662_v37  ;;  %v992_v58 = vmul.f32 %v3831_v48, %v3816_v42 }
  0xa7   : > { %v902_v62 = vrot.slane %v839_v54, 2  ;;  %v1035_v38 = vmul.f32 %v3840_v51, %v3816_v42  ;;  %v1367_v49 = vadd.f32 %v1347_v29, %v1324_v39  ;;  %v6323_v23 = vrot.slane %v4153_v46, 2  ;;  %v4173_v54 = vld [vmem:[%s3801_s20 + $0x50] sm:$0xff] }
  0xa8   : > { %v751_v24 = vsel %vm743_vm3, %v749_v12, %v6319_v16  ;;  %v4169_v11 = vmul.f32 %v3840_v51, %v3825_v45  ;;  %v1708_v37 = vadd.f32 %v4012_v5, %v1685_v57  ;;  %v1187_v29 = vmul.f32 %v3845_v52, %v3816_v42 }
  0xa9   : > { %v816_v53 = vadd.f32 %v751_v24, %v643_v19  ;;  %v1097_v61 = vrot.slane %v1035_v38, 1  ;;  %v1519_v39 = vadd.f32 %v1466_v26, %v1367_v49  ;;  %v904_v12 = vsel %vm896_vm4, %v902_v62, %v6323_v23  ;;  %v4213_v23 = vld [vmem:[%s3801_s20 + $0xb8] sm:$0x3] }
  0xaa   : > { %v6322_v16 = vrot.slane %v4169_v11, 1  ;;  %v4183_v60 = vmul.f32 %v3845_v52, %v3825_v45  ;;  %3294 = vmatmul.msk.f32.gmra.mxu0 %vm1728_vm5, %v1708_v37  ;;  %v1249_v20 = vrot.slane %v1187_v29, 2  ;;  %v1339_v19 = vmul.f32 %v3858_v56, %v4161_v47 }
  0xab   : > { %v969_v57 = vadd.f32 %v904_v12, %v816_v53  ;;  %v1382_v26 = vmul.f32 %v3874_v63, %v4161_v47  ;;  %v1671_v38 = vadd.f32 %v1618_v40, %v1519_v39  ;;  %v4196_v24 = vmul.f32 %v3874_v63, %v4173_v54 }
  0xac   : > { %v1099_v62 = vsel %vm743_vm3, %v1097_v61, %v6322_v16  ;;  %v6325_v49 = vrot.slane %v4183_v60, 2  ;;  %v1534_v29 = vmul.f32 %v3891_v4, %v4161_v47  ;;  %v4202_v12 = vmul.f32 %v3891_v4, %v4173_v54 }
  0xad   : > { %v1012_v53 = vadd.f32 %v992_v58, %v969_v57  ;;  %v1444_v37 = vrot.slane %v1382_v26, 1  ;;  %v1694_v40 = vmul.f32 %v3976_v7, %v1671_v38  ;;  %v6329_v39 = vrot.slane %v4196_v24, 1 }
  0xae   : > { %v1251_v61 = vsel %vm896_vm4, %v1249_v20, %v6325_v49  ;;  %v652_v16 = vmul.f32 %v3794_v34, %v3924_v22  ;;  %v1596_v57 = vrot.slane %v1534_v29, 2  ;;  %v6328_v26 = vrot.slane %v4202_v12, 2 }
  0xaf   : > { %v1164_v58 = vadd.f32 %v1099_v62, %v1012_v53  ;;  %v700_v8 = vmul.f32 %v3799_v35, %v3933_v27  ;;  %v1717_v38 = vadd.f32 %v4012_v5, %v1694_v40  ;;  %v1446_v20 = vsel %vm743_vm3, %v1444_v37, %v6329_v39 }
  0xb0   : > { %v853_v49 = vmul.f32 %v3822_v44, %v3933_v27  ;;  %v1001_v62 = vmul.f32 %v3831_v48, %v3951_v36  ;;  %v1598_v29 = vsel %vm896_vm4, %v1596_v57, %v6328_v26  ;;  %v1049_v30 = vmul.f32 %v3840_v51, %v3962_v59 }
  0xb1   : > { %v1316_v53 = vadd.f32 %v1251_v61, %v1164_v58  ;;  %v772_v32 = vrot.slane %v700_v8, 1  ;;  %3303 = vmatmul.msk.f32.gmra.mxu2 %vm1728_vm5, %v1717_v38  ;;  %v1201_v37 = vmul.f32 %v3845_v52, %v3962_v59  ;;  %v1348_v27 = vmul.f32 %v3858_v56, %v4100_v50 }
  0xb2   : > { %v925_v40 = vrot.slane %v853_v49, 2  ;;  %v1396_v61 = vmul.f32 %v3874_v63, %v4213_v23  ;;  %v6378_v57 = vrot.slane %v4065_v2, 1  ;;  %v1120_v26 = vrot.slane %v1049_v30, 1 }
  0xb3   : > { %v1359_v58 = vadd.f32 %v1339_v19, %v1316_v53  ;;  %v1548_v38 = vmul.f32 %v3891_v4, %v4213_v23  ;;  %v6379_v39 = vrot.slane %v4074_v14, 2  ;;  %v1272_v1 = vrot.slane %v1201_v37, 2 }
  0xb4   : > { %v773_v8 = vsel %vm743_vm3, %v6378_v57, %v772_v32  ;;  %v1467_v43 = vrot.slane %v1396_v61, 1  ;;  %v6380_v28 = vrot.slane %v4094_v17, 1  ;;  %v644_v2 = vmul.f32 %v3794_v34, %v3813_v41 }
  0xb5   : > { %v825_v49 = vadd.f32 %v773_v8, %v652_v16  ;;  %v926_v25 = vsel %vm896_vm4, %v6379_v39, %v925_v40  ;;  %v1511_v31 = vadd.f32 %v1446_v20, %v1359_v58  ;;  %v1619_v53 = vrot.slane %v1548_v38, 2  ;;  %v4257_v40 = vld [vmem:[%s3801_s20 + $0x58] sm:$0x3] }
  0xb6   : > { %v1121_v19 = vsel %vm743_vm3, %v6380_v28, %v1120_v26  ;;  %v6381_v32 = vrot.slane %v4108_v10, 2  ;;  %v6382_v14 = vrot.slane %v4121_v33, 1  ;;  %v688_v17 = vmul.f32 %v3799_v35, %v4007_v55 }
  0xb7   : > { %v978_v30 = vadd.f32 %v926_v25, %v825_v49  ;;  %v1663_v20 = vadd.f32 %v1598_v29, %v1511_v31  ;;  %v6383_v28 = vrot.slane %v4128_v9, 2  ;;  %v841_v41 = vmul.f32 %v3822_v44, %v4007_v55 }
  0xb8   : > { %v1273_v16 = vsel %vm896_vm4, %v6381_v32, %v1272_v1  ;;  %v1468_v39 = vsel %vm743_vm3, %v6382_v14, %v1467_v43  ;;  %v993_v1 = vmul.f32 %v3831_v48, %v3825_v45  ;;  %v752_v10 = vrot.slane %v688_v17, 1 }
  0xb9   : > { %v1620_v26 = vsel %vm896_vm4, %v6383_v28, %v1619_v53  ;;  %v1021_v25 = vadd.f32 %v1001_v62, %v978_v30  ;;  %v1037_v43 = vmul.f32 %v3840_v51, %v4023_v21  ;;  %v1189_v33 = vmul.f32 %v3845_v52, %v4023_v21 }
  0xba   : > { %v1686_v31 = vmul.f32 %v3976_v7, %v1663_v20  ;;  %v905_v29 = vrot.slane %v841_v41, 2  ;;  %v1340_v9 = vmul.f32 %v3858_v56, %v4173_v54  ;;  %v1384_v55 = vmul.f32 %v3874_v63, %v4257_v40 }
  0xbb   : > { %v1173_v37 = vadd.f32 %v1121_v19, %v1021_v25  ;;  %v6384_v61 = vrot.slane %v4139_v15, 1  ;;  %v1100_v58 = vrot.slane %v1037_v43, 1  ;;  %v1252_v57 = vrot.slane %v1189_v33, 2 }
  0xbc   : > { %v1709_v8 = vadd.f32 %v4012_v5, %v1686_v31  ;;  %v6385_v49 = vrot.slane %v4153_v46, 2  ;;  %v1447_v30 = vrot.slane %v1384_v55, 1  ;;  %v6386_v14 = vrot.slane %v4169_v11, 1 }
  0xbd   : > { %v753_v62 = vsel %vm743_vm3, %v6384_v61, %v752_v10  ;;  %v1325_v32 = vadd.f32 %v1273_v16, %v1173_v37  ;;  %v6387_v19 = vrot.slane %v4183_v60, 2  ;;  %v1536_v20 = vmul.f32 %v3891_v4, %v4257_v40 }
  0xbe   : > { %v817_v38 = vadd.f32 %v753_v62, %v644_v2  ;;  %v906_v53 = vsel %vm896_vm4, %v6385_v49, %v905_v29  ;;  %v1101_v17 = vsel %vm743_vm3, %v6386_v14, %v1100_v58  ;;  %3295 = vmatmul.msk.f32.gmra.mxu0 %vm1728_vm5, %v1709_v8  ;;  %v6388_v46 = vrot.slane %v4196_v24, 1  ;;  %v4324_v8 = vld [vmem:[%s3801_s20 + $0xc0] sm:$0xff] }
  0xbf   : > { %v1253_v15 = vsel %vm896_vm4, %v6387_v19, %v1252_v57  ;;  %v653_v16 = vmul.f32 %v3794_v34, %v4061_v0  ;;  %v701_v11 = vmul.f32 %v3799_v35, %v4061_v0  ;;  %v1368_v41 = vadd.f32 %v1348_v27, %v1325_v32 }
  0xc0   : > { %v970_v2 = vadd.f32 %v906_v53, %v817_v38  ;;  %v1448_v28 = vsel %vm743_vm3, %v6388_v46, %v1447_v30  ;;  %v1599_v60 = vrot.slane %v1536_v20, 2  ;;  %v4302_v25 = vmul.f32 %v3799_v35, %v3951_v36  ;;  %v4336_v53 = vld [vmem:[%s3801_s20 + $0xc8] sm:$0xff] }
  0xc1   : > { %v854_v10 = vmul.f32 %v3822_v44, %v4061_v0  ;;  %v774_v24 = vrot.slane %v701_v11, 1  ;;  %v4308_v33 = vmul.f32 %v3822_v44, %v3951_v36  ;;  %v1002_v31 = vmul.f32 %v3831_v48, %v4087_v3 }
  0xc2   : > { %v1013_v43 = vadd.f32 %v993_v1, %v970_v2  ;;  %v1520_v27 = vadd.f32 %v1468_v39, %v1368_v41  ;;  %v6389_v29 = vrot.slane %v4202_v12, 2  ;;  %v775_v37 = vrot.slane %v4302_v25, 1 }
  0xc3   : > { %v927_v61 = vrot.slane %v854_v10, 2  ;;  %v928_v0 = vrot.slane %v4308_v33, 2  ;;  %v1050_v1 = vmul.f32 %v3840_v51, %v4087_v3  ;;  %v4321_v58 = vmul.f32 %v3840_v51, %v4100_v50 }
  0xc4   : > { %v1600_v55 = vsel %vm896_vm4, %v6389_v29, %v1599_v60  ;;  %v1165_v62 = vadd.f32 %v1101_v17, %v1013_v43  ;;  %v1672_v57 = vadd.f32 %v1620_v26, %v1520_v27  ;;  %v776_v12 = vsel %vm743_vm3, %v774_v24, %v775_v37 }
  0xc5   : > { %v1202_v39 = vmul.f32 %v3845_v52, %v4087_v3  ;;  %v4333_v38 = vmul.f32 %v3845_v52, %v4100_v50  ;;  %v826_v30 = vadd.f32 %v776_v12, %v653_v16  ;;  %v929_v26 = vsel %vm896_vm4, %v927_v61, %v928_v0 }
  0xc6   : > { %v1317_v49 = vadd.f32 %v1253_v15, %v1165_v62  ;;  %v1122_v32 = vrot.slane %v1050_v1, 1  ;;  %v1695_v14 = vmul.f32 %v3976_v7, %v1672_v57  ;;  %v1123_v17 = vrot.slane %v4321_v58, 1 }
  0xc7   : > { %v1274_v19 = vrot.slane %v1202_v39, 2  ;;  %v1275_v20 = vrot.slane %v4333_v38, 2  ;;  %v979_v46 = vadd.f32 %v929_v26, %v826_v30  ;;  %v1349_v15 = vmul.f32 %v3858_v56, %v4324_v8 }
  0xc8   : > { %v1360_v2 = vadd.f32 %v1340_v9, %v1317_v49  ;;  %v1397_v16 = vmul.f32 %v3874_v63, %v4324_v8  ;;  %v1718_v11 = vadd.f32 %v4012_v5, %v1695_v14  ;;  %v1124_v41 = vsel %vm743_vm3, %v1122_v32, %v1123_v17 }
  0xc9   : > { %v1276_v60 = vsel %vm896_vm4, %v1274_v19, %v1275_v20  ;;  %v4357_v9 = vmul.f32 %v3874_v63, %v4336_v53  ;;  %v1022_v43 = vadd.f32 %v1002_v31, %v979_v46  ;;  %v1549_v27 = vmul.f32 %v3891_v4, %v4324_v8  ;;  %v4391_v46 = vld [vmem:[%s3801_s20 + $0x60] sm:$0xff] }
  0xca   : > { %v1512_v10 = vadd.f32 %v1448_v28, %v1360_v2  ;;  %v1469_v24 = vrot.slane %v1397_v16, 1  ;;  %3304 = vmatmul.msk.f32.gmra.mxu2 %vm1728_vm5, %v1718_v11  ;;  %v4365_v61 = vmul.f32 %v3891_v4, %v4336_v53  ;;  %v645_v62 = vmul.f32 %v3794_v34, %v3816_v42 }
  0xcb   : > { %v6342_v29 = vrot.slane %v4357_v9, 1  ;;  %v689_v28 = vmul.f32 %v3799_v35, %v3816_v42  ;;  %v1174_v1 = vadd.f32 %v1124_v41, %v1022_v43  ;;  %v1621_v57 = vrot.slane %v1549_v27, 2 }
  0xcc   : > { %v1664_v31 = vadd.f32 %v1600_v55, %v1512_v10  ;;  %v4373_v12 = vmul.f32 %v3799_v35, %v3825_v45  ;;  %v6341_v49 = vrot.slane %v4365_v61, 2  ;;  %v842_v26 = vmul.f32 %v3822_v44, %v3816_v42 }
  0xcd   : > { %v1471_v39 = vsel %vm743_vm3, %v1469_v24, %v6342_v29  ;;  %v754_v30 = vrot.slane %v689_v28, 1  ;;  %v1326_v14 = vadd.f32 %v1276_v60, %v1174_v1  ;;  %v4385_v19 = vmul.f32 %v3822_v44, %v3825_v45 }
  0xce   : > { %v1687_v32 = vmul.f32 %v3976_v7, %v1664_v31  ;;  %v6336_v55 = vrot.slane %v4373_v12, 1  ;;  %v1623_v2 = vsel %vm896_vm4, %v1621_v57, %v6341_v49  ;;  %v907_v16 = vrot.slane %v842_v26, 2 }
  0xcf   : > { %v994_v11 = vmul.f32 %v3831_v48, %v4161_v47  ;;  %v1038_v42 = vmul.f32 %v3840_v51, %v4161_v47  ;;  %v1369_v60 = vadd.f32 %v1349_v15, %v1326_v14  ;;  %v6335_v43 = vrot.slane %v4385_v19, 2 }
  0xd0   : > { %v1710_v41 = vadd.f32 %v4012_v5, %v1687_v32  ;;  %v756_v10 = vsel %vm743_vm3, %v754_v30, %v6336_v55  ;;  %v4404_v27 = vmul.f32 %v3840_v51, %v4173_v54  ;;  %v1190_v31 = vmul.f32 %v3845_v52, %v4161_v47 }
  0xd1   : > { %v818_v24 = vadd.f32 %v756_v10, %v645_v62  ;;  %v1102_v28 = vrot.slane %v1038_v42, 1  ;;  %v1521_v1 = vadd.f32 %v1471_v39, %v1369_v60  ;;  %v909_v15 = vsel %vm896_vm4, %v907_v16, %v6335_v43 }
  0xd2   : > { %3296 = vmatmul.msk.f32.gmra.mxu0 %vm1728_vm5, %v1710_v41  ;;  %v4414_v57 = vmul.f32 %v3845_v52, %v4173_v54  ;;  %v1341_v62 = vmul.f32 %v3858_v56, %v4391_v46  ;;  %v6338_v26 = vrot.slane %v4404_v27, 1  ;;  %v1254_v32 = vrot.slane %v1190_v31, 2 }
  0xd3   : > { %v971_v30 = vadd.f32 %v909_v15, %v818_v24  ;;  %v1385_v14 = vmul.f32 %v3874_v63, %v4391_v46  ;;  %v1673_v39 = vadd.f32 %v1623_v2, %v1521_v1  ;;  %v4424_v16 = vmul.f32 %v3874_v63, %v3905_v13 }
  0xd4   : > { %v6337_v42 = vrot.slane %v4414_v57, 2  ;;  %v1537_v41 = vmul.f32 %v3891_v4, %v4391_v46  ;;  %v1104_v10 = vsel %vm743_vm3, %v1102_v28, %v6338_v26  ;;  %v4433_v31 = vmul.f32 %v3891_v4, %v3905_v13 }
  0xd5   : > { %v1014_v60 = vadd.f32 %v994_v11, %v971_v30  ;;  %v1449_v24 = vrot.slane %v1385_v14, 1  ;;  %v1696_v2 = vmul.f32 %v3976_v7, %v1673_v39  ;;  %v6340_v15 = vrot.slane %v4424_v16, 1  ;;  %v4442_v30 = vld [vmem:[%s3801_s20 + $0xd0] sm:$0x3] }
  0xd6   : > { %v1256_v1 = vsel %vm896_vm4, %v1254_v32, %v6337_v42  ;;  %v1601_v43 = vrot.slane %v1537_v41, 2  ;;  %v6339_v11 = vrot.slane %v4433_v31, 2  ;;  %v654_v28 = vmul.f32 %v3794_v34, %v3951_v36 }
  0xd7   : > { %v1166_v55 = vadd.f32 %v1104_v10, %v1014_v60  ;;  %v703_v14 = vmul.f32 %v3799_v35, %v3962_v59  ;;  %v1719_v39 = vadd.f32 %v4012_v5, %v1696_v2  ;;  %v1451_v32 = vsel %vm743_vm3, %v1449_v24, %v6340_v15 }
  0xd8   : > { %v856_v41 = vmul.f32 %v3822_v44, %v3962_v59  ;;  %v1003_v60 = vmul.f32 %v3831_v48, %v4100_v50  ;;  %v1603_v36 = vsel %vm896_vm4, %v1601_v43, %v6339_v11  ;;  %v1052_v26 = vmul.f32 %v3840_v51, %v4213_v23 }
  0xd9   : > { %v1318_v10 = vadd.f32 %v1256_v1, %v1166_v55  ;;  %v777_v42 = vrot.slane %v703_v14, 1  ;;  %3305 = vmatmul.msk.f32.gmra.mxu2 %vm1728_vm5, %v1719_v39  ;;  %v1204_v24 = vmul.f32 %v3845_v52, %v4213_v23  ;;  %v1350_v59 = vmul.f32 %v3858_v56, %v4336_v53 }
  0xda   : > { %v930_v2 = vrot.slane %v856_v41, 2  ;;  %v1399_v55 = vmul.f32 %v3874_v63, %v4442_v30  ;;  %v1125_v14 = vrot.slane %v1052_v26, 1  ;;  %v1551_v11 = vmul.f32 %v3891_v4, %v4442_v30 }
  0xdb   : > { %v1361_v1 = vadd.f32 %v1341_v62, %v1318_v10  ;;  %v778_v43 = vsel %vm743_vm3, %v775_v37, %v777_v42  ;;  %v1277_v15 = vrot.slane %v1204_v24, 2  ;;  %v646_v25 = vmul.f32 %v3794_v34, %v3825_v45 }
  0xdc   : > { %v827_v39 = vadd.f32 %v778_v43, %v654_v28  ;;  %v931_v41 = vsel %vm896_vm4, %v928_v0, %v930_v2  ;;  %v1472_v49 = vrot.slane %v1399_v55, 1  ;;  %v1126_v62 = vsel %vm743_vm3, %v1123_v17, %v1125_v14 }
  0xdd   : > { %v1513_v29 = vadd.f32 %v1451_v32, %v1361_v1  ;;  %v1624_v10 = vrot.slane %v1551_v11, 2  ;;  %v1278_v26 = vsel %vm896_vm4, %v1275_v20, %v1277_v15  ;;  %v6390_v33 = vrot.slane %v4357_v9, 1 }
  0xde   : > { %v980_v37 = vadd.f32 %v931_v41, %v827_v39  ;;  %v691_v42 = vmul.f32 %v3799_v35, %v4023_v21  ;;  %v6391_v58 = vrot.slane %v4365_v61, 2  ;;  %v844_v45 = vmul.f32 %v3822_v44, %v4023_v21 }
  0xdf   : > { %v1473_v0 = vsel %vm743_vm3, %v6390_v33, %v1472_v49  ;;  %v1665_v28 = vadd.f32 %v1603_v36, %v1513_v29  ;;  %v995_v38 = vmul.f32 %v3831_v48, %v4173_v54  ;;  %v1040_v9 = vmul.f32 %v3840_v51, %v4257_v40 }
  0xe0   : > { %v1625_v17 = vsel %vm896_vm4, %v6391_v58, %v1624_v10  ;;  %v1023_v11 = vadd.f32 %v1003_v60, %v980_v37  ;;  %v757_v20 = vrot.slane %v691_v42, 1  ;;  %v1192_v49 = vmul.f32 %v3845_v52, %v4257_v40 }
  0xe1   : > { %v1688_v29 = vmul.f32 %v3976_v7, %v1665_v28  ;;  %v910_v15 = vrot.slane %v844_v45, 2  ;;  %v1342_v61 = vmul.f32 %v3858_v56, %v3905_v13  ;;  %v1387_v21 = vmul.f32 %v3874_v63, %v3915_v18 }
  0xe2   : > { %v1175_v32 = vadd.f32 %v1126_v62, %v1023_v11  ;;  %v6392_v36 = vrot.slane %v4373_v12, 1  ;;  %v1105_v2 = vrot.slane %v1040_v9, 1  ;;  %v1257_v24 = vrot.slane %v1192_v49, 2 }
  0xe3   : > { %v1711_v55 = vadd.f32 %v4012_v5, %v1688_v29  ;;  %v6393_v43 = vrot.slane %v4385_v19, 2  ;;  %v1452_v39 = vrot.slane %v1387_v21, 1  ;;  %v6394_v10 = vrot.slane %v4404_v27, 1 }
  0xe4   : > { %v758_v60 = vsel %vm743_vm3, %v6392_v36, %v757_v20  ;;  %v1327_v41 = vadd.f32 %v1278_v26, %v1175_v32  ;;  %v6395_v62 = vrot.slane %v4414_v57, 2  ;;  %v1539_v33 = vmul.f32 %v3891_v4, %v3915_v18  ;;  %v4564_v36 = vld [vmem:[%s3801_s20 + $0xe0] sm:$0xff] }
  0xe5   : > { %v819_v1 = vadd.f32 %v758_v60, %v646_v25  ;;  %v911_v14 = vsel %vm896_vm4, %v6393_v43, %v910_v15  ;;  %v1106_v37 = vsel %vm743_vm3, %v6394_v10, %v1105_v2  ;;  %3297 = vmatmul.msk.f32.gmra.mxu0 %vm1728_vm5, %v1711_v55  ;;  %v6396_v19 = vrot.slane %v4424_v16, 1 }
  0xe6   : > { %v1258_v12 = vsel %vm896_vm4, %v6395_v62, %v1257_v24  ;;  %v655_v26 = vmul.f32 %v3794_v34, %v4087_v3  ;;  %v704_v27 = vmul.f32 %v3799_v35, %v4087_v3  ;;  %v1370_v28 = vadd.f32 %v1350_v59, %v1327_v41 }
  0xe7   : > { %v972_v25 = vadd.f32 %v911_v14, %v819_v1  ;;  %v1453_v42 = vsel %vm743_vm3, %v6396_v19, %v1452_v39  ;;  %v1604_v57 = vrot.slane %v1539_v33, 2  ;;  %v4530_v58 = vmul.f32 %v3799_v35, %v4100_v50 }
  0xe8   : > { %v857_v18 = vmul.f32 %v3822_v44, %v4087_v3  ;;  %v779_v16 = vrot.slane %v704_v27, 1  ;;  %v4536_v11 = vmul.f32 %v3822_v44, %v4100_v50  ;;  %v1004_v34 = vmul.f32 %v3831_v48, %v4324_v8  ;;  %v4552_v48 = vld [vmem:[%s3801_s20 + $0xd8] sm:$0xff] }
  0xe9   : > { %v1015_v45 = vadd.f32 %v995_v38, %v972_v25  ;;  %v1522_v59 = vadd.f32 %v1473_v0, %v1370_v28  ;;  %v6397_v20 = vrot.slane %v4433_v31, 2  ;;  %v780_v35 = vrot.slane %v4530_v58, 1 }
  0xea   : > { %v932_v49 = vrot.slane %v857_v18, 2  ;;  %v933_v3 = vrot.slane %v4536_v11, 2  ;;  %v1053_v38 = vmul.f32 %v3840_v51, %v4324_v8  ;;  %v4549_v44 = vmul.f32 %v3840_v51, %v4336_v53 }
  0xeb   : > { %v1605_v9 = vsel %vm896_vm4, %v6397_v20, %v1604_v57  ;;  %v1167_v29 = vadd.f32 %v1106_v37, %v1015_v45  ;;  %v1674_v15 = vadd.f32 %v1625_v17, %v1522_v59  ;;  %v781_v31 = vsel %vm743_vm3, %v779_v16, %v780_v35  ;;  %v4620_v59 = vld [vmem:[%s6294_s1 + $0x2] ss:$0 sm:$0xff] }
  0xec   : > { %v1205_v0 = vmul.f32 %v3845_v52, %v4324_v8  ;;  %v4561_v21 = vmul.f32 %v3845_v52, %v4336_v53  ;;  %v828_v60 = vadd.f32 %v781_v31, %v655_v26  ;;  %v934_v51 = vsel %vm896_vm4, %v932_v49, %v933_v3  ;;  %v4598_v26 = vld [vmem:[%s6294_s1] ss:$0 sm:$0xff] }
  0xed   : > { %v1319_v32 = vadd.f32 %v1258_v12, %v1167_v29  ;;  %v1127_v17 = vrot.slane %v1053_v38, 1  ;;  %v1697_v2 = vmul.f32 %v3976_v7, %v1674_v15  ;;  %v1128_v24 = vrot.slane %v4549_v44, 1 }
  0xee   : > { %v1279_v55 = vrot.slane %v1205_v0, 2  ;;  %v1280_v1 = vrot.slane %v4561_v21, 2  ;;  %v981_v14 = vadd.f32 %v934_v51, %v828_v60  ;;  %v1351_v52 = vmul.f32 %v3858_v56, %v4552_v48  ;;  %v4636_v0 = vld [vmem:[%s6294_s1 + $0x4] ss:$0 sm:$0xff]  ;;  %v3421_v21 = vld [vmem:[%s3801_s20 + $0x68] sm:$0xff] }
  0xef   : > { %v1362_v43 = vadd.f32 %v1342_v61, %v1319_v32  ;;  %v1400_v39 = vmul.f32 %v3874_v63, %v4552_v48  ;;  %v1720_v41 = vadd.f32 %v4012_v5, %v1697_v2  ;;  %v1129_v10 = vsel %vm743_vm3, %v1127_v17, %v1128_v24  ;;  %v4643_v32 = vld [vmem:[%s6294_s1 + $0x5] ss:$0 sm:$0xff] }
  0xf0   : > { %v1281_v37 = vsel %vm896_vm4, %v1279_v55, %v1280_v1  ;;  %v4585_v61 = vmul.f32 %v3874_v63, %v4564_v36  ;;  %v1024_v12 = vadd.f32 %v1004_v34, %v981_v14  ;;  %v1552_v33 = vmul.f32 %v3891_v4, %v4552_v48 }
  0xf1   : > { %v1514_v62 = vadd.f32 %v1453_v42, %v1362_v43  ;;  %v1474_v56 = vrot.slane %v1400_v39, 1  ;;  %3306 = vmatmul.msk.f32.gmra.mxu2 %vm1728_vm5, %v1720_v41  ;;  %v4593_v19 = vmul.f32 %v3891_v4, %v4564_v36  ;;  %v647_v63 = vmul.f32 %v4598_v26, %v4161_v47  ;;  %v4605_v42 = vld [vmem:[%s6294_s1 + $0x1] ss:$0 sm:$0xff]  ;;  %v4659_v41 = vld [vmem:[%s6294_s1 + $0x6] ss:$0 sm:$0xff] }
  0xf2   : > { %v1475_v25 = vrot.slane %v4585_v61, 1  ;;  %v692_v27 = vmul.f32 %v4605_v42, %v4161_v47  ;;  %v1176_v57 = vadd.f32 %v1129_v10, %v1024_v12  ;;  %v1626_v4 = vrot.slane %v1552_v33, 2  ;;  %v4674_v12 = vld [vmem:[%s6294_s1 + $0x8] ss:$0 sm:$0xff]  ;;  %v3422_v61 = vld [vmem:[%s3801_s20 + $0x70] sm:$0x3] }
  0xf3   : > { %v1666_v28 = vadd.f32 %v1605_v9, %v1514_v62  ;;  %v4611_v18 = vmul.f32 %v4605_v42, %v4173_v54  ;;  %v1627_v16 = vrot.slane %v4593_v19, 2  ;;  %v845_v20 = vmul.f32 %v4620_v59, %v4161_v47 }
  0xf4   : > { %v1476_v45 = vsel %vm743_vm3, %v1474_v56, %v1475_v25  ;;  %v759_v34 = vrot.slane %v692_v27, 1  ;;  %v1328_v49 = vadd.f32 %v1281_v37, %v1176_v57  ;;  %v4628_v38 = vmul.f32 %v4620_v59, %v4173_v54 }
  0xf5   : > { %v1689_v9 = vmul.f32 %v3976_v7, %v1666_v28  ;;  %v760_v29 = vrot.slane %v4611_v18, 1  ;;  %v1628_v15 = vsel %vm896_vm4, %v1626_v4, %v1627_v16  ;;  %v912_v31 = vrot.slane %v845_v20, 2  ;;  %v4682_v28 = vld [vmem:[%s6294_s1 + $0x9] ss:$0 sm:$0xff] }
  0xf6   : > { %v996_v47 = vmul.f32 %v4636_v0, %v4391_v46  ;;  %v1041_v60 = vmul.f32 %v4643_v32, %v4391_v46  ;;  %v1371_v17 = vadd.f32 %v1351_v52, %v1328_v49  ;;  %v913_v55 = vrot.slane %v4628_v38, 2 }
  0xf7   : > { %v1712_v51 = vadd.f32 %v4012_v5, %v1689_v9  ;;  %v761_v2 = vsel %vm743_vm3, %v759_v34, %v760_v29  ;;  %v4654_v14 = vmul.f32 %v4643_v32, %v3905_v13  ;;  %v1193_v52 = vmul.f32 %v4659_v41, %v4391_v46  ;;  %v4694_v34 = vld [vmem:[%s6294_s1 + $0xa] ss:$0 sm:$0xff] }
  0xf8   : > { %v820_v43 = vadd.f32 %v761_v2, %v647_v63  ;;  %v1107_v39 = vrot.slane %v1041_v60, 1  ;;  %v1523_v10 = vadd.f32 %v1476_v45, %v1371_v17  ;;  %v914_v37 = vsel %vm896_vm4, %v912_v31, %v913_v55 }
  0xf9   : > { %3298 = vmatmul.msk.f32.gmra.mxu0 %vm1728_vm5, %v1712_v51  ;;  %v4669_v62 = vmul.f32 %v4659_v41, %v3905_v13  ;;  %v1343_v56 = vmul.f32 %v4674_v12, %v4036_v6  ;;  %v1108_v63 = vrot.slane %v4654_v14, 1  ;;  %v1259_v27 = vrot.slane %v1193_v52, 2 }
  0xfa   : > { %v973_v33 = vadd.f32 %v914_v37, %v820_v43  ;;  %v1388_v13 = vmul.f32 %v4682_v28, %v4036_v6  ;;  %v1675_v57 = vadd.f32 %v1628_v15, %v1523_v10  ;;  %v4689_v45 = vmul.f32 %v4682_v28, %v3924_v22  ;;  %v4712_v43 = vld [vmem:[%s3801_s20 + $0xe8] sm:$0x3] }
  0xfb   : > { %v1260_v4 = vrot.slane %v4669_v62, 2  ;;  %v1540_v20 = vmul.f32 %v4694_v34, %v4036_v6  ;;  %v1109_v49 = vsel %vm743_vm3, %v1107_v39, %v1108_v63  ;;  %v4703_v31 = vmul.f32 %v4694_v34, %v3924_v22 }
  0xfc   : > { %v1016_v9 = vadd.f32 %v996_v47, %v973_v33  ;;  %v1454_v15 = vrot.slane %v1388_v13, 1  ;;  %v1698_v60 = vmul.f32 %v3976_v7, %v1675_v57  ;;  %v1455_v17 = vrot.slane %v4689_v45, 1 }
  0xfd   : > { %v1261_v51 = vsel %vm896_vm4, %v1259_v27, %v1260_v4  ;;  %v1606_v2 = vrot.slane %v1540_v20, 2  ;;  %v6343_v47 = vrot.slane %v4703_v31, 2  ;;  %v656_v39 = vmul.f32 %v4598_v26, %v4100_v50 }
  0xfe   : > { %v1168_v6 = vadd.f32 %v1109_v49, %v1016_v9  ;;  %v706_v22 = vmul.f32 %v4605_v42, %v4213_v23  ;;  %v1721_v52 = vadd.f32 %v4012_v5, %v1698_v60  ;;  %v1456_v10 = vsel %vm743_vm3, %v1454_v15, %v1455_v17 }
  0xff   : > { %v859_v37 = vmul.f32 %v4620_v59, %v4213_v23  ;;  %v1005_v33 = vmul.f32 %v4636_v0, %v4336_v53  ;;  %v1608_v50 = vsel %vm896_vm4, %v1606_v2, %v6343_v47  ;;  %v1055_v57 = vmul.f32 %v4643_v32, %v4442_v30 }
 0x100   : > { %v1320_v27 = vadd.f32 %v1261_v51, %v1168_v6  ;;  %v782_v13 = vrot.slane %v706_v22, 1  ;;  %3307 = vmatmul.msk.f32.gmra.mxu2 %vm1728_vm5, %v1721_v52  ;;  %v1207_v9 = vmul.f32 %v4659_v41, %v4442_v30  ;;  %v1352_v23 = vmul.f32 %v4674_v12, %v4564_v36 }
 0x101   : > { %v935_v20 = vrot.slane %v859_v37, 2  ;;  %v1402_v49 = vmul.f32 %v4682_v28, %v4712_v43  ;;  %v1130_v51 = vrot.slane %v1055_v57, 1  ;;  %v1554_v2 = vmul.f32 %v4694_v34, %v4712_v43 }
 0x102   : > { %v1363_v15 = vadd.f32 %v1343_v56, %v1320_v27  ;;  %v783_v60 = vsel %vm743_vm3, %v780_v35, %v782_v13  ;;  %v1282_v52 = vrot.slane %v1207_v9, 2  ;;  %v648_v35 = vmul.f32 %v4598_v26, %v4173_v54 }
 0x103   : > { %v829_v6 = vadd.f32 %v783_v60, %v656_v39  ;;  %v936_v22 = vsel %vm896_vm4, %v933_v3, %v935_v20  ;;  %v1477_v37 = vrot.slane %v1402_v49, 1  ;;  %v1131_v58 = vsel %vm743_vm3, %v1128_v24, %v1130_v51 }
 0x104   : > { %v1515_v47 = vadd.f32 %v1456_v10, %v1363_v15  ;;  %v1629_v56 = vrot.slane %v1554_v2, 2  ;;  %v1283_v11 = vsel %vm896_vm4, %v1280_v1, %v1282_v52  ;;  %v694_v44 = vmul.f32 %v4605_v42, %v4257_v40 }
 0x105   : > { %v982_v27 = vadd.f32 %v936_v22, %v829_v6  ;;  %v1478_v3 = vsel %vm743_vm3, %v1475_v25, %v1477_v37  ;;  %v847_v54 = vmul.f32 %v4620_v59, %v4257_v40  ;;  %v997_v10 = vmul.f32 %v3421_v21, %v4636_v0 }
 0x106   : > { %v1667_v39 = vadd.f32 %v1608_v50, %v1515_v47  ;;  %v1630_v24 = vsel %vm896_vm4, %v1627_v16, %v1629_v56  ;;  %v762_v13 = vrot.slane %v694_v44, 1  ;;  %v1043_v25 = vmul.f32 %v3422_v61, %v4643_v32  ;;  %v3423_v50 = vld [vmem:[%s3801_s20 + $0x80] sm:$0xff]  ;;  %v3424_v16 = vld [vmem:[%s3801_s20 + $0x88] sm:$0x3] }
 0x107   : > { %v1025_v1 = vadd.f32 %v1005_v33, %v982_v27  ;;  %v1195_v57 = vmul.f32 %v3422_v61, %v4659_v41  ;;  %v915_v47 = vrot.slane %v847_v54, 2  ;;  %v1344_v19 = vmul.f32 %v3423_v50, %v4674_v12  ;;  %v4832_v61 = vld [vmem:[%s3801_s20 + $0xf8] sm:$0xff] }
 0x108   : > { %v1690_v20 = vmul.f32 %v3976_v7, %v1667_v39  ;;  %v1390_v9 = vmul.f32 %v3424_v16, %v4682_v28  ;;  %v763_v33 = vsel %vm743_vm3, %v760_v29, %v762_v13  ;;  %v1110_v49 = vrot.slane %v1043_v25, 1 }
 0x109   : > { %v1177_v40 = vadd.f32 %v1131_v58, %v1025_v1  ;;  %v1262_v15 = vrot.slane %v1195_v57, 2  ;;  %v821_v51 = vadd.f32 %v763_v33, %v648_v35  ;;  %v916_v7 = vsel %vm896_vm4, %v913_v55, %v915_v47 }
 0x10a   : > { %v1713_v60 = vadd.f32 %v4012_v5, %v1690_v20  ;;  %v1457_v2 = vrot.slane %v1390_v9, 1  ;;  %v1111_v22 = vsel %vm743_vm3, %v1108_v63, %v1110_v49  ;;  %v1542_v29 = vmul.f32 %v3424_v16, %v4694_v34  ;;  %v4840_v20 = vld [vmem:[%s6295_s2] ss:$0 sm:$0xff] }
 0x10b   : > { %v1329_v6 = vadd.f32 %v1283_v11, %v1177_v40  ;;  %v1263_v18 = vsel %vm896_vm4, %v1260_v4, %v1262_v15  ;;  %v974_v5 = vadd.f32 %v916_v7, %v821_v51  ;;  %v657_v55 = vmul.f32 %v4598_v26, %v4324_v8 }
 0x10c   : > { %3299 = vmatmul.msk.f32.gmra.mxu0 %vm1728_vm5, %v1713_v60  ;;  %v1458_v38 = vsel %vm743_vm3, %v1455_v17, %v1457_v2  ;;  %v707_v14 = vmul.f32 %v4605_v42, %v4324_v8  ;;  %v1609_v52 = vrot.slane %v1542_v29, 2  ;;  %v4798_v62 = vmul.f32 %v4605_v42, %v4336_v53  ;;  %v4852_v60 = vld [vmem:[%s6296_s3] ss:$0 sm:$0xff] }
 0x10d   : > { %v1372_v63 = vadd.f32 %v1352_v23, %v1329_v6  ;;  %v860_v4 = vmul.f32 %v4620_v59, %v4324_v8  ;;  %v1017_v37 = vadd.f32 %v997_v10, %v974_v5  ;;  %v4804_v17 = vmul.f32 %v4620_v59, %v4336_v53  ;;  %v4820_v10 = vld [vmem:[%s3801_s20 + $0xf0] sm:$0xff] }
 0x10e   : > { %v784_v45 = vrot.slane %v707_v14, 1  ;;  %v1006_v58 = vmul.f32 %v4636_v0, %v4552_v48  ;;  %v6398_v56 = vrot.slane %v4703_v31, 2  ;;  %v785_v27 = vrot.slane %v4798_v62, 1 }
 0x10f   : > { %v1524_v23 = vadd.f32 %v1478_v3, %v1372_v63  ;;  %v937_v11 = vrot.slane %v860_v4, 2  ;;  %v1169_v44 = vadd.f32 %v1111_v22, %v1017_v37  ;;  %v938_v8 = vrot.slane %v4804_v17, 2 }
 0x110   : > { %v1610_v35 = vsel %vm896_vm4, %v6398_v56, %v1609_v52  ;;  %v1056_v39 = vmul.f32 %v4643_v32, %v4552_v48  ;;  %v4817_v54 = vmul.f32 %v4643_v32, %v4564_v36  ;;  %v786_v31 = vsel %vm743_vm3, %v784_v45, %v785_v27 }
 0x111   : > { %v1676_v21 = vadd.f32 %v1630_v24, %v1524_v23  ;;  %v1208_v3 = vmul.f32 %v4659_v41, %v4552_v48  ;;  %v4829_v1 = vmul.f32 %v4659_v41, %v4564_v36  ;;  %v1321_v13 = vadd.f32 %v1263_v18, %v1169_v44 }
 0x112   : > { %v830_v25 = vadd.f32 %v786_v31, %v657_v55  ;;  %v939_v24 = vsel %vm896_vm4, %v937_v11, %v938_v8  ;;  %v1132_v57 = vrot.slane %v1056_v39, 1  ;;  %v1133_v50 = vrot.slane %v4817_v54, 1  ;;  %v3427_v39 = vld [vmem:[%s3801_s20 + $0x78] sm:$0xff] }
 0x113   : > { %v1699_v47 = vmul.f32 %v4840_v20, %v1676_v21  ;;  %v1284_v16 = vrot.slane %v1208_v3, 2  ;;  %v1285_v9 = vrot.slane %v4829_v1, 2  ;;  %v1364_v40 = vadd.f32 %v1344_v19, %v1321_v13 }
 0x114   : > { %v983_v33 = vadd.f32 %v939_v24, %v830_v25  ;;  %v1353_v49 = vmul.f32 %v4674_v12, %v4820_v10  ;;  %v1403_v15 = vmul.f32 %v4682_v28, %v4820_v10  ;;  %v1134_v7 = vsel %vm743_vm3, %v1132_v57, %v1133_v50 }
 0x115   : > { %v1722_v51 = vadd.f32 %v4852_v60, %v1699_v47  ;;  %v1286_v19 = vsel %vm896_vm4, %v1284_v16, %v1285_v9  ;;  %v4863_v2 = vmul.f32 %v4682_v28, %v4832_v61  ;;  %v1516_v6 = vadd.f32 %v1458_v38, %v1364_v40  ;;  %v6401_v16 = vld [vmem:[#allocation9_spill] sm:$0xff] }
 0x116   : > { %v1026_v22 = vadd.f32 %v1006_v58, %v983_v33  ;;  %v1479_v18 = vrot.slane %v1403_v15, 1  ;;  %v1555_v29 = vmul.f32 %v4694_v34, %v4820_v10  ;;  %v4871_v55 = vmul.f32 %v4694_v34, %v4832_v61 }
 0x117   : > { %3308 = vmatmul.msk.f32.gmra.mxu2 %vm1728_vm5, %v1722_v51  ;;  %v1480_v5 = vrot.slane %v4863_v2, 1  ;;  %v649_v14 = vmul.f32 %v4598_v26, %v4391_v46  ;;  %v695_v38 = vmul.f32 %v4605_v42, %v4391_v46  ;;  %v1668_v63 = vadd.f32 %v1610_v35, %v1516_v6 }
 0x118   : > { %v1178_v52 = vadd.f32 %v1134_v7, %v1026_v22  ;;  %v1631_v4 = vrot.slane %v1555_v29, 2  ;;  %v848_v37 = vmul.f32 %v4620_v59, %v4391_v46  ;;  %v1632_v58 = vrot.slane %v4871_v55, 2  ;;  %v6399_v46 = vld [vmem:[#allocation8_spill] sm:$0xff] }
 0x119   : > { %v1481_v45 = vsel %vm743_vm3, %v1479_v18, %v1480_v5  ;;  %v764_v23 = vrot.slane %v695_v38, 1  ;;  %v1691_v56 = vmul.f32 %v4840_v20, %v1668_v63  ;;  %v1044_v35 = vmul.f32 %v3427_v39, %v4643_v32  ;;  %v3428_v7 = vld [vmem:[%s3801_s20 + $0x90] sm:$0xff] }
 0x11a   : > { %v1330_v11 = vadd.f32 %v1286_v19, %v1178_v52  ;;  %v917_v44 = vrot.slane %v848_v37, 2  ;;  %v1633_v21 = vsel %vm896_vm4, %v1631_v4, %v1632_v58  ;;  %v6400_v31 = vrot.slane %v6399_v46, 1  ;;  %v6407_v46 = vld [vmem:[#allocation12_spill] sm:$0xff] }
 0x11b   : > { %v998_v13 = vmul.f32 %v3427_v39, %v4636_v0  ;;  %v1196_v25 = vmul.f32 %v3427_v39, %v4659_v41  ;;  %v1714_v24 = vadd.f32 %v4852_v60, %v1691_v56  ;;  %v6402_v40 = vrot.slane %v6401_v16, 2 }
 0x11c   : > { %v766_v3 = vsel %vm743_vm3, %v764_v23, %v6400_v31  ;;  %v1373_v57 = vadd.f32 %v1353_v49, %v1330_v11  ;;  %v1112_v15 = vrot.slane %v1044_v35, 1  ;;  %v1391_v19 = vmul.f32 %v3428_v7, %v4682_v28 }
 0x11d   : > { %v822_v47 = vadd.f32 %v766_v3, %v649_v14  ;;  %v919_v33 = vsel %vm896_vm4, %v917_v44, %v6402_v40  ;;  %v1264_v51 = vrot.slane %v1196_v25, 2  ;;  %v1543_v6 = vmul.f32 %v3428_v7, %v4694_v34  ;;  %3300 = vmatmul.msk.f32.gmra.mxu0 %vm1728_vm5, %v1714_v24  ;;  %v6403_v14 = vld [vmem:[#allocation10_spill] sm:$0xff]  ;;  %v6405_v44 = vld [vmem:[#allocation11_spill] sm:$0xff]  ;;  %v6409_v25 = vld [vmem:[#allocation13_spill] sm:$0xff] }
 0x11e   : > { %v1525_v22 = vadd.f32 %v1481_v45, %v1373_v57  ;;  %v1345_v29 = vmul.f32 %v3428_v7, %v4674_v12  ;;  %v709_v49 = vmul.f32 %v4605_v42, %v4442_v30  ;;  %v6404_v38 = vrot.slane %v6403_v14, 1 }
 0x11f   : > { %v975_v18 = vadd.f32 %v919_v33, %v822_v47  ;;  %v1459_v52 = vrot.slane %v1391_v19, 1  ;;  %v1611_v4 = vrot.slane %v1543_v6, 2  ;;  %v658_v37 = vmul.f32 %v4598_v26, %v4336_v53  ;;  %v4922_v47 = vld [vmem:[%s3801_s20 + $0x100] sm:$0x3] }
 0x120   : > { %v1114_v63 = vsel %vm743_vm3, %v1112_v15, %v6404_v38  ;;  %v1677_v23 = vadd.f32 %v1633_v21, %v1525_v22  ;;  %v787_v11 = vrot.slane %v709_v49, 1  ;;  %v862_v45 = vmul.f32 %v4620_v59, %v4442_v30 }
 0x121   : > { %v1018_v56 = vadd.f32 %v998_v13, %v975_v18  ;;  %v6406_v39 = vrot.slane %v6405_v44, 2  ;;  %v6408_v31 = vrot.slane %v6407_v46, 1  ;;  %v6410_v24 = vrot.slane %v6409_v25, 2 }
 0x122   : > { %v1058_v53 = vmul.f32 %v4643_v32, %v4712_v43  ;;  %v1700_v21 = vmul.f32 %v4840_v20, %v1677_v23  ;;  %v788_v13 = vsel %vm743_vm3, %v785_v27, %v787_v11  ;;  %v940_v16 = vrot.slane %v862_v45, 2 }
 0x123   : > { %v1266_v35 = vsel %vm896_vm4, %v1264_v51, %v6406_v39  ;;  %v1461_v3 = vsel %vm743_vm3, %v1459_v52, %v6408_v31  ;;  %v1613_v57 = vsel %vm896_vm4, %v1611_v4, %v6410_v24  ;;  %v1170_v30 = vadd.f32 %v1114_v63, %v1018_v56 }
 0x124   : > { %v831_v40 = vadd.f32 %v788_v13, %v658_v37  ;;  %v1007_v33 = vmul.f32 %v4636_v0, %v4564_v36  ;;  %v1135_v15 = vrot.slane %v1058_v53, 1  ;;  %v1210_v51 = vmul.f32 %v4659_v41, %v4712_v43 }
 0x125   : > { %v1723_v7 = vadd.f32 %v4852_v60, %v1700_v21  ;;  %v1322_v19 = vadd.f32 %v1266_v35, %v1170_v30  ;;  %v941_v6 = vsel %vm896_vm4, %v938_v8, %v940_v16  ;;  %v1405_v62 = vmul.f32 %v4682_v28, %v4922_v47  ;;  %v4981_v21 = vld [vmem:[%s3801_s20 + $0x110] sm:$0xff] }
 0x126   : > { %v984_v27 = vadd.f32 %v941_v6, %v831_v40  ;;  %v1287_v22 = vrot.slane %v1210_v51, 2  ;;  %v1354_v18 = vmul.f32 %v4674_v12, %v4832_v61  ;;  %v1557_v49 = vmul.f32 %v4694_v34, %v4922_v47 }
 0x127   : > { %3309 = vmatmul.msk.f32.gmra.mxu2 %vm1728_vm5, %v1723_v7  ;;  %v1365_v14 = vadd.f32 %v1345_v29, %v1322_v19  ;;  %v1136_v17 = vsel %vm743_vm3, %v1133_v50, %v1135_v15  ;;  %v1482_v38 = vrot.slane %v1405_v62, 1  ;;  %v710_v8 = vmul.f32 %v4605_v42, %v4552_v48 }
 0x128   : > { %v1027_v63 = vadd.f32 %v1007_v33, %v984_v27  ;;  %v1288_v52 = vsel %vm896_vm4, %v1285_v9, %v1287_v22  ;;  %v659_v4 = vmul.f32 %v4598_v26, %v4552_v48  ;;  %v4957_v37 = vmul.f32 %v4605_v42, %v4564_v36 }
 0x129   : > { %v1517_v29 = vadd.f32 %v1461_v3, %v1365_v14  ;;  %v1634_v54 = vrot.slane %v1557_v49, 2  ;;  %v789_v50 = vrot.slane %v710_v8, 1  ;;  %v863_v23 = vmul.f32 %v4620_v59, %v4552_v48  ;;  %v634_v3 = vld [vmem:[%s3801_s20 + $0x108] sm:$0xff] }
 0x12a   : > { %v1179_v56 = vadd.f32 %v1136_v17, %v1027_v63  ;;  %v1483_v1 = vsel %vm743_vm3, %v1480_v5, %v1482_v38  ;;  %v790_v9 = vrot.slane %v4957_v37, 1  ;;  %v864_v11 = vmul.f32 %v4620_v59, %v4564_v36 }
 0x12b   : > { %v1669_v45 = vadd.f32 %v1613_v57, %v1517_v29  ;;  %v942_v44 = vrot.slane %v863_v23, 2  ;;  %v1008_v39 = vmul.f32 %v4636_v0, %v4820_v10  ;;  %v1059_v35 = vmul.f32 %v4643_v32, %v4820_v10  ;;  %v1810_v29 = vpop.f32.mrf.mxu0 }
 0x12c   : > { %v1331_v48 = vadd.f32 %v1288_v52, %v1179_v56  ;;  %v791_v46 = vsel %vm743_vm3, %v789_v50, %v790_v9  ;;  %v943_v2 = vrot.slane %v864_v11, 2  ;;  %v4974_v5 = vmul.f32 %v4643_v32, %v4832_v61 }
 0x12d   : > { %v1692_v31 = vmul.f32 %v4840_v20, %v1669_v45  ;;  %v832_v25 = vadd.f32 %v791_v46, %v659_v4  ;;  %v1137_v24 = vrot.slane %v1059_v35, 1  ;;  %v1211_v57 = vmul.f32 %v4659_v41, %v4820_v10 }
 0x12e   : > { %v1374_v53 = vadd.f32 %v1354_v18, %v1331_v48  ;;  %v944_v30 = vsel %vm896_vm4, %v942_v44, %v943_v2  ;;  %v1138_v13 = vrot.slane %v4974_v5, 1  ;;  %v4987_v16 = vmul.f32 %v4659_v41, %v4832_v61  ;;  %v636_v44 = vld [vmem:[%s3801_s20 + $0x118] sm:$0x3] }
 0x12f   : > { %v1715_v40 = vadd.f32 %v4852_v60, %v1692_v31  ;;  %v1635_v33 = vsel %vm896_vm4, %v1632_v58, %v1634_v54  ;;  %v985_v15 = vadd.f32 %v944_v30, %v832_v25  ;;  %v1289_v51 = vrot.slane %v1211_v57, 2 }
 0x130   : > { %v1526_v10 = vadd.f32 %v1483_v1, %v1374_v53  ;;  %v1139_v7 = vsel %vm743_vm3, %v1137_v24, %v1138_v13  ;;  %v1290_v19 = vrot.slane %v4987_v16, 2  ;;  %v1406_v6 = vmul.f32 %v4682_v28, %v634_v3  ;;  %v1837_v53 = vpop.f32.mrf.mxu2 }
 0x131   : > { %3301 = vmatmul.msk.f32.gmra.mxu0 %vm1728_vm5, %v1715_v40  ;;  %v1028_v62 = vadd.f32 %v1008_v39, %v985_v15  ;;  %v4999_v27 = vmul.f32 %v4682_v28, %v4981_v21  ;;  %v1558_v55 = vmul.f32 %v4694_v34, %v634_v3  ;;  %v5004_v58 = vmul.f32 %v4694_v34, %v4981_v21 }
 0x132   : > { %v1678_v22 = vadd.f32 %v1635_v33, %v1526_v10  ;;  %v1291_v18 = vsel %vm896_vm4, %v1289_v51, %v1290_v19  ;;  %v1484_v49 = vrot.slane %v1406_v6, 1  ;;  %v1355_v17 = vmul.f32 %v4674_v12, %v634_v3 }
 0x133   : > { %v1180_v14 = vadd.f32 %v1139_v7, %v1028_v62  ;;  %v1485_v38 = vrot.slane %v4999_v27, 1  ;;  %v1636_v8 = vrot.slane %v1558_v55, 2  ;;  %v1637_v52 = vrot.slane %v5004_v58, 2 }
 0x134   : > { %v1701_v63 = vmul.f32 %v4840_v20, %v1678_v22  ;;  %v712_v4 = vmul.f32 %v4605_v42, %v4712_v43  ;;  %v865_v37 = vmul.f32 %v4620_v59, %v4712_v43  ;;  %v660_v23 = vmul.f32 %v4598_v26, %v4564_v36  ;;  %v5026_v59 = vld [vmem:[%s6298_s5] ss:$0 sm:$0xff] }
 0x135   : > { %v1332_v54 = vadd.f32 %v1291_v18, %v1180_v14  ;;  %v1486_v50 = vsel %vm743_vm3, %v1484_v49, %v1485_v38  ;;  %v1061_v56 = vmul.f32 %v4643_v32, %v4922_v47  ;;  %v1213_v42 = vmul.f32 %v4659_v41, %v4922_v47  ;;  %v5036_v41 = vld [vmem:[%s6299_s6] ss:$0 sm:$0xff] }
 0x136   : > { %v1724_v1 = vadd.f32 %v4852_v60, %v1701_v63  ;;  %v792_v11 = vrot.slane %v712_v4, 1  ;;  %v945_v45 = vrot.slane %v865_v37, 2  ;;  %v1638_v36 = vsel %vm896_vm4, %v1636_v8, %v1637_v52 }
 0x137   : > { %v1375_v43 = vadd.f32 %v1355_v17, %v1332_v54  ;;  %v1140_v39 = vrot.slane %v1061_v56, 1  ;;  %v1009_v48 = vmul.f32 %v4636_v0, %v4832_v61  ;;  %v1292_v46 = vrot.slane %v1213_v42, 2 }
 0x138   : > { %3310 = vmatmul.msk.f32.gmra.mxu2 %vm1728_vm5, %v1724_v1  ;;  %v793_v26 = vsel %vm743_vm3, %v790_v9, %v792_v11  ;;  %v946_v32 = vsel %vm896_vm4, %v943_v2, %v945_v45  ;;  %v1408_v5 = vmul.f32 %v4682_v28, %v636_v44  ;;  %v1874_v31 = vmul.f32 %v5026_v59, %v1810_v29  ;;  %v1840_v22 = vpop.f32.mrf.mxu2 }
 0x139   : > { %v1527_v47 = vadd.f32 %v1486_v50, %v1375_v43  ;;  %v833_v35 = vadd.f32 %v793_v26, %v660_v23  ;;  %v5044_v9 = vstv %s3283_s16  ;;  %v1560_v25 = vmul.f32 %v4694_v34, %v636_v44 }
 0x13a   : > { %vm1948_vm6 = vcmp.ge.s32.totalorder %v5044_v9, 0  ;;  %v1141_v24 = vsel %vm743_vm3, %v1138_v13, %v1140_v39  ;;  %v1898_v57 = vadd.f32 %v5036_v41, %v1874_v31  ;;  %vm1958_vm7 = vcmp.lt.s32.totalorder %v5044_v9, 16  ;;  %v1813_v13 = vpop.f32.mrf.mxu0 }
 0x13b   : > { %v1679_v2 = vadd.f32 %v1638_v36, %v1527_v47  ;;  %v986_v3 = vadd.f32 %v946_v32, %v833_v35  ;;  %vm5052_vm9 = vmand %vm1948_vm6, %vm1958_vm7  ;;  %v1293_v30 = vsel %vm896_vm4, %v1290_v19, %v1292_v46  ;;  %v1487_v34 = vrot.slane %v1408_v5, 1 }
 0x13c   : > { %v1918_v16 = vmax.f32 %v1898_v57, 0.0  ;;  %v3483_v40 = vmov 0.0   ;;  %v1356_v51 = vmul.f32 %v4674_v12, %v4981_v21  ;;  %v1639_v10 = vrot.slane %v1560_v25, 2 }
 0x13d   : > { %v1702_v0 = vmul.f32 %v4840_v20, %v1679_v2  ;;  %v1029_v28 = vadd.f32 %v1009_v48, %v986_v3  ;;  %1999 = vst.msk [vmem:[#allocation3] sm:$0xff] %vm1998_vm8, %v3483_v40  ;;  %v1488_v6 = vsel %vm743_vm3, %v1485_v38, %v1487_v34  ;;  %v1883_v27 = vmul.f32 %v5026_v59, %v1837_v53 }
 0x13e   : > { %2000 = vst.msk [vmem:[#allocation3 + $0x8] sm:$0xff] %vm1998_vm8, %v3483_v40  ;;  %v1978_v7 = vsel %vm5052_vm9, %v1918_v16, 0.0  ;;  %v1640_v21 = vsel %vm896_vm4, %v1637_v52, %v1639_v10  ;;  %v1942_v58 = vadd.s32 4, %v5044_v9  ;;  %v1884_v8 = vmul.f32 %v5026_v59, %v1840_v22 }
 0x13f   : > { %v1725_v33 = vadd.f32 %v4852_v60, %v1702_v0  ;;  %v1181_v15 = vadd.f32 %v1141_v24, %v1029_v28  ;;  %2003 = vst.msk [vmem:[#allocation3 + $0x18] sm:$0xff] %vm1998_vm8, %v3483_v40  ;;  %v1907_v14 = vadd.f32 %v5036_v41, %v1883_v27  ;;  %v1943_v37 = vadd.s32 5, %v5044_v9 }
 0x140   : > { %2030 = vst.msk [vmem:[#allocation3 + $0x1] sm:$0xff] %vm1998_vm8, %v1978_v7  ;;  %vm1952_vm10 = vcmp.ge.s32.totalorder %v1942_v58, 0  ;;  %vm1962_vm11 = vcmp.lt.s32.totalorder %v1942_v58, 16  ;;  %v1939_v23 = vadd.s32 1, %v5044_v9  ;;  %v1908_v1 = vadd.f32 %v5036_v41, %v1884_v8  ;;  %v5188_v7 = vld [vmem:[%s6300_s7 + $0x2] ss:$0 sm:$0xff] }
 0x141   : > { %3311 = vmatmul.msk.f32.vlgmr.msra.gmra.mxu3 %vm1728_vm5, %v1725_v33  ;;  %v1333_v19 = vadd.f32 %v1293_v30, %v1181_v15  ;;  %2004 = vst.msk [vmem:[#allocation3 + $0x20] sm:$0xff] %vm1998_vm8, %v3483_v40  ;;  %vm5104_vm12 = vmand %vm1952_vm10, %vm1962_vm11  ;;  %vm1953_vm14 = vcmp.ge.s32.totalorder %v1943_v37, 0  ;;  %vm1963_vm15 = vcmp.lt.s32.totalorder %v1943_v37, 16  ;;  %v1944_v48 = vadd.s32 6, %v5044_v9 }
 0x142   : > { %2006 = vst.msk [vmem:[#allocation3 + $0x30] sm:$0xff] %vm1998_vm8, %v3483_v40  ;;  %v1816_v18 = vpop.f32.mrf.mxu0  ;;  %vm1949_vm0 = vcmp.ge.s32.totalorder %v1939_v23, 0  ;;  %vm1959_vm1 = vcmp.lt.s32.totalorder %v1939_v23, 16  ;;  %v1928_v44 = vmax.f32 %v1908_v1, 0.0  ;;  %vm1973_vm2 = vmand %vm1953_vm14, %vm1963_vm15  ;;  %v1940_v3 = vadd.s32 2, %v5044_v9 }
 0x143   : > { %v1376_v12 = vadd.f32 %v1356_v51, %v1333_v19  ;;  %2007 = vst.msk [vmem:[#allocation3 + $0x38] sm:$0xff] %vm1998_vm8, %v3483_v40  ;;  %v1876_v52 = vmul.f32 %v5026_v59, %v1816_v18  ;;  %vm1969_vm6 = vmand %vm1949_vm0, %vm1959_vm1  ;;  %vm1954_vm7 = vcmp.ge.s32.totalorder %v1944_v48, 0  ;;  %v5215_v1 = vld [vmem:[%s6300_s7 + $0x5] ss:$0 sm:$0xff] }
 0x144   : > { %2009 = vst.msk [vmem:[#allocation3 + $0x48] sm:$0xff] %vm1998_vm8, %v3483_v40  ;;  %v1988_v47 = vsel %vm1973_vm2, %v1928_v44, 0.0  ;;  %vm1950_vm11 = vcmp.ge.s32.totalorder %v1940_v3, 0  ;;  %v5224_v44 = vld [vmem:[%s6300_s7 + $0x6] ss:$0 sm:$0xff] }
 0x145   : > { %v1528_v62 = vadd.f32 %v1488_v6, %v1376_v12  ;;  %2010 = vst.msk [vmem:[#allocation3 + $0x50] sm:$0xff] %vm1998_vm8, %v3483_v40  ;;  %v1900_v11 = vadd.f32 %v5036_v41, %v1876_v52  ;;  %v5194_v6 = vld [vmem:[%s6300_s7] ss:$0 sm:$0xff] }
 0x146   : > { %2012 = vst.msk [vmem:[#allocation3 + $0x60] sm:$0xff] %vm1998_vm8, %v3483_v40 }
 0x147   : > { %v1680_v55 = vadd.f32 %v1640_v21, %v1528_v62  ;;  %2013 = vst.msk [vmem:[#allocation3 + $0x68] sm:$0xff] %vm1998_vm8, %v3483_v40  ;;  %v1920_v36 = vmax.f32 %v1900_v11, 0.0 }
 0x148   : > { %2015 = vst.msk [vmem:[#allocation3 + $0x78] sm:$0xff] %vm1998_vm8, %v3483_v40 }
 0x149   : > { %v1703_v49 = vmul.f32 %v4840_v20, %v1680_v55  ;;  %2016 = vst.msk [vmem:[#allocation3 + $0x80] sm:$0xff] %vm1998_vm8, %v3483_v40  ;;  %v1927_v20 = vmax.f32 %v1907_v14, 0.0  ;;  %v1980_v35 = vsel %vm1969_vm6, %v1920_v36, 0.0 }
 0x14a   : > { %2018 = vst.msk [vmem:[#allocation3 + $0x90] sm:$0xff] %vm1998_vm8, %v3483_v40 }
 0x14b   : > { %v1726_v17 = vadd.f32 %v4852_v60, %v1703_v49  ;;  %2019 = vst.msk [vmem:[#allocation3 + $0x98] sm:$0xff] %vm1998_vm8, %v3483_v40  ;;  %v1875_v60 = vmul.f32 %v5026_v59, %v1813_v13  ;;  %v1987_v63 = vsel %vm5104_vm12, %v1927_v20, 0.0  ;;  %v2050_v13 = vld [vmem:[#allocation3] sm:$0xff] }
 0x14c   : > { %2021 = vst.msk [vmem:[#allocation3 + $0xa8] sm:$0xff] %vm1998_vm8, %v3483_v40  ;;  %v2240_v49 = vmul.f32 %v5188_v7, %v2050_v13 }
 0x14d   : > { %3312 = vmatmul.msk.f32.gmra.mxu3 %vm1728_vm5, %v1726_v17  ;;  %2022 = vst.msk [vmem:[#allocation3 + $0xb0] sm:$0xff] %vm1998_vm8, %v3483_v40  ;;  %v1843_v4 = vpop.f32.mrf.mxu2  ;;  %v1899_v50 = vadd.f32 %v5036_v41, %v1875_v60  ;;  %v2084_v17 = vmul.f32 %v5194_v6, %v2050_v13 }
 0x14e   : > { %2024 = vst.msk [vmem:[#allocation3 + $0xc0] sm:$0xff] %vm1998_vm8, %v3483_v40  ;;  %v1885_v29 = vmul.f32 %v5026_v59, %v1843_v4  ;;  %v5208_v4 = vld [vmem:[%s6300_s7 + $0x4] ss:$0 sm:$0xff] }
 0x14f   : > { %2025 = vst.msk [vmem:[#allocation3 + $0xc8] sm:$0xff] %vm1998_vm8, %v3483_v40  ;;  %v1819_v54 = vpop.f32.mrf.mxu0  ;;  %v1919_v42 = vmax.f32 %v1899_v50, 0.0  ;;  %v2288_v50 = vrot.slane %v2240_v49, 2 }
 0x150   : > { %2027 = vst.msk [vmem:[#allocation3 + $0xd8] sm:$0xff] %vm1998_vm8, %v3483_v40  ;;  %v1877_v56 = vmul.f32 %v5026_v59, %v1819_v54  ;;  %v1909_v45 = vadd.f32 %v5036_v41, %v1885_v29 }
 0x151   : > { %2028 = vst.msk [vmem:[#allocation3 + $0xe0] sm:$0xff] %vm1998_vm8, %v3483_v40  ;;  %v1979_v32 = vsel %vm5052_vm9, %v1919_v42, 0.0  ;;  %vm1964_vm9 = vcmp.lt.s32.totalorder %v1944_v48, 16  ;;  %v1945_v42 = vadd.s32 7, %v5044_v9 }
 0x152   : > { %2014 = vst.msk [vmem:[#allocation3 + $0x70] sm:$0x3] %vm2001_vm13, %v3483_v40  ;;  %v1901_v43 = vadd.f32 %v5036_v41, %v1877_v56  ;;  %v1929_v26 = vmax.f32 %v1909_v45, 0.0  ;;  %vm5162_vm10 = vmand %vm1954_vm7, %vm1964_vm9 }
 0x153   : > { %2039 = vst.msk [vmem:[#allocation3 + $0x69] sm:$0xff] %vm1998_vm8, %v1987_v63  ;;  %vm1955_vm15 = vcmp.ge.s32.totalorder %v1945_v42, 0  ;;  %vm1965_vm0 = vcmp.lt.s32.totalorder %v1945_v42, 16 }
 0x154   : > { %2002 = vst.msk [vmem:[#allocation3 + $0x10] sm:$0x3] %vm2001_vm13, %v3483_v40  ;;  %v1921_v39 = vmax.f32 %v1901_v43, 0.0  ;;  %v1989_v46 = vsel %vm1973_vm2, %v1929_v26, 0.0 }
 0x155   : > { %2005 = vst.msk [vmem:[#allocation3 + $0x28] sm:$0x3] %vm2001_vm13, %v3483_v40 }
 0x156   : > { %2008 = vst.msk [vmem:[#allocation3 + $0x40] sm:$0x3] %vm2001_vm13, %v3483_v40  ;;  %v1981_v5 = vsel %vm1969_vm6, %v1921_v39, 0.0  ;;  %vm5258_vm6 = vmand %vm1955_vm15, %vm1965_vm0 }
 0x157   : > { %2011 = vst.msk [vmem:[#allocation3 + $0x58] sm:$0x3] %vm2001_vm13, %v3483_v40 }
 0x158   : > { %2017 = vst.msk [vmem:[#allocation3 + $0x88] sm:$0x3] %vm2001_vm13, %v3483_v40 }
 0x159   : > { %2020 = vst.msk [vmem:[#allocation3 + $0xa0] sm:$0x3] %vm2001_vm13, %v3483_v40 }
 0x15a   : > { %2023 = vst.msk [vmem:[#allocation3 + $0xb8] sm:$0x3] %vm2001_vm13, %v3483_v40 }
 0x15b   : > { %2026 = vst.msk [vmem:[#allocation3 + $0xd0] sm:$0x3] %vm2001_vm13, %v3483_v40 }
 0x15c   : > { %2029 = vst.msk [vmem:[#allocation3 + $0xe8] sm:$0x3] %vm2001_vm13, %v3483_v40  ;;  %v1846_v31 = vpop.f32.mrf.mxu2  ;;  %vm1960_vm13 = vcmp.lt.s32.totalorder %v1940_v3, 16  ;;  %v5181_v40 = vld [vmem:[%s6300_s7 + $0x1] ss:$0 sm:$0xff] }
 0x15d   : > { %2031 = vst.msk [vmem:[#allocation3 + $0x9] sm:$0xff] %vm1998_vm8, %v1979_v32  ;;  %v1886_v2 = vmul.f32 %v5026_v59, %v1846_v31  ;;  %vm5171_vm14 = vmand %vm1950_vm11, %vm1960_vm13  ;;  %v2118_v33 = vmul.f32 %v5181_v40, %v2050_v13 }
 0x15e   : > { %2040 = vst.msk [vmem:[#allocation3 + $0x79] sm:$0xff] %vm1998_vm8, %v1988_v47  ;;  %v5232_v47 = vadd.s32 3, %v5044_v9 }
 0x15f   : > { %2032 = vst.msk [vmem:[#allocation3 + $0x19] sm:$0xff] %vm1998_vm8, %v1980_v35  ;;  %v1910_v25 = vadd.f32 %v5036_v41, %v1886_v2  ;;  %v2166_v12 = vrot.slane %v2118_v33, 1 }
 0x160   : > { %2041 = vst.msk [vmem:[#allocation3 + $0x81] sm:$0xff] %vm1998_vm8, %v1989_v46  ;;  %vm1951_vm1 = vcmp.ge.s32.totalorder %v5232_v47, 0  ;;  %vm1961_vm2 = vcmp.lt.s32.totalorder %v5232_v47, 16 }
 0x161   : > { %2033 = vst.msk [vmem:[#allocation3 + $0x21] sm:$0xff] %vm1998_vm8, %v1981_v5  ;;  %v1930_v57 = vmax.f32 %v1910_v25, 0.0  ;;  %vm5298_vm7 = vmand %vm1951_vm1, %vm1961_vm2 }
 0x162   : > { %v1822_v0 = vpop.f32.mrf.mxu0 }
 0x163   : > { %v1878_v28 = vmul.f32 %v5026_v59, %v1822_v0  ;;  %v1990_v61 = vsel %vm5162_vm10, %v1930_v57, 0.0 }
 0x164   : > { %2042 = vst.msk [vmem:[#allocation3 + $0x91] sm:$0xff] %vm1998_vm8, %v1990_v61  ;;  %v2051_v15 = vld [vmem:[#allocation3 + $0x8] sm:$0xff]  ;;  %v2052_v51 = vld [vmem:[#allocation3 + $0x10] sm:$0x3] }
 0x165   : > { %v1902_v53 = vadd.f32 %v5036_v41, %v1878_v28  ;;  %v2119_v10 = vmul.f32 %v5181_v40, %v2051_v15  ;;  %v2120_v19 = vmul.f32 %v5181_v40, %v2052_v51  ;;  %v2241_v62 = vmul.f32 %v5188_v7, %v2051_v15 }
 0x166   : > { %v2242_v20 = vmul.f32 %v5188_v7, %v2052_v51  ;;  %v2053_v54 = vld [vmem:[#allocation3 + $0x18] sm:$0xff]  ;;  %v2085_v23 = vmul.f32 %v5194_v6, %v2051_v15 }
 0x167   : > { %v1922_v34 = vmax.f32 %v1902_v53, 0.0  ;;  %v2167_v21 = vrot.slane %v2119_v10, 1  ;;  %v2169_v55 = vrot.slane %v2120_v19, 1  ;;  %v2289_v8 = vrot.slane %v2241_v62, 2 }
 0x168   : > { %v2291_v11 = vrot.slane %v2242_v20, 2  ;;  %v2363_v39 = vmul.f32 %v5208_v4, %v2053_v54  ;;  %v2397_v35 = vmul.f32 %v5215_v1, %v2053_v54  ;;  %v2519_v46 = vmul.f32 %v5224_v44, %v2053_v54  ;;  %v2054_v31 = vld [vmem:[#allocation3 + $0x20] sm:$0xff]  ;;  %v2055_v3 = vld [vmem:[#allocation3 + $0x28] sm:$0x3] }
 0x169   : > { %v1982_v16 = vsel %vm5171_vm14, %v1922_v34, 0.0  ;;  %v2168_v18 = vsel %vm743_vm3, %v2166_v12, %v2167_v21  ;;  %v2170_v37 = vsel %vm743_vm3, %v2167_v21, %v2169_v55  ;;  %v2290_v43 = vsel %vm896_vm4, %v2288_v50, %v2289_v8 }
 0x16a   : > { %2034 = vst.msk [vmem:[#allocation3 + $0x31] sm:$0xff] %vm1998_vm8, %v1982_v16  ;;  %v2222_v52 = vadd.f32 %v2168_v18, %v2084_v17  ;;  %v2223_v36 = vadd.f32 %v2170_v37, %v2085_v23  ;;  %v2292_v48 = vsel %vm896_vm4, %v2289_v8, %v2291_v11  ;;  %v2086_v25 = vmul.f32 %v5194_v6, %v2053_v54  ;;  %v5266_v8 = vld [vmem:[%s6300_s7 + $0x8] ss:$0 sm:$0xff] }
 0x16b   : > { %v2121_v24 = vmul.f32 %v5181_v40, %v2053_v54  ;;  %v2243_v57 = vmul.f32 %v5188_v7, %v2053_v54  ;;  %v2398_v0 = vmul.f32 %v5215_v1, %v2054_v31  ;;  %v2520_v28 = vmul.f32 %v5224_v44, %v2054_v31 }
 0x16c   : > { %v2344_v32 = vadd.f32 %v2290_v43, %v2222_v52  ;;  %v2345_v5 = vadd.f32 %v2292_v48, %v2223_v36  ;;  %v2364_v61 = vmul.f32 %v5208_v4, %v2054_v31  ;;  %v2399_v53 = vmul.f32 %v5215_v1, %v2055_v3  ;;  %v5276_v52 = vld [vmem:[%s6300_s7 + $0xa] ss:$0 sm:$0xff] }
 0x16d   : > { %v2445_v30 = vrot.slane %v2397_v35, 1  ;;  %v2521_v34 = vmul.f32 %v5224_v44, %v2055_v3  ;;  %v2122_v16 = vmul.f32 %v5181_v40, %v2054_v31  ;;  %v5249_v13 = vmul.f32 %v5188_v7, %v2054_v31 }
 0x16e   : > { %v2379_v2 = vadd.f32 %v2363_v39, %v2344_v32  ;;  %v2446_v15 = vrot.slane %v2398_v0, 1  ;;  %v2568_v51 = vrot.slane %v2520_v28, 2  ;;  %v2380_v10 = vadd.f32 %v2364_v61, %v2345_v5 }
 0x16f   : > { %v2448_v19 = vrot.slane %v2399_v53, 1  ;;  %v2567_v21 = vrot.slane %v2519_v46, 2  ;;  %v2172_v62 = vrot.slane %v2122_v16, 1  ;;  %v2293_v18 = vrot.slane %v2243_v57, 2 }
 0x170   : > { %v2447_v55 = vsel %vm743_vm3, %v2445_v30, %v2446_v15  ;;  %v2123_v50 = vmul.f32 %v5181_v40, %v2055_v3  ;;  %v2245_v43 = vmul.f32 %v5188_v7, %v2055_v3 }
 0x171   : > { %v2501_v17 = vadd.f32 %v2447_v55, %v2379_v2  ;;  %v2569_v20 = vsel %vm896_vm4, %v2567_v21, %v2568_v51  ;;  %v2056_v11 = vld [vmem:[#allocation3 + $0x30] sm:$0xff] }
 0x172   : > { %v2798_v39 = vmul.f32 %v5276_v52, %v2056_v11  ;;  %v2365_v46 = vmul.f32 %v5208_v4, %v2056_v11  ;;  %v2400_v5 = vmul.f32 %v5215_v1, %v2056_v11  ;;  %v2522_v28 = vmul.f32 %v5224_v44, %v2056_v11 }
 0x173   : > { %v2174_v61 = vrot.slane %v2123_v50, 1  ;;  %v2296_v16 = vrot.slane %v2245_v43, 2 }
 0x174   : > { %v1849_v27 = vpop.f32.mrf.mxu2 }
 0x175   : > { %v1887_v58 = vmul.f32 %v5026_v59, %v1849_v27  ;;  %v2294_v27 = vrot.slane %v5249_v13, 2 }
 0x176   : > { %v1825_v22 = vpop.f32.mrf.mxu0 }
 0x177   : > { %v1879_v14 = vmul.f32 %v5026_v59, %v1825_v22  ;;  %v1911_v60 = vadd.f32 %v5036_v41, %v1887_v58  ;;  %v2449_v58 = vsel %vm743_vm3, %v2446_v15, %v2448_v19  ;;  %v2171_v22 = vrot.slane %v2121_v24, 1 }
 0x178   : > { %v2502_v37 = vadd.f32 %v2449_v58, %v2380_v10  ;;  %v2295_v54 = vsel %vm896_vm4, %v2293_v18, %v2294_v27  ;;  %v5305_v15 = vmul.f32 %v5181_v40, %v2056_v11  ;;  %v2572_v10 = vrot.slane %v2522_v28, 2 }
 0x179   : > { %v1903_v63 = vadd.f32 %v5036_v41, %v1879_v14  ;;  %v1931_v29 = vmax.f32 %v1911_v60, 0.0  ;;  %v2570_v60 = vrot.slane %v2521_v34, 2  ;;  %v2846_v34 = vrot.slane %v2798_v39, 2 }
 0x17a   : > { %v5313_v19 = vmul.f32 %v5194_v6, %v2056_v11  ;;  %v2297_v58 = vsel %vm896_vm4, %v2294_v27, %v2296_v16  ;;  %v5325_v18 = vmul.f32 %v5188_v7, %v2056_v11 }
 0x17b   : > { %v1923_v56 = vmax.f32 %v1903_v63, 0.0  ;;  %v1991_v45 = vsel %vm5162_vm10, %v1931_v29, 0.0  ;;  %v5271_v63 = vld [vmem:[%s6300_s7 + $0x9] ss:$0 sm:$0xff]  ;;  %v2173_v29 = vsel %vm743_vm3, %v2171_v22, %v2172_v62  ;;  %v2571_v3 = vsel %vm896_vm4, %v2568_v51, %v2570_v60 }
 0x17c   : > { %2043 = vst.msk [vmem:[#allocation3 + $0x99] sm:$0xff] %vm1998_vm8, %v1991_v45  ;;  %v2623_v45 = vadd.f32 %v2569_v20, %v2501_v17  ;;  %v2224_v42 = vadd.f32 %v2173_v29, %v2086_v25  ;;  %v2676_v32 = vmul.f32 %v5271_v63, %v2056_v11  ;;  %v2087_v25 = vmul.f32 %v5194_v6, %v2054_v31 }
 0x17d   : > { %v1983_v26 = vsel %vm5171_vm14, %v1923_v56, 0.0  ;;  %v2624_v0 = vadd.f32 %v2571_v3, %v2502_v37  ;;  %v2175_v31 = vsel %vm743_vm3, %v2172_v62, %v2174_v61  ;;  %v5310_v51 = vadd.s32 8, %v5044_v9 }
 0x17e   : > { %2035 = vst.msk [vmem:[#allocation3 + $0x39] sm:$0xff] %vm1998_vm8, %v1983_v26  ;;  %v2642_v26 = vmul.f32 %v5266_v8, %v2056_v11  ;;  %v2346_v48 = vadd.f32 %v2295_v54, %v2224_v42  ;;  %v2724_v30 = vrot.slane %v2676_v32, 1  ;;  %v2225_v55 = vadd.f32 %v2175_v31, %v2087_v25 }
 0x17f   : > { %v2176_v22 = vrot.slane %v5305_v15, 1  ;;  %vm1956_vm9 = vcmp.ge.s32.totalorder %v5310_v51, 0  ;;  %vm1966_vm10 = vcmp.lt.s32.totalorder %v5310_v51, 16 }
 0x180   : > { %v2658_v57 = vadd.f32 %v2642_v26, %v2623_v45  ;;  %v2381_v13 = vadd.f32 %v2365_v46, %v2346_v48  ;;  %v2973_v45 = vld [vmem:[%s6303_s10 + $0x8] sm:$0xff]  ;;  %v2347_v26 = vadd.f32 %v2297_v58, %v2225_v55  ;;  %v2298_v48 = vrot.slane %v5325_v18, 2  ;;  %vm5542_vm11 = vmand %vm1956_vm9, %vm1966_vm10 }
 0x181   : > { %3036 = vmatpush.msra.mxu1 %v2973_v45  ;;  %3342 = vmatpush.msrb.mxu3 %v2973_v45 }
 0x183   : > { %v1852_v33 = vpop.f32.mrf.mxu2  ;;  %v5463_v18 = vld [vmem:[#allocation3 + $0x98] sm:$0xff] }
 0x184   : > { %v1888_v12 = vmul.f32 %v5026_v59, %v1852_v33  ;;  %v2450_v33 = vrot.slane %v2400_v5, 1 }
 0x185   : > { %v5318_v21 = vld [vmem:[#allocation3 + $0x38] sm:$0xff]  ;;  %v5320_v62 = vld [vmem:[#allocation3 + $0x40] sm:$0x3] }
 0x186   : > { %v1912_v49 = vadd.f32 %v5036_v41, %v1888_v12  ;;  %v5315_v12 = vld [vmem:[#allocation3 + $0x70] sm:$0x3]  ;;  %v2799_v17 = vmul.f32 %v5276_v52, %v5318_v21  ;;  %v2643_v20 = vmul.f32 %v5266_v8, %v5318_v21  ;;  %v2678_v60 = vmul.f32 %v5271_v63, %v5320_v62 }
 0x187   : > { %v2800_v27 = vmul.f32 %v5276_v52, %v5320_v62  ;;  %v2401_v37 = vmul.f32 %v5215_v1, %v5318_v21  ;;  %v5341_v29 = vmul.f32 %v5224_v44, %v5318_v21  ;;  %v5345_v54 = vmul.f32 %v5181_v40, %v5315_v12 }
 0x188   : > { %v1932_v23 = vmax.f32 %v1912_v49, 0.0  ;;  %v2677_v49 = vmul.f32 %v5271_v63, %v5318_v21  ;;  %v2727_v11 = vrot.slane %v2678_v60, 1  ;;  %v2402_v61 = vmul.f32 %v5215_v1, %v5320_v62 }
 0x189   : > { %v1828_v56 = vpop.f32.mrf.mxu0  ;;  %v2849_v42 = vrot.slane %v2800_v27, 2  ;;  %v2451_v43 = vrot.slane %v2401_v37, 1 }
 0x18a   : > { %v1880_v36 = vmul.f32 %v5026_v59, %v1828_v56  ;;  %v1992_v35 = vsel %vm5258_vm6, %v1932_v23, 0.0  ;;  %v2725_v50 = vrot.slane %v2677_v49, 1  ;;  %v2847_v23 = vrot.slane %v2799_v17, 2 }
 0x18b   : > { %2044 = vst.msk [vmem:[#allocation3 + $0xa9] sm:$0xff] %vm1998_vm8, %v1992_v35  ;;  %v2659_v56 = vadd.f32 %v2643_v20, %v2624_v0  ;;  %v2366_v35 = vmul.f32 %v5208_v4, %v5318_v21  ;;  %v2452_v3 = vsel %vm743_vm3, %v2450_v33, %v2451_v43  ;;  %v5390_v20 = vld [vmem:[%s6302_s9] ss:$0 sm:$0xff]  ;;  %v2453_v27 = vrot.slane %v2402_v61, 1 }
 0x18c   : > { %v1904_v2 = vadd.f32 %v5036_v41, %v1880_v36  ;;  %v2573_v36 = vrot.slane %v5341_v29, 2  ;;  %v2726_v32 = vsel %vm743_vm3, %v2724_v30, %v2725_v50  ;;  %v2728_v39 = vsel %vm743_vm3, %v2725_v50, %v2727_v11  ;;  %v5365_v30 = vld [vmem:[%s6301_s8] ss:$0 sm:$0xff] }
 0x18d   : > { %v2780_v46 = vadd.f32 %v2726_v32, %v2658_v57  ;;  %v2848_v5 = vsel %vm896_vm4, %v2846_v34, %v2847_v23  ;;  %v2850_v25 = vsel %vm896_vm4, %v2847_v23, %v2849_v42  ;;  %v2503_v0 = vadd.f32 %v2452_v3, %v2381_v13 }
 0x18e   : > { %v1924_v53 = vmax.f32 %v1904_v2, 0.0  ;;  %v2781_v2 = vadd.f32 %v2728_v39, %v2659_v56  ;;  %v2574_v28 = vsel %vm896_vm4, %v2572_v10, %v2573_v36  ;;  %v2524_v34 = vmul.f32 %v5224_v44, %v5320_v62 }
 0x18f   : > { %v5373_v13 = vmul.f32 %v5181_v40, %v5318_v21  ;;  %v2625_v31 = vadd.f32 %v2574_v28, %v2503_v0  ;;  %v2382_v50 = vadd.f32 %v2366_v35, %v2347_v26  ;;  %v2454_v42 = vsel %vm743_vm3, %v2451_v43, %v2453_v27  ;;  %v2972_v26 = vld [vmem:[%s6303_s10] sm:$0xff] }
 0x190   : > { %v1984_v47 = vsel %vm5298_vm7, %v1924_v53, 0.0  ;;  %v2902_v53 = vadd.f32 %v2848_v5, %v2780_v46  ;;  %v2903_v57 = vadd.f32 %v2850_v25, %v2781_v2  ;;  %v2575_v46 = vrot.slane %v2524_v34, 2  ;;  %3037 = vmatpush.msra.mxu1 %v2972_v26  ;;  %3343 = vmatpush.msrb.mxu3 %v2972_v26 }
 0x191   : > { %2036 = vst.msk [vmem:[#allocation3 + $0x49] sm:$0xff] %vm1998_vm8, %v1984_v47  ;;  %v6348_v5 = vrot.slane %v5373_v13, 1  ;;  %v5410_v25 = vmul.f32 %v5188_v7, %v5318_v21  ;;  %v2504_v28 = vadd.f32 %v2454_v42, %v2382_v50 }
 0x192   : > { %v2921_v17 = vmul.f32 %v5365_v30, %v2902_v53  ;;  %v2922_v60 = vmul.f32 %v5365_v30, %v2903_v57  ;;  %v2576_v57 = vsel %vm896_vm4, %v2573_v36, %v2575_v46  ;;  %v5442_v36 = vmul.f32 %v5188_v7, %v5315_v12 }
 0x193   : > { %v2178_v61 = vsel %vm743_vm3, %v2176_v22, %v6348_v5  ;;  %v5438_v22 = vld [vmem:[#allocation3 + $0x88] sm:$0x3]  ;;  %v5478_v46 = vmul.f32 %v5271_v63, %v5463_v18 }
 0x194   : > { %v2940_v11 = vadd.f32 %v5390_v20, %v2921_v17  ;;  %v2941_v45 = vadd.f32 %v5390_v20, %v2922_v60  ;;  %v2226_v34 = vadd.f32 %v2178_v61, %v5313_v19  ;;  %6424 = vst [vmem:[#allocation9_spill] sm:$0xff] %v5438_v22  ;;  %v2626_v17 = vadd.f32 %v2576_v57, %v2504_v28 }
 0x195   : > { %6428 = vst [vmem:[#allocation13_spill] sm:$0xff] %v5478_v46  ;;  %v5485_v28 = vmul.f32 %v5276_v52, %v5463_v18  ;;  %v6345_v57 = vrot.slane %v5478_v46, 1 }
 0x196   : > { %v2956_v35 = vmax.f32 %v2940_v11, 0.0  ;;  %v2957_v0 = vmax.f32 %v2941_v45, 0.0  ;;  %v2533_v45 = vmul.f32 %v5224_v44, %v5438_v22 }
 0x198   : > { %v5367_v16 = vld [vmem:[#allocation3 + $0x48] sm:$0xff]  ;;  %3319 = vmatmul.msk.f32.vlgmr.msra.gmra.mxu1 %vm1998_vm8, %v2956_v35 }
 0x199   : > { %6423 = vst [vmem:[#allocation8_spill] sm:$0xff] %v5367_v16  ;;  %v2644_v47 = vmul.f32 %v5266_v8, %v5367_v16  ;;  %v5379_v10 = vmul.f32 %v5271_v63, %v5367_v16  ;;  %v5383_v55 = vmul.f32 %v5276_v52, %v5367_v16  ;;  %v5432_v14 = vmul.f32 %v5215_v1, %v5367_v16 }
 0x19a   : > { %v1855_v33 = vpop.f32.mrf.mxu2  ;;  %v1831_v49 = vpop.f32.mrf.mxu0  ;;  %v5436_v19 = vmul.f32 %v5224_v44, %v5367_v16 }
 0x19b   : > { %v1889_v58 = vmul.f32 %v5026_v59, %v1855_v33  ;;  %v1881_v37 = vmul.f32 %v5026_v59, %v1831_v49  ;;  %v5394_v29 = vadd.f32 %v2644_v47, %v2625_v31  ;;  %v6347_v33 = vrot.slane %v5410_v25, 2  ;;  %v5423_v31 = vld [vmem:[#allocation3 + $0x80] sm:$0xff] }
 0x19c   : > { %v2367_v47 = vmul.f32 %v5208_v4, %v5367_v16  ;;  %v2411_v49 = vmul.f32 %v5215_v1, %v5438_v22  ;;  %v2455_v27 = vrot.slane %v5432_v14, 1  ;;  %v5470_v11 = vmul.f32 %v5224_v44, %v5423_v31 }
 0x19d   : > { %v1913_v56 = vadd.f32 %v5036_v41, %v1889_v58  ;;  %v1905_v32 = vadd.f32 %v5036_v41, %v1881_v37  ;;  %v2300_v24 = vsel %vm896_vm4, %v2298_v48, %v6347_v33  ;;  %v5454_v58 = vmul.f32 %v5215_v1, %v5423_v31  ;;  %v5465_v48 = vld [vmem:[#allocation3 + $0xa0] sm:$0x3] }
 0x19e   : > { %v2348_v60 = vadd.f32 %v2300_v24, %v2226_v34  ;;  %v5461_v37 = vmul.f32 %v5208_v4, %v5423_v31  ;;  %6426 = vst [vmem:[#allocation11_spill] sm:$0xff] %v5465_v48  ;;  %v2577_v42 = vrot.slane %v5436_v19, 2  ;;  %v6344_v35 = vrot.slane %v5470_v11, 2 }
 0x19f   : > { %v1933_v2 = vmax.f32 %v1913_v56, 0.0  ;;  %v1925_v43 = vmax.f32 %v1905_v32, 0.0  ;;  %6425 = vst [vmem:[#allocation10_spill] sm:$0xff] %v5454_v58  ;;  %v6346_v50 = vrot.slane %v5454_v58, 1  ;;  %v2468_v56 = vrot.slane %v2411_v49, 1 }
 0x1a0   : > { %6427 = vst [vmem:[#allocation12_spill] sm:$0xff] %v5470_v11  ;;  %v2383_v26 = vadd.f32 %v2367_v47, %v2348_v60  ;;  %v5498_v14 = vadd.s32 9, %v5044_v9  ;;  %3320 = vmatmul.msk.f32.gmra.mxu1 %vm1998_vm8, %v2957_v0  ;;  %v2812_v24 = vmul.f32 %v5276_v52, %v5465_v48  ;;  %v2089_v0 = vmul.f32 %v5194_v6, %v5318_v21 }
 0x1a1   : > { %v1993_v53 = vsel %vm5258_vm6, %v1933_v2, 0.0  ;;  %v1985_v15 = vsel %vm5298_vm7, %v1925_v43, 0.0  ;;  %v2690_v2 = vmul.f32 %v5271_v63, %v5465_v48  ;;  %v2590_v43 = vrot.slane %v2533_v45, 2 }
 0x1a2   : > { %2045 = vst.msk [vmem:[#allocation3 + $0xb1] sm:$0xff] %vm1998_vm8, %v1993_v53  ;;  %v5490_v61 = vsel %vm743_vm3, %v6346_v50, %v2468_v56  ;;  %v5494_v53 = vmul.f32 %v5266_v8, %v5463_v18  ;;  %v2126_v45 = vmul.f32 %v5181_v40, %v5320_v62  ;;  %v6432_v58 = vrot.slane %v5379_v10, 1 }
 0x1a3   : > { %2037 = vst.msk [vmem:[#allocation3 + $0x51] sm:$0xff] %vm1998_vm8, %v1985_v15  ;;  %v2747_v34 = vrot.slane %v2690_v2, 1  ;;  %v5504_v19 = vsel %vm896_vm4, %v6344_v35, %v2590_v43  ;;  %v6433_v51 = vrot.slane %v5383_v55, 2  ;;  %vm1967_vm13 = vcmp.lt.s32.totalorder %v5498_v14, 16 }
 0x1a5   : > { %v5517_v9 = vsel %vm743_vm3, %v6345_v57, %v2747_v34 }
 0x1a6   : > { %6429 = vst [vmem:[#allocation14_spill] sm:$0xff] %v5517_v9 }
 0x1aa   : > { %v1858_v15 = vpop.f32.mrf.mxu2  ;;  %v5510_v60 = vld [vmem:[#allocation3 + $0x50] sm:$0xff]  ;;  %v5512_v56 = vld [vmem:[#allocation3 + $0x58] sm:$0x3] }
 0x1ab   : > { %v1890_v49 = vmul.f32 %v5026_v59, %v1858_v15  ;;  %v2680_v2 = vmul.f32 %v5271_v63, %v5510_v60  ;;  %v2802_v43 = vmul.f32 %v5276_v52, %v5510_v60  ;;  %v2645_v15 = vmul.f32 %v5266_v8, %v5510_v60 }
 0x1ac   : > { %v2681_v35 = vmul.f32 %v5271_v63, %v5512_v56  ;;  %v2803_v21 = vmul.f32 %v5276_v52, %v5512_v56  ;;  %v2404_v57 = vmul.f32 %v5215_v1, %v5510_v60  ;;  %v2526_v50 = vmul.f32 %v5224_v44, %v5510_v60 }
 0x1ad   : > { %v1914_v34 = vadd.f32 %v5036_v41, %v1890_v49  ;;  %v2730_v33 = vrot.slane %v2680_v2, 1  ;;  %v2852_v49 = vrot.slane %v2802_v43, 2  ;;  %v2661_v5 = vadd.f32 %v2645_v15, %v2626_v17 }
 0x1ae   : > { %v1834_v23 = vpop.f32.mrf.mxu0  ;;  %v2732_v47 = vrot.slane %v2681_v35, 1  ;;  %v2854_v46 = vrot.slane %v2803_v21, 2  ;;  %v2456_v11 = vrot.slane %v2404_v57, 1  ;;  %v2578_v9 = vrot.slane %v2526_v50, 2 }
 0x1af   : > { %v1934_v3 = vmax.f32 %v1914_v34, 0.0  ;;  %v1882_v39 = vmul.f32 %v5026_v59, %v1834_v23  ;;  %v2731_v48 = vsel %vm743_vm3, %v6432_v58, %v2730_v33  ;;  %v2853_v22 = vsel %vm896_vm4, %v6433_v51, %v2852_v49 }
 0x1b0   : > { %v2733_v16 = vsel %vm743_vm3, %v2730_v33, %v2732_v47  ;;  %v2782_v23 = vadd.f32 %v2731_v48, %v5394_v29  ;;  %v2855_v10 = vsel %vm896_vm4, %v2852_v49, %v2854_v46  ;;  %v2457_v58 = vsel %vm743_vm3, %v2455_v27, %v2456_v11  ;;  %v5589_v49 = vld [vmem:[#allocation3 + $0x78] sm:$0xff] }
 0x1b1   : > { %v1994_v17 = vsel %vm5542_vm11, %v1934_v3, 0.0  ;;  %v1906_v35 = vadd.f32 %v5036_v41, %v1882_v39  ;;  %v2783_v2 = vadd.f32 %v2733_v16, %v2661_v5  ;;  %v2579_v55 = vsel %vm896_vm4, %v2577_v42, %v2578_v9 }
 0x1b2   : > { %2046 = vst.msk [vmem:[#allocation3 + $0xc1] sm:$0xff] %vm1998_vm8, %v1994_v17  ;;  %v2869_v57 = vrot.slane %v2812_v24, 2  ;;  %v2904_v33 = vadd.f32 %v2853_v22, %v2782_v23  ;;  %v2505_v47 = vadd.f32 %v2457_v58, %v2383_v26  ;;  %v6434_v3 = vrot.slane %v5485_v28, 2 }
 0x1b3   : > { %v1926_v43 = vmax.f32 %v1906_v35, 0.0  ;;  %v2905_v50 = vadd.f32 %v2855_v10, %v2783_v2  ;;  %v2179_v29 = vrot.slane %v2126_v45, 1  ;;  %v2248_v16 = vmul.f32 %v5188_v7, %v5320_v62 }
 0x1b4   : > { %v5565_v39 = vsel %vm896_vm4, %v6434_v3, %v2869_v57  ;;  %v2368_v5 = vmul.f32 %v5208_v4, %v5510_v60  ;;  %v2923_v48 = vmul.f32 %v5365_v30, %v2904_v33  ;;  %v2627_v42 = vadd.f32 %v2579_v55, %v2505_v47  ;;  %v5597_v55 = vld [vmem:[#allocation3 + $0x90] sm:$0xff] }
 0x1b5   : > { %v1986_v27 = vsel %vm5104_vm12, %v1926_v43, 0.0  ;;  %v2924_v22 = vmul.f32 %v5365_v30, %v2905_v50  ;;  %v6435_v46 = vrot.slane %v5373_v13, 1  ;;  %v2301_v24 = vrot.slane %v2248_v16, 2 }
 0x1b6   : > { %2038 = vst.msk [vmem:[#allocation3 + $0x61] sm:$0xff] %vm1998_vm8, %v1986_v27  ;;  %v2405_v62 = vmul.f32 %v5215_v1, %v5512_v56  ;;  %v2527_v45 = vmul.f32 %v5224_v44, %v5512_v56  ;;  %v2942_v38 = vadd.f32 %v5390_v20, %v2923_v48  ;;  %v5587_v21 = vmul.f32 %v5271_v63, %v5315_v12 }
 0x1b7   : > { %v2180_v26 = vsel %vm743_vm3, %v6435_v46, %v2179_v29  ;;  %v2943_v15 = vadd.f32 %v5390_v20, %v2924_v22  ;;  %v6436_v13 = vrot.slane %v5410_v25, 2  ;;  %v2806_v23 = vmul.f32 %v5276_v52, %v5315_v12 }
 0x1b8   : > { %v2227_v34 = vadd.f32 %v2180_v26, %v2089_v0  ;;  %v2458_v17 = vrot.slane %v2405_v62, 1  ;;  %v2580_v35 = vrot.slane %v2527_v45, 2  ;;  %v2958_v2 = vmax.f32 %v2942_v38, 0.0 }
 0x1b9   : > { %v2302_v51 = vsel %vm896_vm4, %v6436_v13, %v2301_v24  ;;  %v2959_v10 = vmax.f32 %v2943_v15, 0.0  ;;  %v2737_v0 = vrot.slane %v5587_v21, 1  ;;  %v2859_v33 = vrot.slane %v2806_v23, 2 }
 0x1ba   : > { %v2349_v58 = vadd.f32 %v2302_v51, %v2227_v34  ;;  %v2459_v57 = vsel %vm743_vm3, %v2456_v11, %v2458_v17  ;;  %v2581_v43 = vsel %vm896_vm4, %v2578_v9, %v2580_v35  ;;  %v2094_v25 = vmul.f32 %v5194_v6, %v5589_v49  ;;  %3321 = vmatmul.msk.f32.gmra.mxu1 %vm1998_vm8, %v2958_v2 }
 0x1bb   : > { %v1861_v50 = vpop.f32.mrf.mxu2  ;;  %v2133_v3 = vmul.f32 %v5181_v40, %v5589_v49  ;;  %v5608_v29 = vmul.f32 %v5181_v40, %v5423_v31  ;;  %v5612_v11 = vmul.f32 %v5188_v7, %v5589_v49  ;;  %v5617_v16 = vmul.f32 %v5188_v7, %v5423_v31 }
 0x1bc   : > { %v2384_v47 = vadd.f32 %v2368_v5, %v2349_v58  ;;  %v1891_v9 = vmul.f32 %v5026_v59, %v1861_v50  ;;  %v5621_v5 = vmul.f32 %v5208_v4, %v5597_v55  ;;  %v5625_v27 = vmul.f32 %v5215_v1, %v5597_v55 }
 0x1bd   : > { %vm1957_vm12 = vcmp.ge.s32.totalorder %v5498_v14, 0  ;;  %v5629_v48 = vld [vmem:[#allocation3 + $0x60] sm:$0xff]  ;;  %v5631_v22 = vld [vmem:[#allocation3 + $0x68] sm:$0xff]  ;;  %v2191_v46 = vrot.slane %v2133_v3, 1  ;;  %v2192_v26 = vrot.slane %v5608_v29, 1  ;;  %v2313_v24 = vrot.slane %v5612_v11, 2 }
 0x1be   : > { %v2506_v59 = vadd.f32 %v2459_v57, %v2384_v47  ;;  %v1915_v62 = vadd.f32 %v5036_v41, %v1891_v9  ;;  %v2646_v45 = vmul.f32 %v5266_v8, %v5629_v48  ;;  %v2682_v38 = vmul.f32 %v5271_v63, %v5629_v48  ;;  %vm5698_vm14 = vmand %vm1957_vm12, %vm1967_vm13 }
 0x1bf   : > { %v2683_v15 = vmul.f32 %v5271_v63, %v5631_v22  ;;  %v2804_v34 = vmul.f32 %v5276_v52, %v5629_v48  ;;  %v2805_v21 = vmul.f32 %v5276_v52, %v5631_v22  ;;  %v2093_v13 = vmul.f32 %v5194_v6, %v5631_v22 }
 0x1c0   : > { %v5650_v41 = vmul.f32 %v5181_v40, %v5631_v22  ;;  %v1935_v51 = vmax.f32 %v1915_v62, 0.0  ;;  %v2662_v17 = vadd.f32 %v2646_v45, %v2627_v42  ;;  %v2734_v35 = vrot.slane %v2682_v38, 1 }
 0x1c1   : > { %v2735_v23 = vrot.slane %v2683_v15, 1  ;;  %v2856_v2 = vrot.slane %v2804_v34, 2  ;;  %v2857_v58 = vrot.slane %v2805_v21, 2  ;;  %v5655_v50 = vmul.f32 %v5188_v7, %v5631_v22 }
 0x1c2   : > { %v6359_v57 = vrot.slane %v5650_v41, 1  ;;  %v1995_v47 = vsel %vm5542_vm11, %v1935_v51, 0.0  ;;  %v2628_v11 = vadd.f32 %v2581_v43, %v2506_v59  ;;  %v2647_v9 = vmul.f32 %v5266_v8, %v5631_v22  ;;  %3322 = vmatmul.msk.f32.gmra.mxu1 %vm1998_vm8, %v2959_v10  ;;  %v3429_v10 = vld [vmem:[%s6298_s5] ss:$0 sm:$0xff] }
 0x1c3   : > { %v2736_v3 = vsel %vm743_vm3, %v2734_v35, %v2735_v23  ;;  %2047 = vst.msk [vmem:[#allocation3 + $0xc9] sm:$0xff] %vm1998_vm8, %v1995_v47  ;;  %v2858_v62 = vsel %vm896_vm4, %v2856_v2, %v2857_v58  ;;  %v6437_v45 = vrot.slane %v5345_v54, 1  ;;  %v6358_v38 = vrot.slane %v5655_v50, 2 }
 0x1c4   : > { %v2784_v42 = vadd.f32 %v2736_v3, %v2662_v17  ;;  %v1864_v15 = vpop.f32.mrf.mxu3  ;;  %v2663_v59 = vadd.f32 %v2647_v9, %v2628_v11  ;;  %v2738_v34 = vsel %vm743_vm3, %v2735_v23, %v2737_v0  ;;  %v2860_v21 = vsel %vm896_vm4, %v2857_v58, %v2859_v33  ;;  %v3430_v58 = vld [vmem:[%s6299_s6] ss:$0 sm:$0xff] }
 0x1c5   : > { %v2190_v32 = vsel %vm743_vm3, %v6359_v57, %v6437_v45  ;;  %v1892_v51 = vmul.f32 %v3429_v10, %v1864_v15  ;;  %v6438_v54 = vrot.slane %v5442_v36, 2  ;;  %v2314_v33 = vrot.slane %v5617_v16, 2 }
 0x1c6   : > { %v2231_v43 = vadd.f32 %v2190_v32, %v2093_v13  ;;  %v2906_v17 = vadd.f32 %v2858_v62, %v2784_v42  ;;  %v2193_v13 = vsel %vm743_vm3, %v2191_v46, %v2192_v26  ;;  %v2785_v0 = vadd.f32 %v2738_v34, %v2663_v59  ;;  %v5709_v32 = vld [vmem:[#allocation3 + $0xa8] sm:$0xff]  ;;  %v5714_v59 = vld [vmem:[#allocation3 + $0xb0] sm:$0xff] }
 0x1c7   : > { %v2312_v35 = vsel %vm896_vm4, %v6358_v38, %v6438_v54  ;;  %v2232_v23 = vadd.f32 %v2193_v13, %v2094_v25  ;;  %v1916_v47 = vadd.f32 %v3430_v58, %v1892_v51  ;;  %v5691_v3 = vmul.f32 %v5215_v1, %v5463_v18 }
 0x1c8   : > { %v2353_v2 = vadd.f32 %v2312_v35, %v2231_v43  ;;  %v2925_v36 = vmul.f32 %v5365_v30, %v2906_v17  ;;  %v2470_v11 = vrot.slane %v5625_v27, 1  ;;  %v2907_v9 = vadd.f32 %v2860_v21, %v2785_v0 }
 0x1c9   : > { %v2315_v42 = vsel %vm896_vm4, %v2313_v24, %v2314_v33  ;;  %v2534_v62 = vmul.f32 %v5224_v44, %v5597_v55  ;;  %v1936_v45 = vmax.f32 %v1916_v47, 0.0  ;;  %v2471_v15 = vrot.slane %v5691_v3, 1 }
 0x1ca   : > { %v2388_v46 = vadd.f32 %v5461_v37, %v2353_v2  ;;  %v2944_v27 = vadd.f32 %v5390_v20, %v2925_v36  ;;  %v2354_v14 = vadd.f32 %v2315_v42, %v2232_v23  ;;  %v2926_v37 = vmul.f32 %v5365_v30, %v2907_v9 }
 0x1cb   : > { %v5718_v24 = vmul.f32 %v5224_v44, %v5463_v18  ;;  %v2592_v34 = vrot.slane %v2534_v62, 2  ;;  %v1996_v21 = vsel %vm5698_vm14, %v1936_v45, 0.0  ;;  %v2472_v54 = vsel %vm743_vm3, %v2470_v11, %v2471_v15 }
 0x1cc   : > { %v2510_v43 = vadd.f32 %v5490_v61, %v2388_v46  ;;  %v2960_v51 = vmax.f32 %v2944_v27, 0.0  ;;  %v2389_v17 = vadd.f32 %v5621_v5, %v2354_v14  ;;  %2048 = vst.msk [vmem:[#allocation3 + $0xd9] sm:$0xff] %vm1998_vm8, %v1996_v21  ;;  %v2945_v35 = vadd.f32 %v5390_v20, %v2926_v37  ;;  %v6441_v14 = vld [vmem:[#allocation14_spill] sm:$0xff] }
 0x1cd   : > { %v2593_v13 = vrot.slane %v5718_v24, 2  ;;  %v2652_v2 = vmul.f32 %v5266_v8, %v5709_v32  ;;  %v2691_v5 = vmul.f32 %v5271_v63, %v5709_v32  ;;  %v5737_v23 = vmul.f32 %v5271_v63, %v5714_v59 }
 0x1ce   : > { %v2632_v61 = vadd.f32 %v5504_v19, %v2510_v43  ;;  %3323 = vmatmul.msk.f32.gmra.mxu1 %vm1998_vm8, %v2960_v51  ;;  %v2511_v0 = vadd.f32 %v2472_v54, %v2389_v17  ;;  %v2813_v19 = vmul.f32 %v5276_v52, %v5709_v32  ;;  %v2961_v36 = vmax.f32 %v2945_v35, 0.0 }
 0x1cf   : > { %v2594_v11 = vsel %vm896_vm4, %v2592_v34, %v2593_v13  ;;  %v5747_v46 = vmul.f32 %v5276_v52, %v5714_v59  ;;  %v2749_v42 = vrot.slane %v2691_v5, 1  ;;  %v2750_v62 = vrot.slane %v5737_v23, 1 }
 0x1d0   : > { %v2667_v47 = vadd.f32 %v5494_v53, %v2632_v61  ;;  %v2633_v9 = vadd.f32 %v2594_v11, %v2511_v0  ;;  %v2871_v45 = vrot.slane %v2813_v19, 2  ;;  %v1867_v27 = vpop.f32.mrf.mxu3  ;;  %v6442_v53 = vld [vmem:[#allocation8_spill] sm:$0xff]  ;;  %v5761_v61 = vmul.f32 %v5181_v40, %v5510_v60 }
 0x1d1   : > { %v6364_v37 = vrot.slane %v5747_v46, 2  ;;  %v2090_v21 = vmul.f32 %v5194_v6, %v6442_v53  ;;  %v2127_v34 = vmul.f32 %v5181_v40, %v6442_v53  ;;  %v1893_v51 = vmul.f32 %v3429_v10, %v1867_v27 }
 0x1d2   : > { %v2789_v43 = vadd.f32 %v6441_v14, %v2667_v47  ;;  %v2668_v17 = vadd.f32 %v2652_v2, %v2633_v9  ;;  %v2751_v54 = vsel %vm743_vm3, %v2749_v42, %v2750_v62  ;;  %v2249_v19 = vmul.f32 %v5188_v7, %v6442_v53 }
 0x1d3   : > { %v2873_v0 = vsel %vm896_vm4, %v2871_v45, %v6364_v37  ;;  %v2181_v5 = vrot.slane %v2127_v34, 1  ;;  %v1917_v10 = vadd.f32 %v3430_v58, %v1893_v51  ;;  %v6363_v47 = vrot.slane %v5761_v61, 1 }
 0x1d4   : > { %v2911_v35 = vadd.f32 %v5565_v39, %v2789_v43  ;;  %v2790_v2 = vadd.f32 %v2751_v54, %v2668_v17  ;;  %v5772_v11 = vmul.f32 %v5188_v7, %v5510_v60  ;;  %v2303_v42 = vrot.slane %v2249_v19, 2 }
 0x1d5   : > { %v2369_v39 = vmul.f32 %v5208_v4, %v5629_v48  ;;  %v2406_v45 = vmul.f32 %v5215_v1, %v5629_v48  ;;  %v1937_v27 = vmax.f32 %v1917_v10, 0.0  ;;  %v2183_v14 = vsel %vm743_vm3, %v2181_v5, %v6363_v47 }
 0x1d6   : > { %v2930_v9 = vmul.f32 %v5365_v30, %v2911_v35  ;;  %3324 = vmatmul.msk.f32.gmra.mxu1 %vm1998_vm8, %v2961_v36  ;;  %v2912_v58 = vadd.f32 %v2873_v0, %v2790_v2  ;;  %v6362_v43 = vrot.slane %v5772_v11, 2  ;;  %v2228_v34 = vadd.f32 %v2183_v14, %v2090_v21 }
 0x1d7   : > { %v5787_v51 = vmul.f32 %v5215_v1, %v5631_v22  ;;  %v2460_v17 = vrot.slane %v2406_v45, 1  ;;  %v1997_v54 = vsel %vm5698_vm14, %v1937_v27, 0.0  ;;  %v2528_v0 = vmul.f32 %v5224_v44, %v5629_v48 }
 0x1d8   : > { %v2949_v53 = vadd.f32 %v5390_v20, %v2930_v9  ;;  %v2931_v36 = vmul.f32 %v5365_v30, %v2912_v58  ;;  %v2305_v35 = vsel %vm896_vm4, %v2303_v42, %v6362_v43  ;;  %2049 = vst.msk [vmem:[#allocation3 + $0xe1] sm:$0xff] %vm1998_vm8, %v1997_v54  ;;  %v5801_v10 = vmul.f32 %v5224_v44, %v5631_v22 }
 0x1d9   : > { %v2350_v5 = vadd.f32 %v2305_v35, %v2228_v34  ;;  %v6360_v19 = vrot.slane %v5787_v51, 1  ;;  %v2582_v2 = vrot.slane %v2528_v0, 2  ;;  %v2685_v9 = vmul.f32 %v5271_v63, %v5589_v49 }
 0x1da   : > { %v2965_v21 = vmax.f32 %v2949_v53, 0.0  ;;  %v2950_v25 = vadd.f32 %v5390_v20, %v2931_v36  ;;  %v6361_v27 = vrot.slane %v5801_v10, 2  ;;  %v5813_v58 = vmul.f32 %v5271_v63, %v5423_v31 }
 0x1db   : > { %v2385_v42 = vadd.f32 %v2369_v39, %v2350_v5  ;;  %v2462_v45 = vsel %vm743_vm3, %v2460_v17, %v6360_v19  ;;  %v2648_v14 = vmul.f32 %v5266_v8, %v5589_v49  ;;  %v2739_v53 = vrot.slane %v2685_v9, 1  ;;  %v5828_v5 = vld [vmem:[#allocation3 + $0xb8] sm:$0x3] }
 0x1dc   : > { %3328 = vmatmul.msk.f32.vlgmr.msrb.gmra.mxu3 %vm1998_vm8, %v2965_v21  ;;  %v2807_v34 = vmul.f32 %v5276_v52, %v5589_v49  ;;  %v5821_v39 = vmul.f32 %v5276_v52, %v5423_v31  ;;  %v2966_v54 = vmax.f32 %v2950_v25, 0.0  ;;  %v2584_v17 = vsel %vm896_vm4, %v2582_v2, %v6361_v27  ;;  %v6443_v9 = vld [vmem:[#allocation9_spill] sm:$0xff]  ;;  %v6444_v2 = vld [vmem:[#allocation11_spill] sm:$0xff] }
 0x1dd   : > { %v2507_v36 = vadd.f32 %v2462_v45, %v2385_v42  ;;  %v2740_v35 = vrot.slane %v5813_v58, 1  ;;  %v2135_v38 = vmul.f32 %v5181_v40, %v6443_v9  ;;  %v2257_v57 = vmul.f32 %v5188_v7, %v6443_v9 }
 0x1de   : > { %v2861_v0 = vrot.slane %v2807_v34, 2  ;;  %v6365_v21 = vrot.slane %v5821_v39, 2  ;;  %v2095_v42 = vmul.f32 %v5194_v6, %v5423_v31  ;;  %v2414_v45 = vmul.f32 %v5215_v1, %v6444_v2 }
 0x1df   : > { %v2629_v19 = vadd.f32 %v2584_v17, %v2507_v36  ;;  %v2741_v25 = vsel %vm743_vm3, %v2739_v53, %v2740_v35  ;;  %v2194_v58 = vrot.slane %v2135_v38, 1  ;;  %v2316_v34 = vrot.slane %v2257_v57, 2 }
 0x1e0   : > { %v2374_v27 = vmul.f32 %v5208_v4, %v5463_v18  ;;  %v2536_v43 = vmul.f32 %v5224_v44, %v6444_v2  ;;  %v2863_v36 = vsel %vm896_vm4, %v2861_v0, %v6365_v21  ;;  %v2473_v53 = vrot.slane %v2414_v45, 1 }
 0x1e1   : > { %v2664_v47 = vadd.f32 %v2648_v14, %v2629_v19  ;;  %v2693_v17 = vmul.f32 %v5271_v63, %v5828_v5  ;;  %v2195_v38 = vsel %vm743_vm3, %v2192_v26, %v2194_v58  ;;  %v2317_v57 = vsel %vm896_vm4, %v2314_v33, %v2316_v34 }
 0x1e2   : > { %v2595_v37 = vrot.slane %v2536_v43, 2  ;;  %v2815_v19 = vmul.f32 %v5276_v52, %v5828_v5  ;;  %v2233_v0 = vadd.f32 %v2195_v38, %v2095_v42  ;;  %v2653_v45 = vmul.f32 %v5266_v8, %v5714_v59 }
 0x1e3   : > { %v2786_v14 = vadd.f32 %v2741_v25, %v2664_v47  ;;  %v2752_v21 = vrot.slane %v2693_v17, 1  ;;  %v2474_v29 = vsel %vm743_vm3, %v2471_v15, %v2473_v53  ;;  %v2129_v33 = vmul.f32 %v5181_v40, %v5512_v56 }
 0x1e4   : > { %3329 = vmatmul.msk.f32.gmra.mxu3 %vm1998_vm8, %v2966_v54  ;;  %v2596_v16 = vsel %vm896_vm4, %v2593_v13, %v2595_v37  ;;  %v2874_v26 = vrot.slane %v2815_v19, 2  ;;  %v2355_v54 = vadd.f32 %v2317_v57, %v2233_v0  ;;  %v2091_v47 = vmul.f32 %v5194_v6, %v5510_v60  ;;  %v5907_v19 = vld [vmem:[%s6300_s7] ss:$0 sm:$0xff] }
 0x1e5   : > { %v2908_v43 = vadd.f32 %v2863_v36, %v2786_v14  ;;  %v2251_v25 = vmul.f32 %v5188_v7, %v5512_v56  ;;  %v2753_v3 = vsel %vm743_vm3, %v2750_v62, %v2752_v21  ;;  %v6445_v15 = vrot.slane %v5747_v46, 2 }
 0x1e6   : > { %v2184_v13 = vrot.slane %v2129_v33, 1  ;;  %v2408_v40 = vmul.f32 %v5215_v1, %v5315_v12  ;;  %v2390_v42 = vadd.f32 %v2374_v27, %v2355_v54  ;;  %v2530_v6 = vmul.f32 %v5224_v44, %v5315_v12 }
 0x1e7   : > { %v2875_v24 = vsel %vm896_vm4, %v6445_v15, %v2874_v26  ;;  %v2927_v37 = vmul.f32 %v5365_v30, %v2908_v43  ;;  %v2306_v58 = vrot.slane %v2251_v25, 2  ;;  %v6446_v7 = vrot.slane %v5761_v61, 1 }
 0x1e8   : > { %v2370_v56 = vmul.f32 %v5208_v4, %v5631_v22  ;;  %v2463_v23 = vrot.slane %v2408_v40, 1  ;;  %v2687_v46 = vmul.f32 %v5271_v63, %v6443_v9  ;;  %v2512_v62 = vadd.f32 %v2474_v29, %v2390_v42  ;;  %v5926_v29 = vld [vmem:[%s6300_s7 + $0x2] ss:$0 sm:$0xff] }
 0x1e9   : > { %v2185_v60 = vsel %vm743_vm3, %v6446_v7, %v2184_v13  ;;  %v2946_v1 = vadd.f32 %v5390_v20, %v2927_v37  ;;  %v2649_v27 = vmul.f32 %v5266_v8, %v5423_v31  ;;  %v6447_v44 = vrot.slane %v5772_v11, 2  ;;  %v5946_v37 = vld [vmem:[%s6300_s7 + $0x5] ss:$0 sm:$0xff] }
 0x1ea   : > { %v2229_v21 = vadd.f32 %v2185_v60, %v2091_v47  ;;  %v2585_v61 = vrot.slane %v2530_v6, 2  ;;  %v2742_v34 = vrot.slane %v2687_v46, 1  ;;  %v2809_v4 = vmul.f32 %v5276_v52, %v6443_v9 }
 0x1eb   : > { %v2307_v12 = vsel %vm896_vm4, %v6447_v44, %v2306_v58  ;;  %v2962_v22 = vmax.f32 %v2946_v1, 0.0  ;;  %v2634_v36 = vadd.f32 %v2596_v16, %v2512_v62  ;;  %v6448_v17 = vrot.slane %v5787_v51, 1  ;;  %v5914_v51 = vld [vmem:[%s6300_s7 + $0x1] ss:$0 sm:$0xff]  ;;  %v5970_v1 = vld [vmem:[#allocation3 + $0xc8] sm:$0xff] }
 0x1ec   : > { %v2351_v53 = vadd.f32 %v2307_v12, %v2229_v21  ;;  %v6449_v57 = vrot.slane %v5801_v10, 2  ;;  %v2743_v11 = vsel %vm743_vm3, %v2740_v35, %v2742_v34  ;;  %v2096_v9 = vmul.f32 %v5907_v19, %v5597_v55 }
 0x1ed   : > { %v2464_v38 = vsel %vm743_vm3, %v6448_v17, %v2463_v23  ;;  %v2136_v10 = vmul.f32 %v5914_v51, %v5597_v55  ;;  %3325 = vmatmul.msk.f32.gmra.mxu1 %vm1998_vm8, %v2962_v22  ;;  %v2669_v14 = vadd.f32 %v2653_v45, %v2634_v36  ;;  %v5921_v0 = vmul.f32 %v5914_v51, %v5463_v18  ;;  %v5937_v45 = vld [vmem:[%s6300_s7 + $0x4] ss:$0 sm:$0xff] }
 0x1ee   : > { %v2586_v31 = vsel %vm896_vm4, %v6449_v57, %v2585_v61  ;;  %v2386_v35 = vadd.f32 %v2370_v56, %v2351_v53  ;;  %v2258_v16 = vmul.f32 %v5926_v29, %v5597_v55  ;;  %v2864_v26 = vrot.slane %v2809_v4, 2  ;;  %v5961_v56 = vld [vmem:[#allocation3 + $0xc0] sm:$0xff] }
 0x1ef   : > { %v2196_v33 = vrot.slane %v2136_v10, 1  ;;  %v5932_v43 = vmul.f32 %v5926_v29, %v5463_v18  ;;  %v2375_v54 = vmul.f32 %v5937_v45, %v5709_v32  ;;  %v2791_v47 = vadd.f32 %v2753_v3, %v2669_v14  ;;  %v5957_v3 = vld [vmem:[%s6300_s7 + $0x6] ss:$0 sm:$0xff] }
 0x1f0   : > { %v2508_v25 = vadd.f32 %v2464_v38, %v2386_v35  ;;  %v2197_v15 = vrot.slane %v5921_v0, 1  ;;  %v2318_v13 = vrot.slane %v2258_v16, 2  ;;  %v2415_v42 = vmul.f32 %v5946_v37, %v5709_v32 }
 0x1f1   : > { %v2319_v40 = vrot.slane %v5932_v43, 2  ;;  %v5952_v58 = vmul.f32 %v5946_v37, %v5714_v59  ;;  %v2537_v6 = vmul.f32 %v5957_v3, %v5709_v32  ;;  %v2913_v7 = vadd.f32 %v2875_v24, %v2791_v47 }
 0x1f2   : > { %v2630_v60 = vadd.f32 %v2586_v31, %v2508_v25  ;;  %v2198_v23 = vsel %vm743_vm3, %v2196_v33, %v2197_v15  ;;  %v5968_v46 = vmul.f32 %v5957_v3, %v5714_v59  ;;  %v2475_v44 = vrot.slane %v2415_v42, 1 }
 0x1f3   : > { %v2234_v62 = vadd.f32 %v2198_v23, %v2096_v9  ;;  %v2320_v21 = vsel %vm896_vm4, %v2318_v13, %v2319_v40  ;;  %v2476_v24 = vrot.slane %v5952_v58, 1  ;;  %v2932_v12 = vmul.f32 %v5365_v30, %v2913_v7 }
 0x1f4   : > { %v2665_v61 = vadd.f32 %v2649_v27, %v2630_v60  ;;  %v2597_v34 = vrot.slane %v2537_v6, 2  ;;  %v2598_v4 = vrot.slane %v5968_v46, 2  ;;  %v6450_v22 = vrot.slane %v5821_v39, 2 }
 0x1f5   : > { %v2356_v53 = vadd.f32 %v2320_v21, %v2234_v62  ;;  %v2477_v17 = vsel %vm743_vm3, %v2475_v44, %v2476_v24  ;;  %v2694_v38 = vmul.f32 %v5271_v63, %v5961_v56  ;;  %v2951_v57 = vadd.f32 %v5390_v20, %v2932_v12 }
 0x1f6   : > { %v2865_v36 = vsel %vm896_vm4, %v6450_v22, %v2864_v26  ;;  %v2787_v31 = vadd.f32 %v2743_v11, %v2665_v61  ;;  %v2654_v27 = vmul.f32 %v5266_v8, %v5961_v56  ;;  %v5991_v9 = vmul.f32 %v5271_v63, %v5970_v1 }
 0x1f7   : > { %v2391_v39 = vadd.f32 %v2375_v54, %v2356_v53  ;;  %v2754_v10 = vrot.slane %v2694_v38, 1  ;;  %v2816_v14 = vmul.f32 %v5276_v52, %v5961_v56  ;;  %v5997_v35 = vmul.f32 %v5276_v52, %v5970_v1 }
 0x1f8   : > { %v2967_v16 = vmax.f32 %v2951_v57, 0.0  ;;  %v2909_v26 = vadd.f32 %v2865_v36, %v2787_v31  ;;  %v2599_v11 = vsel %vm896_vm4, %v2597_v34, %v2598_v4  ;;  %v2755_v8 = vrot.slane %v5991_v9, 1  ;;  %v6031_v36 = vld [vmem:[%s6300_s7 + $0x9] ss:$0 sm:$0xff] }
 0x1f9   : > { %v2513_v33 = vadd.f32 %v2477_v17, %v2391_v39  ;;  %v2876_v63 = vrot.slane %v2816_v14, 2  ;;  %v2877_v54 = vrot.slane %v5997_v35, 2  ;;  %v2130_v47 = vmul.f32 %v5914_v51, %v5629_v48  ;;  %v6048_v14 = vld [vmem:[%s6300_s7 + $0xa] ss:$0 sm:$0xff] }
 0x1fa   : > { %3330 = vmatmul.msk.f32.gmra.mxu3 %vm1998_vm8, %v2967_v16  ;;  %v2928_v52 = vmul.f32 %v5365_v30, %v2909_v26  ;;  %v2756_v25 = vsel %vm743_vm3, %v2754_v10, %v2755_v8  ;;  %v2092_v13 = vmul.f32 %v5907_v19, %v5629_v48  ;;  %v2252_v42 = vmul.f32 %v5926_v29, %v5629_v48 }
 0x1fb   : > { %v2635_v6 = vadd.f32 %v2599_v11, %v2513_v33  ;;  %v2186_v7 = vrot.slane %v2130_v47, 1  ;;  %v2371_v60 = vmul.f32 %v5937_v45, %v5589_v49  ;;  %v2409_v23 = vmul.f32 %v5946_v37, %v5589_v49  ;;  %v6453_v11 = vld [vmem:[#allocation10_spill] sm:$0xff]  ;;  %v6455_v47 = vld [vmem:[#allocation12_spill] sm:$0xff] }
 0x1fc   : > { %v2947_v62 = vadd.f32 %v5390_v20, %v2928_v52  ;;  %v2878_v21 = vsel %vm896_vm4, %v2876_v63, %v2877_v54  ;;  %v2308_v44 = vrot.slane %v2252_v42, 2  ;;  %v2531_v12 = vmul.f32 %v5957_v3, %v5589_v49  ;;  %v6038_v49 = vld [vmem:[%s6300_s7 + $0x8] ss:$0 sm:$0xff] }
 0x1fd   : > { %v2670_v61 = vadd.f32 %v2654_v27, %v2635_v6  ;;  %v6451_v48 = vrot.slane %v5650_v41, 1  ;;  %v2465_v22 = vrot.slane %v2409_v23, 1  ;;  %v2688_v53 = vmul.f32 %v6031_v36, %v5597_v55  ;;  %v6457_v23 = vld [vmem:[#allocation13_spill] sm:$0xff] }
 0x1fe   : > { %v2963_v17 = vmax.f32 %v2947_v62, 0.0  ;;  %v2587_v57 = vrot.slane %v2531_v12, 2  ;;  %v2650_v41 = vmul.f32 %v6038_v49, %v5597_v55  ;;  %v6452_v27 = vrot.slane %v5655_v50, 2 }
 0x1ff   : > { %v2188_v34 = vsel %vm743_vm3, %v2186_v7, %v6451_v48  ;;  %v2792_v31 = vadd.f32 %v2756_v25, %v2670_v61  ;;  %v2744_v10 = vrot.slane %v2688_v53, 1  ;;  %v2810_v16 = vmul.f32 %v6048_v14, %v5597_v55 }
 0x200   : > { %v2230_v38 = vadd.f32 %v2188_v34, %v2092_v13  ;;  %v2310_v39 = vsel %vm896_vm4, %v2308_v44, %v6452_v27  ;;  %3326 = vmatmul.msk.f32.gmra.mxu1 %vm1998_vm8, %v2963_v17  ;;  %v6454_v33 = vrot.slane %v6453_v11, 1  ;;  %v6456_v50 = vrot.slane %v6455_v47, 2  ;;  %v6071_v34 = vld [vmem:[#allocation3 + $0xd0] sm:$0x3] }
 0x201   : > { %v2138_v25 = vmul.f32 %v5914_v51, %v6444_v2  ;;  %v2914_v13 = vadd.f32 %v2878_v21, %v2792_v31  ;;  %v2866_v42 = vrot.slane %v2810_v16, 2  ;;  %v2097_v6 = vmul.f32 %v5907_v19, %v5463_v18 }
 0x202   : > { %v2352_v26 = vadd.f32 %v2310_v39, %v2230_v38  ;;  %v2467_v63 = vsel %vm743_vm3, %v2465_v22, %v6454_v33  ;;  %v2589_v52 = vsel %vm896_vm4, %v2587_v57, %v6456_v50  ;;  %v2260_v55 = vmul.f32 %v5926_v29, %v6444_v2 }
 0x203   : > { %v6458_v62 = vrot.slane %v6457_v23, 1  ;;  %v2199_v12 = vrot.slane %v2138_v25, 1  ;;  %v2417_v61 = vmul.f32 %v5946_v37, %v5828_v5  ;;  %v2933_v48 = vmul.f32 %v5365_v30, %v2914_v13 }
 0x204   : > { %v2387_v7 = vadd.f32 %v2371_v60, %v2352_v26  ;;  %v2321_v21 = vrot.slane %v2260_v55, 2  ;;  %v2376_v18 = vmul.f32 %v5937_v45, %v5714_v59  ;;  %v2539_v2 = vmul.f32 %v5957_v3, %v5828_v5 }
 0x205   : > { %v2746_v44 = vsel %vm743_vm3, %v2744_v10, %v6458_v62  ;;  %v6459_v22 = vrot.slane %v5485_v28, 2  ;;  %v2200_v17 = vsel %vm743_vm3, %v2197_v15, %v2199_v12  ;;  %v2478_v38 = vrot.slane %v2417_v61, 1  ;;  %v2077_v62 = vld [vmem:[#allocation3 + $0xd8] sm:$0xff] }
 0x206   : > { %v2509_v60 = vadd.f32 %v2467_v63, %v2387_v7  ;;  %v2952_v57 = vadd.f32 %v5390_v20, %v2933_v48  ;;  %v2235_v31 = vadd.f32 %v2200_v17, %v2097_v6  ;;  %v2322_v27 = vsel %vm896_vm4, %v2319_v40, %v2321_v21  ;;  %v6132_v21 = vld [vmem:[#allocation3 + $0xe0] sm:$0xff] }
 0x207   : > { %v2868_v53 = vsel %vm896_vm4, %v2866_v42, %v6459_v22  ;;  %v2600_v39 = vrot.slane %v2539_v2, 2  ;;  %v2655_v16 = vmul.f32 %v6038_v49, %v5970_v1  ;;  %v2696_v28 = vmul.f32 %v6031_v36, %v6071_v34 }
 0x208   : > { %v2631_v10 = vadd.f32 %v2589_v52, %v2509_v60  ;;  %v2818_v0 = vmul.f32 %v6048_v14, %v6071_v34  ;;  %v2968_v15 = vmax.f32 %v2952_v57, 0.0  ;;  %v2357_v26 = vadd.f32 %v2322_v27, %v2235_v31 }
 0x209   : > { %v2479_v11 = vsel %vm743_vm3, %v2476_v24, %v2478_v38  ;;  %v2601_v43 = vsel %vm896_vm4, %v2598_v4, %v2600_v39  ;;  %v2757_v33 = vrot.slane %v2696_v28, 1  ;;  %v2098_v63 = vmul.f32 %v5907_v19, %v5709_v32 }
 0x20a   : > { %v2666_v40 = vadd.f32 %v2650_v41, %v2631_v10  ;;  %v2139_v47 = vmul.f32 %v5914_v51, %v5709_v32  ;;  %3331 = vmatmul.msk.f32.gmra.mxu3 %vm1998_vm8, %v2968_v15  ;;  %v2392_v50 = vadd.f32 %v2376_v18, %v2357_v26  ;;  %v6106_v58 = vmul.f32 %v5914_v51, %v5714_v59 }
 0x20b   : > { %v2261_v46 = vmul.f32 %v5926_v29, %v5709_v32  ;;  %v6112_v24 = vmul.f32 %v5926_v29, %v5714_v59  ;;  %v2758_v41 = vsel %vm743_vm3, %v2755_v8, %v2757_v33  ;;  %v2879_v52 = vrot.slane %v2818_v0, 2 }
 0x20c   : > { %v2788_v4 = vadd.f32 %v2746_v44, %v2666_v40  ;;  %v2201_v25 = vrot.slane %v2139_v47, 1  ;;  %v2514_v13 = vadd.f32 %v2479_v11, %v2392_v50  ;;  %v2202_v42 = vrot.slane %v6106_v58, 1 }
 0x20d   : > { %v2323_v6 = vrot.slane %v2261_v46, 2  ;;  %v2324_v55 = vrot.slane %v6112_v24, 2  ;;  %v2377_v32 = vmul.f32 %v5937_v45, %v5961_v56  ;;  %v2418_v23 = vmul.f32 %v5946_v37, %v5961_v56 }
 0x20e   : > { %v2910_v7 = vadd.f32 %v2868_v53, %v2788_v4  ;;  %v6125_v9 = vmul.f32 %v5946_v37, %v5970_v1  ;;  %v2636_v8 = vadd.f32 %v2601_v43, %v2514_v13  ;;  %v2203_v44 = vsel %vm743_vm3, %v2201_v25, %v2202_v42  ;;  %v2079_v13 = vld [vmem:[#allocation3 + $0xe8] sm:$0x3] }
 0x20f   : > { %v2325_v12 = vsel %vm896_vm4, %v2323_v6, %v2324_v55  ;;  %v2540_v61 = vmul.f32 %v5957_v3, %v5961_v56  ;;  %v2236_v18 = vadd.f32 %v2203_v44, %v2098_v63  ;;  %v2480_v2 = vrot.slane %v2418_v23, 1  ;;  %v3440_v63 = vld [vmem:[%s6301_s8] ss:$0 sm:$0xff] }
 0x210   : > { %v2929_v48 = vmul.f32 %v5365_v30, %v2910_v7  ;;  %v2481_v60 = vrot.slane %v6125_v9, 1  ;;  %v2671_v22 = vadd.f32 %v2655_v16, %v2636_v8  ;;  %v2880_v53 = vsel %vm896_vm4, %v2877_v54, %v2879_v52 }
 0x211   : > { %v2541_v17 = vmul.f32 %v5957_v3, %v5970_v1  ;;  %v2602_v38 = vrot.slane %v2540_v61, 2  ;;  %v2358_v56 = vadd.f32 %v2325_v12, %v2236_v18  ;;  %v2697_v31 = vmul.f32 %v6031_v36, %v2077_v62 }
 0x212   : > { %v2948_v57 = vadd.f32 %v5390_v20, %v2929_v48  ;;  %v2482_v30 = vsel %vm743_vm3, %v2480_v2, %v2481_v60  ;;  %v2793_v27 = vadd.f32 %v2758_v41, %v2671_v22  ;;  %v2698_v10 = vmul.f32 %v6031_v36, %v6132_v21 }
 0x213   : > { %v2603_v39 = vrot.slane %v2541_v17, 2  ;;  %v2819_v35 = vmul.f32 %v6048_v14, %v2077_v62  ;;  %v2393_v54 = vadd.f32 %v2377_v32, %v2358_v56  ;;  %v2820_v28 = vmul.f32 %v6048_v14, %v6132_v21 }
 0x214   : > { %v2964_v16 = vmax.f32 %v2948_v57, 0.0  ;;  %v2915_v0 = vadd.f32 %v2880_v53, %v2793_v27  ;;  %v2759_v15 = vrot.slane %v2697_v31, 1  ;;  %v2760_v26 = vrot.slane %v2698_v10, 1 }
 0x215   : > { %v2604_v20 = vsel %vm896_vm4, %v2602_v38, %v2603_v39  ;;  %v2515_v11 = vadd.f32 %v2482_v30, %v2393_v54  ;;  %v2656_v43 = vmul.f32 %v6038_v49, %v2077_v62  ;;  %v2881_v40 = vrot.slane %v2819_v35, 2  ;;  %v3039_v53 = vpop.f32.mrf.mxu1 }
 0x216   : > { %3327 = vmatmul.msk.f32.gmra.mxu1 %vm1998_vm8, %v2964_v16  ;;  %v2141_v33 = vmul.f32 %v5914_v51, %v5828_v5  ;;  %v2934_v47 = vmul.f32 %v3440_v63, %v2915_v0  ;;  %v2882_v50 = vrot.slane %v2820_v28, 2  ;;  %v2099_v58 = vmul.f32 %v5907_v19, %v5714_v59  ;;  %v3441_v51 = vld [vmem:[%s6302_s9] ss:$0 sm:$0xff]  ;;  %v3130_v28 = vld [vmem:[%s6192_s25 + $0x8] sm:$0xff] }
 0x217   : > { %v2263_v46 = vmul.f32 %v5926_v29, %v5828_v5  ;;  %v2637_v24 = vadd.f32 %v2604_v20, %v2515_v11  ;;  %v2420_v41 = vmul.f32 %v5946_v37, %v6071_v34  ;;  %v2761_v25 = vsel %vm743_vm3, %v2759_v15, %v2760_v26 }
 0x218   : > { %v2204_v4 = vrot.slane %v2141_v33, 1  ;;  %v2953_v52 = vadd.f32 %v3441_v51, %v2934_v47  ;;  %v2542_v59 = vmul.f32 %v5957_v3, %v6071_v34  ;;  %v2378_v29 = vmul.f32 %v5937_v45, %v5970_v1 }
 0x219   : > { %v2326_v6 = vrot.slane %v2263_v46, 2  ;;  %v2672_v19 = vadd.f32 %v2656_v43, %v2637_v24  ;;  %v2483_v37 = vrot.slane %v2420_v41, 1  ;;  %v2883_v32 = vsel %vm896_vm4, %v2881_v40, %v2882_v50  ;;  %v3131_v43 = vld [vmem:[%s6192_s25 + $0x10] sm:$0xff]  ;;  %v3133_v41 = vld [vmem:[%s6192_s25 + $0x20] sm:$0xff] }
 0x21a   : > { %v2205_v5 = vsel %vm743_vm3, %v2202_v42, %v2204_v4  ;;  %v2969_v7 = vmax.f32 %v2953_v52, 0.0  ;;  %v2605_v62 = vrot.slane %v2542_v59, 2  ;;  %v2699_v44 = vmul.f32 %v6031_v36, %v2079_v13 }
 0x21b   : > { %v2237_v23 = vadd.f32 %v2205_v5, %v2099_v58  ;;  %v2327_v9 = vsel %vm896_vm4, %v2324_v55, %v2326_v6  ;;  %v2794_v8 = vadd.f32 %v2761_v25, %v2672_v19  ;;  %v2484_v42 = vsel %vm743_vm3, %v2481_v60, %v2483_v37  ;;  %v6182_v55 = vld [vmem:[%s6304_s11] ss:$0 sm:$0xff]  ;;  %v3134_v6 = vld [vmem:[%s6192_s25 + $0x28] sm:$0xff] }
 0x21c   : > { %3332 = vmatmul.msk.f32.gmra.mxu3 %vm1998_vm8, %v2969_v7  ;;  %v2821_v45 = vmul.f32 %v6048_v14, %v2079_v13  ;;  %v2606_v61 = vsel %vm896_vm4, %v2603_v39, %v2605_v62  ;;  %v2762_v48 = vrot.slane %v2699_v44, 1  ;;  %v2657_v18 = vmul.f32 %v6038_v49, %v6132_v21  ;;  %v6189_v14 = vld [vmem:[%s6305_s12] ss:$0 sm:$0xff]  ;;  %v3138_v37 = vld [vmem:[%s6192_s25 + $0x48] sm:$0xff] }
 0x21d   : > { %v2359_v3 = vadd.f32 %v2327_v9, %v2237_v23  ;;  %v2916_v34 = vadd.f32 %v2883_v32, %v2794_v8  ;;  %v3091_v57 = vmul.f32 %v6182_v55, %v3039_v53  ;;  %v3129_v21 = vld [vmem:[%s6192_s25] sm:$0xff]  ;;  %v3042_v35 = vpop.f32.mrf.mxu1  ;;  %v3139_v8 = vld [vmem:[%s6192_s25 + $0x50] sm:$0xff] }
 0x21e   : > { %v2884_v22 = vrot.slane %v2821_v45, 2  ;;  %v2763_v38 = vsel %vm743_vm3, %v2760_v26, %v2762_v48  ;;  %v3092_v16 = vmul.f32 %v6182_v55, %v3042_v35 }
 0x21f   : > { %v2394_v1 = vadd.f32 %v2378_v29, %v2359_v3  ;;  %v2935_v12 = vmul.f32 %v3440_v63, %v2916_v34  ;;  %v3111_v30 = vadd.f32 %v6189_v14, %v3091_v57 }
 0x220   : > { %v2885_v56 = vsel %vm896_vm4, %v2882_v50, %v2884_v22  ;;  %v3112_v0 = vadd.f32 %v6189_v14, %v3092_v16  ;;  %v3132_v50 = vld [vmem:[%s6192_s25 + $0x18] sm:$0xff] }
 0x221   : > { %v2516_v36 = vadd.f32 %v2484_v42, %v2394_v1  ;;  %v2954_v2 = vadd.f32 %v3441_v51, %v2935_v12  ;;  %v3145_v27 = vadd.f32 %v3129_v21, %v3111_v30  ;;  %v3135_v42 = vld [vmem:[%s6192_s25 + $0x30] sm:$0xff] }
 0x222   : > { %v3146_v15 = vadd.f32 %v3130_v28, %v3112_v0 }
 0x223   : > { %v2638_v60 = vadd.f32 %v2606_v61, %v2516_v36  ;;  %v2970_v17 = vmax.f32 %v2954_v2, 0.0  ;;  %3161 = vst.msk [vmem:[%s3600_s27] sm:$0xff] %vm1728_vm5, %v3145_v27  ;;  %v3140_v2 = vld [vmem:[%s6192_s25 + $0x58] sm:$0xff]  ;;  %v3137_v27 = vld [vmem:[%s6192_s25 + $0x40] sm:$0xff] }
 0x224   : > { %3162 = vst.msk [vmem:[%s3600_s27 + $0x8] sm:$0xff] %vm1728_vm5, %v3146_v15 }
 0x225   : > { %v2673_v49 = vadd.f32 %v2657_v18, %v2638_v60  ;;  %3333 = vmatmul.msk.f32.gmra.mxu3 %vm1998_vm8, %v2970_v17  ;;  %v3136_v18 = vld [vmem:[%s6192_s25 + $0x38] sm:$0xff] }
 0x227   : > { %v2795_v31 = vadd.f32 %v2763_v38, %v2673_v49  ;;  %v3141_v49 = vld [vmem:[%s6192_s25 + $0x60] sm:$0xff] }
 0x229   : > { %v2917_v39 = vadd.f32 %v2885_v56, %v2795_v31 }
 0x22b   : > { %v2936_v10 = vmul.f32 %v3440_v63, %v2917_v39 }
 0x22d   : > { %v2955_v54 = vadd.f32 %v3441_v51, %v2936_v10 }
 0x22f   : > { %v2971_v20 = vmax.f32 %v2955_v54, 0.0  ;;  %v3142_v54 = vld [vmem:[%s6192_s25 + $0x68] sm:$0xff] }
 0x231   : > { %3334 = vmatmul.msk.f32.gmra.mxu3 %vm1998_vm8, %v2971_v20 }
 0x237   : > { %v3045_v26 = vpop.f32.mrf.mxu1 }
 0x238   : > { %v3093_v11 = vmul.f32 %v6182_v55, %v3045_v26  ;;  %v3143_v26 = vld [vmem:[%s6192_s25 + $0x70] sm:$0xff] }
 0x23a   : > { %v3113_v40 = vadd.f32 %v6189_v14, %v3093_v11 }
 0x23c   : > { %v3147_v33 = vadd.f32 %v3131_v43, %v3113_v40 }
 0x23e   : > { %3163 = vst.msk [vmem:[%s3600_s27 + $0x10] sm:$0xff] %vm1728_vm5, %v3147_v33 }
 0x23f   : > { %v3048_v63 = vpop.f32.mrf.mxu1 }
 0x240   : > { %v3094_v47 = vmul.f32 %v6182_v55, %v3048_v63  ;;  %v3144_v63 = vld [vmem:[%s6192_s25 + $0x78] sm:$0xff] }
 0x242   : > { %v3114_v58 = vadd.f32 %v6189_v14, %v3094_v47 }
 0x244   : > { %v3148_v46 = vadd.f32 %v3132_v50, %v3114_v58 }
 0x246   : > { %3164 = vst.msk [vmem:[%s3600_s27 + $0x18] sm:$0xff] %vm1728_vm5, %v3148_v46 }
 0x24b   : > { %v3051_v24 = vpop.f32.mrf.mxu1 }
 0x24c   : > { %v3095_v4 = vmul.f32 %v6182_v55, %v3051_v24 }
 0x24e   : > { %v3115_v51 = vadd.f32 %v6189_v14, %v3095_v4 }
 0x250   : > { %v3149_v52 = vadd.f32 %v3133_v41, %v3115_v51 }
 0x252   : > { %3165 = vst.msk [vmem:[%s3600_s27 + $0x20] sm:$0xff] %vm1728_vm5, %v3149_v52 }
 0x253   : > { %v3054_v25 = vpop.f32.mrf.mxu1 }
 0x254   : > { %v3096_v13 = vmul.f32 %v6182_v55, %v3054_v25 }
 0x256   : > { %v3116_v59 = vadd.f32 %v6189_v14, %v3096_v13 }
 0x258   : > { %v3150_v19 = vadd.f32 %v3134_v6, %v3116_v59 }
 0x25a   : > { %3166 = vst.msk [vmem:[%s3600_s27 + $0x28] sm:$0xff] %vm1728_vm5, %v3150_v19 }
 0x25f   : > { %v3066_v5 = vpop.f32.mrf.mxu3 }
 0x260   : > { %v3100_v29 = vmul.f32 %v6182_v55, %v3066_v5 }
 0x262   : > { %v3120_v7 = vadd.f32 %v6189_v14, %v3100_v29 }
 0x264   : > { %v3154_v32 = vadd.f32 %v3138_v37, %v3120_v7 }
 0x266   : > { %3170 = vst.msk [vmem:[%s3600_s27 + $0x48] sm:$0xff] %vm1728_vm5, %v3154_v32 }
 0x267   : > { %v3069_v23 = vpop.f32.mrf.mxu3 }
 0x268   : > { %v3101_v9 = vmul.f32 %v6182_v55, %v3069_v23 }
 0x26a   : > { %v3121_v62 = vadd.f32 %v6189_v14, %v3101_v9  ;;  %v3057_v44 = vpop.f32.mrf.mxu1 }
 0x26b   : > { %v3097_v3 = vmul.f32 %v6182_v55, %v3057_v44 }
 0x26c   : > { %v3155_v34 = vadd.f32 %v3139_v8, %v3121_v62 }
 0x26d   : > { %v3117_v45 = vadd.f32 %v6189_v14, %v3097_v3 }
 0x26e   : > { %3171 = vst.msk [vmem:[%s3600_s27 + $0x50] sm:$0xff] %vm1728_vm5, %v3155_v34 }
 0x26f   : > { %v3151_v1 = vadd.f32 %v3135_v42, %v3117_v45 }
 0x271   : > { %3167 = vst.msk [vmem:[%s3600_s27 + $0x30] sm:$0xff] %vm1728_vm5, %v3151_v1 }
 0x27d   : > { %v3060_v12 = vpop.f32.mrf.mxu1  ;;  %v3072_v61 = vpop.f32.mrf.mxu3 }
 0x27e   : > { %v3098_v48 = vmul.f32 %v6182_v55, %v3060_v12  ;;  %v3102_v36 = vmul.f32 %v6182_v55, %v3072_v61 }
 0x280   : > { %v3118_v22 = vadd.f32 %v6189_v14, %v3098_v48  ;;  %v3122_v60 = vadd.f32 %v6189_v14, %v3102_v36 }
 0x282   : > { %v3152_v53 = vadd.f32 %v3136_v18, %v3118_v22  ;;  %v3156_v17 = vadd.f32 %v3140_v2, %v3122_v60 }
 0x284   : > { %3168 = vst.msk [vmem:[%s3600_s27 + $0x38] sm:$0xff] %vm1728_vm5, %v3152_v53 }
 0x285   : > { %3172 = vst.msk [vmem:[%s3600_s27 + $0x58] sm:$0xff] %vm1728_vm5, %v3156_v17 }
 0x28d   : > { %v3075_v38 = vpop.f32.mrf.mxu3 }
 0x28e   : > { %v3103_v57 = vmul.f32 %v6182_v55, %v3075_v38 }
 0x290   : > { %v3123_v21 = vadd.f32 %v6189_v14, %v3103_v57 }
 0x292   : > { %v3157_v30 = vadd.f32 %v3141_v49, %v3123_v21 }
 0x293   : > { %v3063_v56 = vpop.f32.mrf.mxu1 }
 0x294   : > { %v3099_v31 = vmul.f32 %v6182_v55, %v3063_v56  ;;  %3173 = vst.msk [vmem:[%s3600_s27 + $0x60] sm:$0xff] %vm1728_vm5, %v3157_v30 }
 0x296   : > { %v3119_v39 = vadd.f32 %v6189_v14, %v3099_v31 }
 0x298   : > { %v3153_v10 = vadd.f32 %v3137_v27, %v3119_v39 }
 0x29a   : > { %3169 = vst.msk [vmem:[%s3600_s27 + $0x40] sm:$0xff] %vm1728_vm5, %v3153_v10 }
 0x29f   : > { %v3078_v35 = vpop.f32.mrf.mxu3 }
 0x2a0   : > { %v3104_v16 = vmul.f32 %v6182_v55, %v3078_v35 }
 0x2a2   : > { %v3124_v28 = vadd.f32 %v6189_v14, %v3104_v16 }
 0x2a4   : > { %v3158_v0 = vadd.f32 %v3142_v54, %v3124_v28 }
 0x2a6   : > { %3174 = vst.msk [vmem:[%s3600_s27 + $0x68] sm:$0xff] %vm1728_vm5, %v3158_v0 }
 0x2a8   : > { %v3081_v20 = vpop.f32.mrf.mxu3 }
 0x2a9   : > { %v3105_v15 = vmul.f32 %v6182_v55, %v3081_v20 }
 0x2ab   : > { %v3125_v11 = vadd.f32 %v6189_v14, %v3105_v15 }
 0x2ad   : > { %v3159_v43 = vadd.f32 %v3143_v26, %v3125_v11 }
 0x2af   : > { %3175 = vst.msk [vmem:[%s3600_s27 + $0x70] sm:$0xff] %vm1728_vm5, %v3159_v43 }
 0x2b4   : > { %v3084_v40 = vpop.f32.mrf.mxu3 }
 0x2b5   : > { %v3106_v33 = vmul.f32 %v6182_v55, %v3084_v40 }
 0x2b7   : > { %v3126_v47 = vadd.f32 %v6189_v14, %v3106_v33 }
 0x2b9   : > { %v3160_v50 = vadd.f32 %v3144_v63, %v3126_v47 }
 0x2bb   : > { %3176 = vst.msk [vmem:[%s3600_s27 + $0x78] sm:$0xff] %vm1728_vm5, %v3160_v50 }
 0x2bc PF: > { %s23_s29 = sadd.s32 1, %s3480_s29   ;;  %s6460_s25 = sld [smem:[#allocation4_spill]] }
 0x2bd   : > { %p20_p8 = scmp.ge.s32.totalorder %s23_s29, 6   ;;  %s6461_s26 = sld [smem:[#allocation5_spill]] }
 0x2be   : > { %s6462_s27 = sld [smem:[#allocation6_spill]] }
 0x2bf   : > { %s6463_s28 = sld [smem:[#allocation7_spill]]  ;;  %22 = sbr.rel (!%p20_p8) target bundleno = 3 (0x3), region = 113 }

</bundles_post_ra>
